<compile_context>
chip_gen: v7x
topology: tpu7x:2x2x1
jax: 0.10.0
libtpu: 0.0.40
codegen_flags: <defaults>
</compile_context>

<pallas_src>
import jax
import jax.numpy as jnp
from jax.experimental import pallas as pl
from jax.experimental.pallas import tpu as pltpu

EPS = 1e-5
NEG_SLOPE = 0.2
LANE = 128                      # output-channel padding (lane-dense stores)
TILE_M_MAX = 512                # rows of the im2col matrix per grid step
VMEM_LIMIT = 32 * 1024 * 1024   # safe scoped-VMEM limit on v5e/v6e/v7x


def _round_up(x, m):
    return ((x + m - 1) // m) * m


def _plan_m(m):
    """Pick a sublane-aligned tile and padded M so tiles always divide M."""
    m_pad = _round_up(m, 8)
    tm = min(TILE_M_MAX, m_pad)
    m_pad = _round_up(m_pad, tm)
    return tm, m_pad, m_pad // tm


# ----------------------------------------------------------------------------
# Pallas kernels
# ----------------------------------------------------------------------------
def _make_cnr_kernel(num_m, m_real):
    """Fused conv(matmul) + BatchNorm(batch stats) + LeakyReLU(0.2) kernel.

    Grid is (2, num_m): phase 0 = matmul + stats (y kept in VMEM scratch),
    phase 1 = normalize + LeakyReLU + bf16 store. Both axes are sequential
    ("arbitrary") because the stats scratch accumulates across M tiles and
    phase 1 must see the finalized scale/shift.
    """
    inv_m = 1.0 / float(m_real)

    def kernel(p_ref, w_ref, gb_ref, o_ref, y_sc, stats_sc, ss_sc):
        phase = pl.program_id(0)
        mi = pl.program_id(1)

        @pl.when(phase == 0)
        def _matmul_and_stats():
            @pl.when(mi == 0)
            def _init():
                stats_sc[...] = jnp.zeros_like(stats_sc)

            y = jnp.dot(p_ref[...], w_ref[...],
                        preferred_element_type=jnp.float32)
            y_sc[mi] = y                                  # VMEM-resident y
            # Zero-padded rows of the patch matrix yield y == 0 and therefore
            # contribute exactly 0 to both sums; dividing by the real M below
            # keeps the batch statistics exact.
            stats_sc[0:1, :] += jnp.sum(y, axis=0, keepdims=True)
            stats_sc[1:2, :] += jnp.sum(y * y, axis=0, keepdims=True)

            @pl.when(mi == num_m - 1)
            def _finalize_bn():
                mean = stats_sc[0:1, :] * inv_m
                var = jnp.maximum(stats_sc[1:2, :] * inv_m - mean * mean, 0.0)
                inv = jax.lax.rsqrt(var + EPS)
                g = gb_ref[0:1, :]
                b = gb_ref[1:2, :]
                ss_sc[0:1, :] = g * inv
                ss_sc[1:2, :] = b - mean * (g * inv)

        @pl.when(phase == 1)
        def _normalize_lrelu():
            x = y_sc[mi] * ss_sc[0:1, :] + ss_sc[1:2, :]
            x = jnp.where(x > 0, x, NEG_SLOPE * x)
            o_ref[...] = x.astype(o_ref.dtype)

    return kernel


def _conv_sigmoid_kernel(p_ref, w_ref, o_ref):
    """Final layer: matmul + sigmoid (no norm / relu)."""
    y = jnp.dot(p_ref[...], w_ref[...], preferred_element_type=jnp.float32)
    o_ref[...] = jax.nn.sigmoid(y)


# ----------------------------------------------------------------------------
# Layout / patch plumbing (plain JAX, cheap)
# ----------------------------------------------------------------------------
def extract_patches(x, k, stride, pad):
    """x: (N, H, W, C) bf16 -> (N*OH*OW, k*k*C) bf16, K-order = (kh, kw, c)."""
    N, H, W, C = x.shape
    xp = jnp.pad(x, ((0, 0), (pad, pad), (pad, pad), (0, 0)))
    OH = (H + 2 * pad - k) // stride + 1
    OW = (W + 2 * pad - k) // stride + 1
    cols = []
    for kh in range(k):
        for kw in range(k):
            cols.append(xp[:, kh:kh + stride * OH:stride,
                           kw:kw + stride * OW:stride, :])
    patches = jnp.concatenate(cols, axis=-1)          # (N, OH, OW, k*k*C)
    return patches.reshape(N * OH * OW, k * k * C), OH, OW


def prep_weight(w, cout_pad):
    """w: (Cout, Cin, KH, KW) f32 -> (KH*KW*Cin, cout_pad) bf16.

    Contraction dim uses the REAL Cin (no zero padding); only the output dim
    is padded to the 128-lane width.
    """
    cout, cin, kh, kw = w.shape
    w2d = w.transpose(2, 3, 1, 0).reshape(kh * kw * cin, cout)
    w2d = jnp.pad(w2d, ((0, 0), (0, cout_pad - cout)))
    return w2d.astype(jnp.bfloat16)


# ----------------------------------------------------------------------------
# pallas_call wrappers
# ----------------------------------------------------------------------------
def conv_bn_lrelu_layer(x_nhwc, w, gamma, beta):
    """One CNR2d block (k=4, s=2, p=1, bnorm, LeakyReLU 0.2).

    x_nhwc: (N, H, W, Cin_real) bf16 -> (N, OH, OW, Cout_real) bf16.
    """
    N = x_nhwc.shape[0]
    cout = w.shape[0]
    cp = _round_up(max(cout, LANE), LANE)

    patches, OH, OW = extract_patches(x_nhwc, 4, 2, 1)     # (M, 16*cin_real)
    M, K = patches.shape
    tm, m_pad, num_m = _plan_m(M)
    if m_pad != M:
        patches = jnp.pad(patches, ((0, m_pad - M), (0, 0)))

    w2d = prep_weight(w, cp)                                # (K, cp) bf16
    gb = jnp.concatenate(
        [jnp.pad(gamma.reshape(1, -1), ((0, 0), (0, cp - cout))),
         jnp.pad(beta.reshape(1, -1), ((0, 0), (0, cp - cout)))],
        axis=0).astype(jnp.float32)                         # (2, cp) f32

    kernel = _make_cnr_kernel(num_m, M)
    out = pl.pallas_call(
        kernel,
        grid=(2, num_m),
        in_specs=[
            # Patches only stream through phase 0; weight / gamma-beta resident.
            pl.BlockSpec((tm, K), lambda p, m: (m * (1 - p), 0)),
            pl.BlockSpec((K, cp), lambda p, m: (0, 0)),
            pl.BlockSpec((2, cp), lambda p, m: (0, 0)),
        ],
        # Output only streams through phase 1.
        out_specs=pl.BlockSpec((tm, cp), lambda p, m: (m * p, 0)),
        out_shape=jax.ShapeDtypeStruct((m_pad, cp), jnp.bfloat16),
        scratch_shapes=[
            pltpu.VMEM((num_m, tm, cp), jnp.float32),   # y (conv accumulator)
            pltpu.VMEM((2, cp), jnp.float32),           # sum / sumsq
            pltpu.VMEM((2, cp), jnp.float32),           # scale / shift
        ],
        compiler_params=pltpu.CompilerParams(
            dimension_semantics=("arbitrary", "arbitrary"),
            vmem_limit_bytes=VMEM_LIMIT),
    )(patches, w2d, gb)

    # Lane-dense (cp=128) store in the kernel; slice back to the real channel
    # count so the next layer's contraction carries no zero padding.
    return out[:M].reshape(N, OH, OW, cp)[..., :cout]


def conv_sigmoid_layer(x_nhwc, w):
    """Final conv (k=4, s=1, p=1, no bias/norm/relu) + sigmoid; returns NCHW f32."""
    N = x_nhwc.shape[0]
    cout = w.shape[0]
    cp = _round_up(max(cout, LANE), LANE)

    patches, OH, OW = extract_patches(x_nhwc, 4, 1, 1)
    M, K = patches.shape
    tm, m_pad, num_m = _plan_m(M)
    if m_pad != M:
        patches = jnp.pad(patches, ((0, m_pad - M), (0, 0)))

    w2d = prep_weight(w, cp)

    y = pl.pallas_call(
        _conv_sigmoid_kernel,
        grid=(num_m,),
        in_specs=[
            pl.BlockSpec((tm, K), lambda m: (m, 0)),
            pl.BlockSpec((K, cp), lambda m: (0, 0)),
        ],
        out_specs=pl.BlockSpec((tm, cp), lambda m: (m, 0)),
        out_shape=jax.ShapeDtypeStruct((m_pad, cp), jnp.float32),
        compiler_params=pltpu.CompilerParams(
            dimension_semantics=("parallel",),
            vmem_limit_bytes=VMEM_LIMIT),
    )(patches, w2d)

    y = y[:M, :cout].reshape(N, OH, OW, cout)
    return jnp.transpose(y, (0, 3, 1, 2))


# ----------------------------------------------------------------------------
# Discriminator
# ----------------------------------------------------------------------------
def init_params(key, nch_in=3, nch_ker=8):
    chans = [nch_in, nch_ker, 2 * nch_ker, 4 * nch_ker, 8 * nch_ker, 1]
    params = []
    for li in range(5):
        key, kw, kg, kb = jax.random.split(key, 4)
        cin, cout = chans[li], chans[li + 1]
        w = 0.05 * jax.random.normal(kw, (cout, cin, 4, 4), jnp.float32)
        gamma = 1.0 + 0.1 * jax.random.normal(kg, (1, cout), jnp.float32)
        beta = 0.1 * jax.random.normal(kb, (1, cout), jnp.float32)
        params.append((w, gamma, beta))
    return params


@jax.jit
def discriminator_forward(x, params):
    """x: (N, C, H, W) f32 (PyTorch layout) -> (N, 1, OH, OW) f32."""
    a = jnp.transpose(x, (0, 2, 3, 1)).astype(jnp.bfloat16)   # one-time NHWC
    for li in range(4):
        w, g, b = params[li]
        a = conv_bn_lrelu_layer(a, w, g, b)
    w, _, _ = params[4]
    return conv_sigmoid_layer(a, w)


# ----------------------------------------------------------------------------
# Pure-JAX f32 reference (for correctness check)
# ----------------------------------------------------------------------------
def reference_forward(x, params):
    def conv(x, w, stride, pad):
        return jax.lax.conv_general_dilated(
            x, w, (stride, stride), [(pad, pad), (pad, pad)],
            dimension_numbers=("NCHW", "OIHW", "NCHW"))

    for li in range(4):
        w, g, b = params[li]
        x = conv(x, w, 2, 1)
        mean = jnp.mean(x, axis=(0, 2, 3), keepdims=True)
        var = jnp.mean((x - mean) ** 2, axis=(0, 2, 3), keepdims=True)
        x = (x - mean) * jax.lax.rsqrt(var + EPS)
        x = x * g.reshape(1, -1, 1, 1) + b.reshape(1, -1, 1, 1)
        x = jnp.where(x > 0, x, NEG_SLOPE * x)
    w, _, _ = params[4]
    x = conv(x, w, 1, 1)
    return jax.nn.sigmoid(x)


if __name__ == "__main__":
    key = jax.random.PRNGKey(0)
    kx, kp = jax.random.split(key)

    N, C, H, W = 2, 3, 32, 32      # smallest spatial size the 5-layer stack supports
    nch_ker = 8
    x = jax.random.normal(kx, (N, C, H, W), jnp.float32)
    params = init_params(kp, nch_in=C, nch_ker=nch_ker)

    out = jax.block_until_ready(discriminator_forward(x, params))
    ref = jax.block_until_ready(reference_forward(x, params))

    assert out.shape == (N, 1, 1, 1), out.shape
    assert out.dtype == jnp.float32
    # bf16 matmul inputs (f32 accumulation) over 5 layers -> loosened tolerance
    # vs. the pure-f32 reference; still catches structural/semantic bugs.
    assert jnp.allclose(out, ref, rtol=5e-2, atol=2.5e-2), (out, ref)

    print("KERNEL_OK")
</pallas_src>

<mosaic_0001>
module attributes {stable_mosaic.version = 11 : i64} {
  func.func @kernel(%arg0: i32, %arg1: i32, %arg2: memref<512x48xbf16, #tpu.memory_space<vmem>>, %arg3: memref<48x128xbf16, #tpu.memory_space<vmem>>, %arg4: memref<2x128xf32, #tpu.memory_space<vmem>>, %arg5: memref<512x128xbf16, #tpu.memory_space<vmem>>, %arg6: memref<1x512x128xf32, #tpu.memory_space<vmem>>, %arg7: memref<2x128xf32, #tpu.memory_space<vmem>>, %arg8: memref<2x128xf32, #tpu.memory_space<vmem>>) attributes {dimension_semantics = [#tpu.dimension_semantics<arbitrary>, #tpu.dimension_semantics<arbitrary>], iteration_bounds = array<i64: 2, 1>, scalar_prefetch = 0 : i64, scratch_operands = 3 : i64, tpu.core_type = #tpu.core_type<tc>, window_params = [{transform_indices = @transform_0, window_bounds = array<i64: 512, 48>}, {pipeline_mode = #tpu.pipeline_mode<synchronous>, transform_indices = @transform_1, window_bounds = array<i64: 48, 128>}, {pipeline_mode = #tpu.pipeline_mode<synchronous>, transform_indices = @transform_2, window_bounds = array<i64: 2, 128>}, {transform_indices = @transform_3, window_bounds = array<i64: 512, 128>}]} {
    %c0_i32 = arith.constant 0 : i32
    %0 = arith.cmpi eq, %arg0, %c0_i32 : i32
    %1 = arith.extui %0 : i1 to i32
    %c0_i32_0 = arith.constant 0 : i32
    %2 = arith.cmpi ne, %1, %c0_i32_0 : i32
    scf.if %2 {
      %c0_i32_2 = arith.constant 0 : i32
      %6 = arith.cmpi eq, %arg1, %c0_i32_2 : i32
      %7 = arith.extui %6 : i1 to i32
      %c0_i32_3 = arith.constant 0 : i32
      %8 = arith.cmpi ne, %7, %c0_i32_3 : i32
      scf.if %8 {
        %cst_20 = arith.constant 0.000000e+00 : f32
        %30 = vector.broadcast %cst_20 : f32 to vector<2x128xf32>
        %c0_21 = arith.constant 0 : index
        %c0_22 = arith.constant 0 : index
        %31 = vector.load %arg7[%c0_21, %c0_22] : memref<2x128xf32, #tpu.memory_space<vmem>>, vector<2x128xf32>
        tpu.vector_store %arg7[%c0_21, %c0_22], %30 {strides = array<i32>} : memref<2x128xf32, #tpu.memory_space<vmem>>, vector<2x128xf32>,
      } else {
      }
      %c0 = arith.constant 0 : index
      %c0_4 = arith.constant 0 : index
      %9 = vector.load %arg2[%c0, %c0_4] : memref<512x48xbf16, #tpu.memory_space<vmem>>, vector<512x48xbf16>
      %c0_5 = arith.constant 0 : index
      %c0_6 = arith.constant 0 : index
      %10 = vector.load %arg3[%c0_5, %c0_6] : memref<48x128xbf16, #tpu.memory_space<vmem>>, vector<48x128xbf16>
      %cst = arith.constant dense<0.000000e+00> : vector<512x128xf32>
      %11 = tpu.matmul %9, %10, %cst {dimension_numbers = #tpu.dot_dimension_numbers<[1], [0], [0], [1], [0, 0, 1, 1], [], []>} : vector<512x48xbf16>, vector<48x128xbf16>, vector<512x128xf32> -> vector<512x128xf32>
      %12 = arith.index_cast %arg1 : i32 to index
      %c0_7 = arith.constant 0 : index
      %c0_8 = arith.constant 0 : index
      %13 = vector.load %arg6[%12, %c0_7, %c0_8] : memref<1x512x128xf32, #tpu.memory_space<vmem>>, vector<1x512x128xf32>
      %14 = vector.shape_cast %13 : vector<1x512x128xf32> to vector<512x128xf32>
      %15 = vector.shape_cast %11 : vector<512x128xf32> to vector<1x512x128xf32>
      tpu.vector_store %arg6[%12, %c0_7, %c0_8], %15 {strides = array<i32>} : memref<1x512x128xf32, #tpu.memory_space<vmem>>, vector<1x512x128xf32>,
      %c0_9 = arith.constant 0 : index
      %c0_10 = arith.constant 0 : index
      %16 = vector.load %arg7[%c0_9, %c0_10] : memref<2x128xf32, #tpu.memory_space<vmem>>, vector<1x128xf32>
      %cst_11 = arith.constant dense<0.000000e+00> : vector<128xf32>
      %17 = vector.multi_reduction <add>, %11, %cst_11 [0] : vector<512x128xf32> to vector<128xf32>
      %18 = vector.shape_cast %17 : vector<128xf32> to vector<1x128xf32>
      %19 = arith.addf %16, %18 : vector<1x128xf32>
      %c0_12 = arith.constant 0 : index
      %c0_13 = arith.constant 0 : index
      %20 = vector.load %arg7[%c0_12, %c0_13] : memref<2x128xf32, #tpu.memory_space<vmem>>, vector<1x128xf32>
      tpu.vector_store %arg7[%c0_12, %c0_13], %19 {strides = array<i32>} : memref<2x128xf32, #tpu.memory_space<vmem>>, vector<1x128xf32>,
      %c1 = arith.constant 1 : index
      %c0_14 = arith.constant 0 : index
      %21 = vector.load %arg7[%c1, %c0_14] : memref<2x128xf32, #tpu.memory_space<vmem>>, vector<1x128xf32>
      %22 = arith.mulf %11, %11 : vector<512x128xf32>
      %cst_15 = arith.constant dense<0.000000e+00> : vector<128xf32>
      %23 = vector.multi_reduction <add>, %22, %cst_15 [0] : vector<512x128xf32> to vector<128xf32>
      %24 = vector.shape_cast %23 : vector<128xf32> to vector<1x128xf32>
      %25 = arith.addf %21, %24 : vector<1x128xf32>
      %c1_16 = arith.constant 1 : index
      %c0_17 = arith.constant 0 : index
      %26 = vector.load %arg7[%c1_16, %c0_17] : memref<2x128xf32, #tpu.memory_space<vmem>>, vector<1x128xf32>
      tpu.vector_store %arg7[%c1_16, %c0_17], %25 {strides = array<i32>} : memref<2x128xf32, #tpu.memory_space<vmem>>, vector<1x128xf32>,
      %c0_i32_18 = arith.constant 0 : i32
      %27 = arith.cmpi eq, %arg1, %c0_i32_18 : i32
      %28 = arith.extui %27 : i1 to i32
      %c0_i32_19 = arith.constant 0 : i32
      %29 = arith.cmpi ne, %28, %c0_i32_19 : i32
      scf.if %29 {
        %c0_20 = arith.constant 0 : index
        %c0_21 = arith.constant 0 : index
        %30 = vector.load %arg7[%c0_20, %c0_21] : memref<2x128xf32, #tpu.memory_space<vmem>>, vector<1x128xf32>
        %cst_22 = arith.constant 0.001953125 : f32
        %31 = vector.broadcast %cst_22 : f32 to vector<1x128xf32>
        %32 = arith.mulf %30, %31 : vector<1x128xf32>
        %c1_23 = arith.constant 1 : index
        %c0_24 = arith.constant 0 : index
        %33 = vector.load %arg7[%c1_23, %c0_24] : memref<2x128xf32, #tpu.memory_space<vmem>>, vector<1x128xf32>
        %cst_25 = arith.constant 0.001953125 : f32
        %34 = vector.broadcast %cst_25 : f32 to vector<1x128xf32>
        %35 = arith.mulf %33, %34 : vector<1x128xf32>
        %36 = arith.mulf %32, %32 : vector<1x128xf32>
        %37 = arith.subf %35, %36 : vector<1x128xf32>
        %cst_26 = arith.constant 0.000000e+00 : f32
        %38 = vector.broadcast %cst_26 : f32 to vector<1x128xf32>
        %39 = arith.maximumf %37, %38 : vector<1x128xf32>
        %cst_27 = arith.constant 9.99999974E-6 : f32
        %40 = vector.broadcast %cst_27 : f32 to vector<1x128xf32>
        %41 = arith.addf %39, %40 : vector<1x128xf32>
        %42 = math.rsqrt %41 : vector<1x128xf32>
        %c0_28 = arith.constant 0 : index
        %c0_29 = arith.constant 0 : index
        %43 = vector.load %arg4[%c0_28, %c0_29] : memref<2x128xf32, #tpu.memory_space<vmem>>, vector<1x128xf32>
        %c1_30 = arith.constant 1 : index
        %c0_31 = arith.constant 0 : index
        %44 = vector.load %arg4[%c1_30, %c0_31] : memref<2x128xf32, #tpu.memory_space<vmem>>, vector<1x128xf32>
        %45 = arith.mulf %43, %42 : vector<1x128xf32>
        %c0_32 = arith.constant 0 : index
        %c0_33 = arith.constant 0 : index
        %46 = vector.load %arg8[%c0_32, %c0_33] : memref<2x128xf32, #tpu.memory_space<vmem>>, vector<1x128xf32>
        tpu.vector_store %arg8[%c0_32, %c0_33], %45 {strides = array<i32>} : memref<2x128xf32, #tpu.memory_space<vmem>>, vector<1x128xf32>,
        %47 = arith.mulf %43, %42 : vector<1x128xf32>
        %48 = arith.mulf %32, %47 : vector<1x128xf32>
        %49 = arith.subf %44, %48 : vector<1x128xf32>
        %c1_34 = arith.constant 1 : index
        %c0_35 = arith.constant 0 : index
        %50 = vector.load %arg8[%c1_34, %c0_35] : memref<2x128xf32, #tpu.memory_space<vmem>>, vector<1x128xf32>
        tpu.vector_store %arg8[%c1_34, %c0_35], %49 {strides = array<i32>} : memref<2x128xf32, #tpu.memory_space<vmem>>, vector<1x128xf32>,
      } else {
      }
    } else {
    }
    %c1_i32 = arith.constant 1 : i32
    %3 = arith.cmpi eq, %arg0, %c1_i32 : i32
    %4 = arith.extui %3 : i1 to i32
    %c0_i32_1 = arith.constant 0 : i32
    %5 = arith.cmpi ne, %4, %c0_i32_1 : i32
    scf.if %5 {
      %6 = arith.index_cast %arg1 : i32 to index
      %c0 = arith.constant 0 : index
      %c0_2 = arith.constant 0 : index
      %7 = vector.load %arg6[%6, %c0, %c0_2] : memref<1x512x128xf32, #tpu.memory_space<vmem>>, vector<1x512x128xf32>
      %8 = vector.shape_cast %7 : vector<1x512x128xf32> to vector<512x128xf32>
      %c0_3 = arith.constant 0 : index
      %c0_4 = arith.constant 0 : index
      %9 = vector.load %arg8[%c0_3, %c0_4] : memref<2x128xf32, #tpu.memory_space<vmem>>, vector<1x128xf32>
      %10 = vector.broadcast %9 : vector<1x128xf32> to vector<512x128xf32>
      %11 = arith.mulf %8, %10 : vector<512x128xf32>
      %c1 = arith.constant 1 : index
      %c0_5 = arith.constant 0 : index
      %12 = vector.load %arg8[%c1, %c0_5] : memref<2x128xf32, #tpu.memory_space<vmem>>, vector<1x128xf32>
      %13 = vector.broadcast %12 : vector<1x128xf32> to vector<512x128xf32>
      %14 = arith.addf %11, %13 : vector<512x128xf32>
      %cst = arith.constant 0.000000e+00 : f32
      %15 = vector.broadcast %cst : f32 to vector<512x128xf32>
      %16 = arith.cmpf ogt, %14, %15 : vector<512x128xf32>
      %cst_6 = arith.constant 2.000000e-01 : f32
      %17 = vector.broadcast %cst_6 : f32 to vector<512x128xf32>
      %18 = arith.mulf %17, %14 : vector<512x128xf32>
      %19 = arith.select %16, %14, %18 : vector<512x128xi1>, vector<512x128xf32>
      %20 = arith.truncf %19 : vector<512x128xf32> to vector<512x128xbf16>
      %c0_7 = arith.constant 0 : index
      %c0_8 = arith.constant 0 : index
      %21 = vector.load %arg5[%c0_7, %c0_8] : memref<512x128xbf16, #tpu.memory_space<vmem>>, vector<512x128xbf16>
      tpu.vector_store %arg5[%c0_7, %c0_8], %20 {strides = array<i32>} : memref<512x128xbf16, #tpu.memory_space<vmem>>, vector<512x128xbf16>,
    } else {
    }
    return
  }
  func.func @transform_0(%arg0: i32, %arg1: i32) -> (i32, i32) {
    %c1_i32 = arith.constant 1 : i32
    %0 = arith.subi %c1_i32, %arg0 : i32
    %1 = arith.muli %arg1, %0 : i32
    %c0_i32 = arith.constant 0 : i32
    %c0_i32_0 = arith.constant 0 : i32
    return %1, %c0_i32 : i32, i32
  }
  func.func @transform_1(%arg0: i32, %arg1: i32) -> (i32, i32) {
    %c0_i32 = arith.constant 0 : i32
    %c0_i32_0 = arith.constant 0 : i32
    %c0_i32_1 = arith.constant 0 : i32
    return %c0_i32, %c0_i32_0 : i32, i32
  }
  func.func @transform_2(%arg0: i32, %arg1: i32) -> (i32, i32) {
    %c0_i32 = arith.constant 0 : i32
    %c0_i32_0 = arith.constant 0 : i32
    %c0_i32_1 = arith.constant 0 : i32
    return %c0_i32, %c0_i32_0 : i32, i32
  }
  func.func @transform_3(%arg0: i32, %arg1: i32) -> (i32, i32) {
    %0 = arith.muli %arg1, %arg0 : i32
    %c0_i32 = arith.constant 0 : i32
    %c0_i32_0 = arith.constant 0 : i32
    return %0, %c0_i32 : i32, i32
  }
}

module attributes {stable_mosaic.version = 11 : i64} {
  func.func @kernel(%arg0: i32, %arg1: i32, %arg2: memref<128x128xbf16, #tpu.memory_space<vmem>>, %arg3: memref<128x128xbf16, #tpu.memory_space<vmem>>, %arg4: memref<2x128xf32, #tpu.memory_space<vmem>>, %arg5: memref<128x128xbf16, #tpu.memory_space<vmem>>, %arg6: memref<1x128x128xf32, #tpu.memory_space<vmem>>, %arg7: memref<2x128xf32, #tpu.memory_space<vmem>>, %arg8: memref<2x128xf32, #tpu.memory_space<vmem>>) attributes {dimension_semantics = [#tpu.dimension_semantics<arbitrary>, #tpu.dimension_semantics<arbitrary>], iteration_bounds = array<i64: 2, 1>, scalar_prefetch = 0 : i64, scratch_operands = 3 : i64, tpu.core_type = #tpu.core_type<tc>, window_params = [{transform_indices = @transform_0, window_bounds = array<i64: 128, 128>}, {pipeline_mode = #tpu.pipeline_mode<synchronous>, transform_indices = @transform_1, window_bounds = array<i64: 128, 128>}, {pipeline_mode = #tpu.pipeline_mode<synchronous>, transform_indices = @transform_2, window_bounds = array<i64: 2, 128>}, {transform_indices = @transform_3, window_bounds = array<i64: 128, 128>}]} {
    %c0_i32 = arith.constant 0 : i32
    %0 = arith.cmpi eq, %arg0, %c0_i32 : i32
    %1 = arith.extui %0 : i1 to i32
    %c0_i32_0 = arith.constant 0 : i32
    %2 = arith.cmpi ne, %1, %c0_i32_0 : i32
    scf.if %2 {
      %c0_i32_2 = arith.constant 0 : i32
      %6 = arith.cmpi eq, %arg1, %c0_i32_2 : i32
      %7 = arith.extui %6 : i1 to i32
      %c0_i32_3 = arith.constant 0 : i32
      %8 = arith.cmpi ne, %7, %c0_i32_3 : i32
      scf.if %8 {
        %cst_20 = arith.constant 0.000000e+00 : f32
        %30 = vector.broadcast %cst_20 : f32 to vector<2x128xf32>
        %c0_21 = arith.constant 0 : index
        %c0_22 = arith.constant 0 : index
        %31 = vector.load %arg7[%c0_21, %c0_22] : memref<2x128xf32, #tpu.memory_space<vmem>>, vector<2x128xf32>
        tpu.vector_store %arg7[%c0_21, %c0_22], %30 {strides = array<i32>} : memref<2x128xf32, #tpu.memory_space<vmem>>, vector<2x128xf32>,
      } else {
      }
      %c0 = arith.constant 0 : index
      %c0_4 = arith.constant 0 : index
      %9 = vector.load %arg2[%c0, %c0_4] : memref<128x128xbf16, #tpu.memory_space<vmem>>, vector<128x128xbf16>
      %c0_5 = arith.constant 0 : index
      %c0_6 = arith.constant 0 : index
      %10 = vector.load %arg3[%c0_5, %c0_6] : memref<128x128xbf16, #tpu.memory_space<vmem>>, vector<128x128xbf16>
      %cst = arith.constant dense<0.000000e+00> : vector<128x128xf32>
      %11 = tpu.matmul %9, %10, %cst {dimension_numbers = #tpu.dot_dimension_numbers<[1], [0], [0], [1], [0, 0, 1, 1], [], []>} : vector<128x128xbf16>, vector<128x128xbf16>, vector<128x128xf32> -> vector<128x128xf32>
      %12 = arith.index_cast %arg1 : i32 to index
      %c0_7 = arith.constant 0 : index
      %c0_8 = arith.constant 0 : index
      %13 = vector.load %arg6[%12, %c0_7, %c0_8] : memref<1x128x128xf32, #tpu.memory_space<vmem>>, vector<1x128x128xf32>
      %14 = vector.shape_cast %13 : vector<1x128x128xf32> to vector<128x128xf32>
      %15 = vector.shape_cast %11 : vector<128x128xf32> to vector<1x128x128xf32>
      tpu.vector_store %arg6[%12, %c0_7, %c0_8], %15 {strides = array<i32>} : memref<1x128x128xf32, #tpu.memory_space<vmem>>, vector<1x128x128xf32>,
      %c0_9 = arith.constant 0 : index
      %c0_10 = arith.constant 0 : index
      %16 = vector.load %arg7[%c0_9, %c0_10] : memref<2x128xf32, #tpu.memory_space<vmem>>, vector<1x128xf32>
      %cst_11 = arith.constant dense<0.000000e+00> : vector<128xf32>
      %17 = vector.multi_reduction <add>, %11, %cst_11 [0] : vector<128x128xf32> to vector<128xf32>
      %18 = vector.shape_cast %17 : vector<128xf32> to vector<1x128xf32>
      %19 = arith.addf %16, %18 : vector<1x128xf32>
      %c0_12 = arith.constant 0 : index
      %c0_13 = arith.constant 0 : index
      %20 = vector.load %arg7[%c0_12, %c0_13] : memref<2x128xf32, #tpu.memory_space<vmem>>, vector<1x128xf32>
      tpu.vector_store %arg7[%c0_12, %c0_13], %19 {strides = array<i32>} : memref<2x128xf32, #tpu.memory_space<vmem>>, vector<1x128xf32>,
      %c1 = arith.constant 1 : index
      %c0_14 = arith.constant 0 : index
      %21 = vector.load %arg7[%c1, %c0_14] : memref<2x128xf32, #tpu.memory_space<vmem>>, vector<1x128xf32>
      %22 = arith.mulf %11, %11 : vector<128x128xf32>
      %cst_15 = arith.constant dense<0.000000e+00> : vector<128xf32>
      %23 = vector.multi_reduction <add>, %22, %cst_15 [0] : vector<128x128xf32> to vector<128xf32>
      %24 = vector.shape_cast %23 : vector<128xf32> to vector<1x128xf32>
      %25 = arith.addf %21, %24 : vector<1x128xf32>
      %c1_16 = arith.constant 1 : index
      %c0_17 = arith.constant 0 : index
      %26 = vector.load %arg7[%c1_16, %c0_17] : memref<2x128xf32, #tpu.memory_space<vmem>>, vector<1x128xf32>
      tpu.vector_store %arg7[%c1_16, %c0_17], %25 {strides = array<i32>} : memref<2x128xf32, #tpu.memory_space<vmem>>, vector<1x128xf32>,
      %c0_i32_18 = arith.constant 0 : i32
      %27 = arith.cmpi eq, %arg1, %c0_i32_18 : i32
      %28 = arith.extui %27 : i1 to i32
      %c0_i32_19 = arith.constant 0 : i32
      %29 = arith.cmpi ne, %28, %c0_i32_19 : i32
      scf.if %29 {
        %c0_20 = arith.constant 0 : index
        %c0_21 = arith.constant 0 : index
        %30 = vector.load %arg7[%c0_20, %c0_21] : memref<2x128xf32, #tpu.memory_space<vmem>>, vector<1x128xf32>
        %cst_22 = arith.constant 7.812500e-03 : f32
        %31 = vector.broadcast %cst_22 : f32 to vector<1x128xf32>
        %32 = arith.mulf %30, %31 : vector<1x128xf32>
        %c1_23 = arith.constant 1 : index
        %c0_24 = arith.constant 0 : index
        %33 = vector.load %arg7[%c1_23, %c0_24] : memref<2x128xf32, #tpu.memory_space<vmem>>, vector<1x128xf32>
        %cst_25 = arith.constant 7.812500e-03 : f32
        %34 = vector.broadcast %cst_25 : f32 to vector<1x128xf32>
        %35 = arith.mulf %33, %34 : vector<1x128xf32>
        %36 = arith.mulf %32, %32 : vector<1x128xf32>
        %37 = arith.subf %35, %36 : vector<1x128xf32>
        %cst_26 = arith.constant 0.000000e+00 : f32
        %38 = vector.broadcast %cst_26 : f32 to vector<1x128xf32>
        %39 = arith.maximumf %37, %38 : vector<1x128xf32>
        %cst_27 = arith.constant 9.99999974E-6 : f32
        %40 = vector.broadcast %cst_27 : f32 to vector<1x128xf32>
        %41 = arith.addf %39, %40 : vector<1x128xf32>
        %42 = math.rsqrt %41 : vector<1x128xf32>
        %c0_28 = arith.constant 0 : index
        %c0_29 = arith.constant 0 : index
        %43 = vector.load %arg4[%c0_28, %c0_29] : memref<2x128xf32, #tpu.memory_space<vmem>>, vector<1x128xf32>
        %c1_30 = arith.constant 1 : index
        %c0_31 = arith.constant 0 : index
        %44 = vector.load %arg4[%c1_30, %c0_31] : memref<2x128xf32, #tpu.memory_space<vmem>>, vector<1x128xf32>
        %45 = arith.mulf %43, %42 : vector<1x128xf32>
        %c0_32 = arith.constant 0 : index
        %c0_33 = arith.constant 0 : index
        %46 = vector.load %arg8[%c0_32, %c0_33] : memref<2x128xf32, #tpu.memory_space<vmem>>, vector<1x128xf32>
        tpu.vector_store %arg8[%c0_32, %c0_33], %45 {strides = array<i32>} : memref<2x128xf32, #tpu.memory_space<vmem>>, vector<1x128xf32>,
        %47 = arith.mulf %43, %42 : vector<1x128xf32>
        %48 = arith.mulf %32, %47 : vector<1x128xf32>
        %49 = arith.subf %44, %48 : vector<1x128xf32>
        %c1_34 = arith.constant 1 : index
        %c0_35 = arith.constant 0 : index
        %50 = vector.load %arg8[%c1_34, %c0_35] : memref<2x128xf32, #tpu.memory_space<vmem>>, vector<1x128xf32>
        tpu.vector_store %arg8[%c1_34, %c0_35], %49 {strides = array<i32>} : memref<2x128xf32, #tpu.memory_space<vmem>>, vector<1x128xf32>,
      } else {
      }
    } else {
    }
    %c1_i32 = arith.constant 1 : i32
    %3 = arith.cmpi eq, %arg0, %c1_i32 : i32
    %4 = arith.extui %3 : i1 to i32
    %c0_i32_1 = arith.constant 0 : i32
    %5 = arith.cmpi ne, %4, %c0_i32_1 : i32
    scf.if %5 {
      %6 = arith.index_cast %arg1 : i32 to index
      %c0 = arith.constant 0 : index
      %c0_2 = arith.constant 0 : index
      %7 = vector.load %arg6[%6, %c0, %c0_2] : memref<1x128x128xf32, #tpu.memory_space<vmem>>, vector<1x128x128xf32>
      %8 = vector.shape_cast %7 : vector<1x128x128xf32> to vector<128x128xf32>
      %c0_3 = arith.constant 0 : index
      %c0_4 = arith.constant 0 : index
      %9 = vector.load %arg8[%c0_3, %c0_4] : memref<2x128xf32, #tpu.memory_space<vmem>>, vector<1x128xf32>
      %10 = vector.broadcast %9 : vector<1x128xf32> to vector<128x128xf32>
      %11 = arith.mulf %8, %10 : vector<128x128xf32>
      %c1 = arith.constant 1 : index
      %c0_5 = arith.constant 0 : index
      %12 = vector.load %arg8[%c1, %c0_5] : memref<2x128xf32, #tpu.memory_space<vmem>>, vector<1x128xf32>
      %13 = vector.broadcast %12 : vector<1x128xf32> to vector<128x128xf32>
      %14 = arith.addf %11, %13 : vector<128x128xf32>
      %cst = arith.constant 0.000000e+00 : f32
      %15 = vector.broadcast %cst : f32 to vector<128x128xf32>
      %16 = arith.cmpf ogt, %14, %15 : vector<128x128xf32>
      %cst_6 = arith.constant 2.000000e-01 : f32
      %17 = vector.broadcast %cst_6 : f32 to vector<128x128xf32>
      %18 = arith.mulf %17, %14 : vector<128x128xf32>
      %19 = arith.select %16, %14, %18 : vector<128x128xi1>, vector<128x128xf32>
      %20 = arith.truncf %19 : vector<128x128xf32> to vector<128x128xbf16>
      %c0_7 = arith.constant 0 : index
      %c0_8 = arith.constant 0 : index
      %21 = vector.load %arg5[%c0_7, %c0_8] : memref<128x128xbf16, #tpu.memory_space<vmem>>, vector<128x128xbf16>
      tpu.vector_store %arg5[%c0_7, %c0_8], %20 {strides = array<i32>} : memref<128x128xbf16, #tpu.memory_space<vmem>>, vector<128x128xbf16>,
    } else {
    }
    return
  }
  func.func @transform_0(%arg0: i32, %arg1: i32) -> (i32, i32) {
    %c1_i32 = arith.constant 1 : i32
    %0 = arith.subi %c1_i32, %arg0 : i32
    %1 = arith.muli %arg1, %0 : i32
    %c0_i32 = arith.constant 0 : i32
    %c0_i32_0 = arith.constant 0 : i32
    return %1, %c0_i32 : i32, i32
  }
  func.func @transform_1(%arg0: i32, %arg1: i32) -> (i32, i32) {
    %c0_i32 = arith.constant 0 : i32
    %c0_i32_0 = arith.constant 0 : i32
    %c0_i32_1 = arith.constant 0 : i32
    return %c0_i32, %c0_i32_0 : i32, i32
  }
  func.func @transform_2(%arg0: i32, %arg1: i32) -> (i32, i32) {
    %c0_i32 = arith.constant 0 : i32
    %c0_i32_0 = arith.constant 0 : i32
    %c0_i32_1 = arith.constant 0 : i32
    return %c0_i32, %c0_i32_0 : i32, i32
  }
  func.func @transform_3(%arg0: i32, %arg1: i32) -> (i32, i32) {
    %0 = arith.muli %arg1, %arg0 : i32
    %c0_i32 = arith.constant 0 : i32
    %c0_i32_0 = arith.constant 0 : i32
    return %0, %c0_i32 : i32, i32
  }
}

module attributes {stable_mosaic.version = 11 : i64} {
  func.func @kernel(%arg0: i32, %arg1: i32, %arg2: memref<32x256xbf16, #tpu.memory_space<vmem>>, %arg3: memref<256x128xbf16, #tpu.memory_space<vmem>>, %arg4: memref<2x128xf32, #tpu.memory_space<vmem>>, %arg5: memref<32x128xbf16, #tpu.memory_space<vmem>>, %arg6: memref<1x32x128xf32, #tpu.memory_space<vmem>>, %arg7: memref<2x128xf32, #tpu.memory_space<vmem>>, %arg8: memref<2x128xf32, #tpu.memory_space<vmem>>) attributes {dimension_semantics = [#tpu.dimension_semantics<arbitrary>, #tpu.dimension_semantics<arbitrary>], iteration_bounds = array<i64: 2, 1>, scalar_prefetch = 0 : i64, scratch_operands = 3 : i64, tpu.core_type = #tpu.core_type<tc>, window_params = [{transform_indices = @transform_0, window_bounds = array<i64: 32, 256>}, {pipeline_mode = #tpu.pipeline_mode<synchronous>, transform_indices = @transform_1, window_bounds = array<i64: 256, 128>}, {pipeline_mode = #tpu.pipeline_mode<synchronous>, transform_indices = @transform_2, window_bounds = array<i64: 2, 128>}, {transform_indices = @transform_3, window_bounds = array<i64: 32, 128>}]} {
    %c0_i32 = arith.constant 0 : i32
    %0 = arith.cmpi eq, %arg0, %c0_i32 : i32
    %1 = arith.extui %0 : i1 to i32
    %c0_i32_0 = arith.constant 0 : i32
    %2 = arith.cmpi ne, %1, %c0_i32_0 : i32
    scf.if %2 {
      %c0_i32_2 = arith.constant 0 : i32
      %6 = arith.cmpi eq, %arg1, %c0_i32_2 : i32
      %7 = arith.extui %6 : i1 to i32
      %c0_i32_3 = arith.constant 0 : i32
      %8 = arith.cmpi ne, %7, %c0_i32_3 : i32
      scf.if %8 {
        %cst_20 = arith.constant 0.000000e+00 : f32
        %30 = vector.broadcast %cst_20 : f32 to vector<2x128xf32>
        %c0_21 = arith.constant 0 : index
        %c0_22 = arith.constant 0 : index
        %31 = vector.load %arg7[%c0_21, %c0_22] : memref<2x128xf32, #tpu.memory_space<vmem>>, vector<2x128xf32>
        tpu.vector_store %arg7[%c0_21, %c0_22], %30 {strides = array<i32>} : memref<2x128xf32, #tpu.memory_space<vmem>>, vector<2x128xf32>,
      } else {
      }
      %c0 = arith.constant 0 : index
      %c0_4 = arith.constant 0 : index
      %9 = vector.load %arg2[%c0, %c0_4] : memref<32x256xbf16, #tpu.memory_space<vmem>>, vector<32x256xbf16>
      %c0_5 = arith.constant 0 : index
      %c0_6 = arith.constant 0 : index
      %10 = vector.load %arg3[%c0_5, %c0_6] : memref<256x128xbf16, #tpu.memory_space<vmem>>, vector<256x128xbf16>
      %cst = arith.constant dense<0.000000e+00> : vector<32x128xf32>
      %11 = tpu.matmul %9, %10, %cst {dimension_numbers = #tpu.dot_dimension_numbers<[1], [0], [0], [1], [0, 0, 1, 1], [], []>} : vector<32x256xbf16>, vector<256x128xbf16>, vector<32x128xf32> -> vector<32x128xf32>
      %12 = arith.index_cast %arg1 : i32 to index
      %c0_7 = arith.constant 0 : index
      %c0_8 = arith.constant 0 : index
      %13 = vector.load %arg6[%12, %c0_7, %c0_8] : memref<1x32x128xf32, #tpu.memory_space<vmem>>, vector<1x32x128xf32>
      %14 = vector.shape_cast %13 : vector<1x32x128xf32> to vector<32x128xf32>
      %15 = vector.shape_cast %11 : vector<32x128xf32> to vector<1x32x128xf32>
      tpu.vector_store %arg6[%12, %c0_7, %c0_8], %15 {strides = array<i32>} : memref<1x32x128xf32, #tpu.memory_space<vmem>>, vector<1x32x128xf32>,
      %c0_9 = arith.constant 0 : index
      %c0_10 = arith.constant 0 : index
      %16 = vector.load %arg7[%c0_9, %c0_10] : memref<2x128xf32, #tpu.memory_space<vmem>>, vector<1x128xf32>
      %cst_11 = arith.constant dense<0.000000e+00> : vector<128xf32>
      %17 = vector.multi_reduction <add>, %11, %cst_11 [0] : vector<32x128xf32> to vector<128xf32>
      %18 = vector.shape_cast %17 : vector<128xf32> to vector<1x128xf32>
      %19 = arith.addf %16, %18 : vector<1x128xf32>
      %c0_12 = arith.constant 0 : index
      %c0_13 = arith.constant 0 : index
      %20 = vector.load %arg7[%c0_12, %c0_13] : memref<2x128xf32, #tpu.memory_space<vmem>>, vector<1x128xf32>
      tpu.vector_store %arg7[%c0_12, %c0_13], %19 {strides = array<i32>} : memref<2x128xf32, #tpu.memory_space<vmem>>, vector<1x128xf32>,
      %c1 = arith.constant 1 : index
      %c0_14 = arith.constant 0 : index
      %21 = vector.load %arg7[%c1, %c0_14] : memref<2x128xf32, #tpu.memory_space<vmem>>, vector<1x128xf32>
      %22 = arith.mulf %11, %11 : vector<32x128xf32>
      %cst_15 = arith.constant dense<0.000000e+00> : vector<128xf32>
      %23 = vector.multi_reduction <add>, %22, %cst_15 [0] : vector<32x128xf32> to vector<128xf32>
      %24 = vector.shape_cast %23 : vector<128xf32> to vector<1x128xf32>
      %25 = arith.addf %21, %24 : vector<1x128xf32>
      %c1_16 = arith.constant 1 : index
      %c0_17 = arith.constant 0 : index
      %26 = vector.load %arg7[%c1_16, %c0_17] : memref<2x128xf32, #tpu.memory_space<vmem>>, vector<1x128xf32>
      tpu.vector_store %arg7[%c1_16, %c0_17], %25 {strides = array<i32>} : memref<2x128xf32, #tpu.memory_space<vmem>>, vector<1x128xf32>,
      %c0_i32_18 = arith.constant 0 : i32
      %27 = arith.cmpi eq, %arg1, %c0_i32_18 : i32
      %28 = arith.extui %27 : i1 to i32
      %c0_i32_19 = arith.constant 0 : i32
      %29 = arith.cmpi ne, %28, %c0_i32_19 : i32
      scf.if %29 {
        %c0_20 = arith.constant 0 : index
        %c0_21 = arith.constant 0 : index
        %30 = vector.load %arg7[%c0_20, %c0_21] : memref<2x128xf32, #tpu.memory_space<vmem>>, vector<1x128xf32>
        %cst_22 = arith.constant 3.125000e-02 : f32
        %31 = vector.broadcast %cst_22 : f32 to vector<1x128xf32>
        %32 = arith.mulf %30, %31 : vector<1x128xf32>
        %c1_23 = arith.constant 1 : index
        %c0_24 = arith.constant 0 : index
        %33 = vector.load %arg7[%c1_23, %c0_24] : memref<2x128xf32, #tpu.memory_space<vmem>>, vector<1x128xf32>
        %cst_25 = arith.constant 3.125000e-02 : f32
        %34 = vector.broadcast %cst_25 : f32 to vector<1x128xf32>
        %35 = arith.mulf %33, %34 : vector<1x128xf32>
        %36 = arith.mulf %32, %32 : vector<1x128xf32>
        %37 = arith.subf %35, %36 : vector<1x128xf32>
        %cst_26 = arith.constant 0.000000e+00 : f32
        %38 = vector.broadcast %cst_26 : f32 to vector<1x128xf32>
        %39 = arith.maximumf %37, %38 : vector<1x128xf32>
        %cst_27 = arith.constant 9.99999974E-6 : f32
        %40 = vector.broadcast %cst_27 : f32 to vector<1x128xf32>
        %41 = arith.addf %39, %40 : vector<1x128xf32>
        %42 = math.rsqrt %41 : vector<1x128xf32>
        %c0_28 = arith.constant 0 : index
        %c0_29 = arith.constant 0 : index
        %43 = vector.load %arg4[%c0_28, %c0_29] : memref<2x128xf32, #tpu.memory_space<vmem>>, vector<1x128xf32>
        %c1_30 = arith.constant 1 : index
        %c0_31 = arith.constant 0 : index
        %44 = vector.load %arg4[%c1_30, %c0_31] : memref<2x128xf32, #tpu.memory_space<vmem>>, vector<1x128xf32>
        %45 = arith.mulf %43, %42 : vector<1x128xf32>
        %c0_32 = arith.constant 0 : index
        %c0_33 = arith.constant 0 : index
        %46 = vector.load %arg8[%c0_32, %c0_33] : memref<2x128xf32, #tpu.memory_space<vmem>>, vector<1x128xf32>
        tpu.vector_store %arg8[%c0_32, %c0_33], %45 {strides = array<i32>} : memref<2x128xf32, #tpu.memory_space<vmem>>, vector<1x128xf32>,
        %47 = arith.mulf %43, %42 : vector<1x128xf32>
        %48 = arith.mulf %32, %47 : vector<1x128xf32>
        %49 = arith.subf %44, %48 : vector<1x128xf32>
        %c1_34 = arith.constant 1 : index
        %c0_35 = arith.constant 0 : index
        %50 = vector.load %arg8[%c1_34, %c0_35] : memref<2x128xf32, #tpu.memory_space<vmem>>, vector<1x128xf32>
        tpu.vector_store %arg8[%c1_34, %c0_35], %49 {strides = array<i32>} : memref<2x128xf32, #tpu.memory_space<vmem>>, vector<1x128xf32>,
      } else {
      }
    } else {
    }
    %c1_i32 = arith.constant 1 : i32
    %3 = arith.cmpi eq, %arg0, %c1_i32 : i32
    %4 = arith.extui %3 : i1 to i32
    %c0_i32_1 = arith.constant 0 : i32
    %5 = arith.cmpi ne, %4, %c0_i32_1 : i32
    scf.if %5 {
      %6 = arith.index_cast %arg1 : i32 to index
      %c0 = arith.constant 0 : index
      %c0_2 = arith.constant 0 : index
      %7 = vector.load %arg6[%6, %c0, %c0_2] : memref<1x32x128xf32, #tpu.memory_space<vmem>>, vector<1x32x128xf32>
      %8 = vector.shape_cast %7 : vector<1x32x128xf32> to vector<32x128xf32>
      %c0_3 = arith.constant 0 : index
      %c0_4 = arith.constant 0 : index
      %9 = vector.load %arg8[%c0_3, %c0_4] : memref<2x128xf32, #tpu.memory_space<vmem>>, vector<1x128xf32>
      %10 = vector.broadcast %9 : vector<1x128xf32> to vector<32x128xf32>
      %11 = arith.mulf %8, %10 : vector<32x128xf32>
      %c1 = arith.constant 1 : index
      %c0_5 = arith.constant 0 : index
      %12 = vector.load %arg8[%c1, %c0_5] : memref<2x128xf32, #tpu.memory_space<vmem>>, vector<1x128xf32>
      %13 = vector.broadcast %12 : vector<1x128xf32> to vector<32x128xf32>
      %14 = arith.addf %11, %13 : vector<32x128xf32>
      %cst = arith.constant 0.000000e+00 : f32
      %15 = vector.broadcast %cst : f32 to vector<32x128xf32>
      %16 = arith.cmpf ogt, %14, %15 : vector<32x128xf32>
      %cst_6 = arith.constant 2.000000e-01 : f32
      %17 = vector.broadcast %cst_6 : f32 to vector<32x128xf32>
      %18 = arith.mulf %17, %14 : vector<32x128xf32>
      %19 = arith.select %16, %14, %18 : vector<32x128xi1>, vector<32x128xf32>
      %20 = arith.truncf %19 : vector<32x128xf32> to vector<32x128xbf16>
      %c0_7 = arith.constant 0 : index
      %c0_8 = arith.constant 0 : index
      %21 = vector.load %arg5[%c0_7, %c0_8] : memref<32x128xbf16, #tpu.memory_space<vmem>>, vector<32x128xbf16>
      tpu.vector_store %arg5[%c0_7, %c0_8], %20 {strides = array<i32>} : memref<32x128xbf16, #tpu.memory_space<vmem>>, vector<32x128xbf16>,
    } else {
    }
    return
  }
  func.func @transform_0(%arg0: i32, %arg1: i32) -> (i32, i32) {
    %c1_i32 = arith.constant 1 : i32
    %0 = arith.subi %c1_i32, %arg0 : i32
    %1 = arith.muli %arg1, %0 : i32
    %c0_i32 = arith.constant 0 : i32
    %c0_i32_0 = arith.constant 0 : i32
    return %1, %c0_i32 : i32, i32
  }
  func.func @transform_1(%arg0: i32, %arg1: i32) -> (i32, i32) {
    %c0_i32 = arith.constant 0 : i32
    %c0_i32_0 = arith.constant 0 : i32
    %c0_i32_1 = arith.constant 0 : i32
    return %c0_i32, %c0_i32_0 : i32, i32
  }
  func.func @transform_2(%arg0: i32, %arg1: i32) -> (i32, i32) {
    %c0_i32 = arith.constant 0 : i32
    %c0_i32_0 = arith.constant 0 : i32
    %c0_i32_1 = arith.constant 0 : i32
    return %c0_i32, %c0_i32_0 : i32, i32
  }
  func.func @transform_3(%arg0: i32, %arg1: i32) -> (i32, i32) {
    %0 = arith.muli %arg1, %arg0 : i32
    %c0_i32 = arith.constant 0 : i32
    %c0_i32_0 = arith.constant 0 : i32
    return %0, %c0_i32 : i32, i32
  }
}

module attributes {stable_mosaic.version = 11 : i64} {
  func.func @kernel(%arg0: i32, %arg1: i32, %arg2: memref<8x512xbf16, #tpu.memory_space<vmem>>, %arg3: memref<512x128xbf16, #tpu.memory_space<vmem>>, %arg4: memref<2x128xf32, #tpu.memory_space<vmem>>, %arg5: memref<8x128xbf16, #tpu.memory_space<vmem>>, %arg6: memref<1x8x128xf32, #tpu.memory_space<vmem>>, %arg7: memref<2x128xf32, #tpu.memory_space<vmem>>, %arg8: memref<2x128xf32, #tpu.memory_space<vmem>>) attributes {dimension_semantics = [#tpu.dimension_semantics<arbitrary>, #tpu.dimension_semantics<arbitrary>], iteration_bounds = array<i64: 2, 1>, scalar_prefetch = 0 : i64, scratch_operands = 3 : i64, tpu.core_type = #tpu.core_type<tc>, window_params = [{transform_indices = @transform_0, window_bounds = array<i64: 8, 512>}, {pipeline_mode = #tpu.pipeline_mode<synchronous>, transform_indices = @transform_1, window_bounds = array<i64: 512, 128>}, {pipeline_mode = #tpu.pipeline_mode<synchronous>, transform_indices = @transform_2, window_bounds = array<i64: 2, 128>}, {transform_indices = @transform_3, window_bounds = array<i64: 8, 128>}]} {
    %c0_i32 = arith.constant 0 : i32
    %0 = arith.cmpi eq, %arg0, %c0_i32 : i32
    %1 = arith.extui %0 : i1 to i32
    %c0_i32_0 = arith.constant 0 : i32
    %2 = arith.cmpi ne, %1, %c0_i32_0 : i32
    scf.if %2 {
      %c0_i32_2 = arith.constant 0 : i32
      %6 = arith.cmpi eq, %arg1, %c0_i32_2 : i32
      %7 = arith.extui %6 : i1 to i32
      %c0_i32_3 = arith.constant 0 : i32
      %8 = arith.cmpi ne, %7, %c0_i32_3 : i32
      scf.if %8 {
        %cst_20 = arith.constant 0.000000e+00 : f32
        %30 = vector.broadcast %cst_20 : f32 to vector<2x128xf32>
        %c0_21 = arith.constant 0 : index
        %c0_22 = arith.constant 0 : index
        %31 = vector.load %arg7[%c0_21, %c0_22] : memref<2x128xf32, #tpu.memory_space<vmem>>, vector<2x128xf32>
        tpu.vector_store %arg7[%c0_21, %c0_22], %30 {strides = array<i32>} : memref<2x128xf32, #tpu.memory_space<vmem>>, vector<2x128xf32>,
      } else {
      }
      %c0 = arith.constant 0 : index
      %c0_4 = arith.constant 0 : index
      %9 = vector.load %arg2[%c0, %c0_4] : memref<8x512xbf16, #tpu.memory_space<vmem>>, vector<8x512xbf16>
      %c0_5 = arith.constant 0 : index
      %c0_6 = arith.constant 0 : index
      %10 = vector.load %arg3[%c0_5, %c0_6] : memref<512x128xbf16, #tpu.memory_space<vmem>>, vector<512x128xbf16>
      %cst = arith.constant dense<0.000000e+00> : vector<8x128xf32>
      %11 = tpu.matmul %9, %10, %cst {dimension_numbers = #tpu.dot_dimension_numbers<[1], [0], [0], [1], [0, 0, 1, 1], [], []>} : vector<8x512xbf16>, vector<512x128xbf16>, vector<8x128xf32> -> vector<8x128xf32>
      %12 = arith.index_cast %arg1 : i32 to index
      %c0_7 = arith.constant 0 : index
      %c0_8 = arith.constant 0 : index
      %13 = vector.load %arg6[%12, %c0_7, %c0_8] : memref<1x8x128xf32, #tpu.memory_space<vmem>>, vector<1x8x128xf32>
      %14 = vector.shape_cast %13 : vector<1x8x128xf32> to vector<8x128xf32>
      %15 = vector.shape_cast %11 : vector<8x128xf32> to vector<1x8x128xf32>
      tpu.vector_store %arg6[%12, %c0_7, %c0_8], %15 {strides = array<i32>} : memref<1x8x128xf32, #tpu.memory_space<vmem>>, vector<1x8x128xf32>,
      %c0_9 = arith.constant 0 : index
      %c0_10 = arith.constant 0 : index
      %16 = vector.load %arg7[%c0_9, %c0_10] : memref<2x128xf32, #tpu.memory_space<vmem>>, vector<1x128xf32>
      %cst_11 = arith.constant dense<0.000000e+00> : vector<128xf32>
      %17 = vector.multi_reduction <add>, %11, %cst_11 [0] : vector<8x128xf32> to vector<128xf32>
      %18 = vector.shape_cast %17 : vector<128xf32> to vector<1x128xf32>
      %19 = arith.addf %16, %18 : vector<1x128xf32>
      %c0_12 = arith.constant 0 : index
      %c0_13 = arith.constant 0 : index
      %20 = vector.load %arg7[%c0_12, %c0_13] : memref<2x128xf32, #tpu.memory_space<vmem>>, vector<1x128xf32>
      tpu.vector_store %arg7[%c0_12, %c0_13], %19 {strides = array<i32>} : memref<2x128xf32, #tpu.memory_space<vmem>>, vector<1x128xf32>,
      %c1 = arith.constant 1 : index
      %c0_14 = arith.constant 0 : index
      %21 = vector.load %arg7[%c1, %c0_14] : memref<2x128xf32, #tpu.memory_space<vmem>>, vector<1x128xf32>
      %22 = arith.mulf %11, %11 : vector<8x128xf32>
      %cst_15 = arith.constant dense<0.000000e+00> : vector<128xf32>
      %23 = vector.multi_reduction <add>, %22, %cst_15 [0] : vector<8x128xf32> to vector<128xf32>
      %24 = vector.shape_cast %23 : vector<128xf32> to vector<1x128xf32>
      %25 = arith.addf %21, %24 : vector<1x128xf32>
      %c1_16 = arith.constant 1 : index
      %c0_17 = arith.constant 0 : index
      %26 = vector.load %arg7[%c1_16, %c0_17] : memref<2x128xf32, #tpu.memory_space<vmem>>, vector<1x128xf32>
      tpu.vector_store %arg7[%c1_16, %c0_17], %25 {strides = array<i32>} : memref<2x128xf32, #tpu.memory_space<vmem>>, vector<1x128xf32>,
      %c0_i32_18 = arith.constant 0 : i32
      %27 = arith.cmpi eq, %arg1, %c0_i32_18 : i32
      %28 = arith.extui %27 : i1 to i32
      %c0_i32_19 = arith.constant 0 : i32
      %29 = arith.cmpi ne, %28, %c0_i32_19 : i32
      scf.if %29 {
        %c0_20 = arith.constant 0 : index
        %c0_21 = arith.constant 0 : index
        %30 = vector.load %arg7[%c0_20, %c0_21] : memref<2x128xf32, #tpu.memory_space<vmem>>, vector<1x128xf32>
        %cst_22 = arith.constant 1.250000e-01 : f32
        %31 = vector.broadcast %cst_22 : f32 to vector<1x128xf32>
        %32 = arith.mulf %30, %31 : vector<1x128xf32>
        %c1_23 = arith.constant 1 : index
        %c0_24 = arith.constant 0 : index
        %33 = vector.load %arg7[%c1_23, %c0_24] : memref<2x128xf32, #tpu.memory_space<vmem>>, vector<1x128xf32>
        %cst_25 = arith.constant 1.250000e-01 : f32
        %34 = vector.broadcast %cst_25 : f32 to vector<1x128xf32>
        %35 = arith.mulf %33, %34 : vector<1x128xf32>
        %36 = arith.mulf %32, %32 : vector<1x128xf32>
        %37 = arith.subf %35, %36 : vector<1x128xf32>
        %cst_26 = arith.constant 0.000000e+00 : f32
        %38 = vector.broadcast %cst_26 : f32 to vector<1x128xf32>
        %39 = arith.maximumf %37, %38 : vector<1x128xf32>
        %cst_27 = arith.constant 9.99999974E-6 : f32
        %40 = vector.broadcast %cst_27 : f32 to vector<1x128xf32>
        %41 = arith.addf %39, %40 : vector<1x128xf32>
        %42 = math.rsqrt %41 : vector<1x128xf32>
        %c0_28 = arith.constant 0 : index
        %c0_29 = arith.constant 0 : index
        %43 = vector.load %arg4[%c0_28, %c0_29] : memref<2x128xf32, #tpu.memory_space<vmem>>, vector<1x128xf32>
        %c1_30 = arith.constant 1 : index
        %c0_31 = arith.constant 0 : index
        %44 = vector.load %arg4[%c1_30, %c0_31] : memref<2x128xf32, #tpu.memory_space<vmem>>, vector<1x128xf32>
        %45 = arith.mulf %43, %42 : vector<1x128xf32>
        %c0_32 = arith.constant 0 : index
        %c0_33 = arith.constant 0 : index
        %46 = vector.load %arg8[%c0_32, %c0_33] : memref<2x128xf32, #tpu.memory_space<vmem>>, vector<1x128xf32>
        tpu.vector_store %arg8[%c0_32, %c0_33], %45 {strides = array<i32>} : memref<2x128xf32, #tpu.memory_space<vmem>>, vector<1x128xf32>,
        %47 = arith.mulf %43, %42 : vector<1x128xf32>
        %48 = arith.mulf %32, %47 : vector<1x128xf32>
        %49 = arith.subf %44, %48 : vector<1x128xf32>
        %c1_34 = arith.constant 1 : index
        %c0_35 = arith.constant 0 : index
        %50 = vector.load %arg8[%c1_34, %c0_35] : memref<2x128xf32, #tpu.memory_space<vmem>>, vector<1x128xf32>
        tpu.vector_store %arg8[%c1_34, %c0_35], %49 {strides = array<i32>} : memref<2x128xf32, #tpu.memory_space<vmem>>, vector<1x128xf32>,
      } else {
      }
    } else {
    }
    %c1_i32 = arith.constant 1 : i32
    %3 = arith.cmpi eq, %arg0, %c1_i32 : i32
    %4 = arith.extui %3 : i1 to i32
    %c0_i32_1 = arith.constant 0 : i32
    %5 = arith.cmpi ne, %4, %c0_i32_1 : i32
    scf.if %5 {
      %6 = arith.index_cast %arg1 : i32 to index
      %c0 = arith.constant 0 : index
      %c0_2 = arith.constant 0 : index
      %7 = vector.load %arg6[%6, %c0, %c0_2] : memref<1x8x128xf32, #tpu.memory_space<vmem>>, vector<1x8x128xf32>
      %8 = vector.shape_cast %7 : vector<1x8x128xf32> to vector<8x128xf32>
      %c0_3 = arith.constant 0 : index
      %c0_4 = arith.constant 0 : index
      %9 = vector.load %arg8[%c0_3, %c0_4] : memref<2x128xf32, #tpu.memory_space<vmem>>, vector<1x128xf32>
      %10 = vector.broadcast %9 : vector<1x128xf32> to vector<8x128xf32>
      %11 = arith.mulf %8, %10 : vector<8x128xf32>
      %c1 = arith.constant 1 : index
      %c0_5 = arith.constant 0 : index
      %12 = vector.load %arg8[%c1, %c0_5] : memref<2x128xf32, #tpu.memory_space<vmem>>, vector<1x128xf32>
      %13 = vector.broadcast %12 : vector<1x128xf32> to vector<8x128xf32>
      %14 = arith.addf %11, %13 : vector<8x128xf32>
      %cst = arith.constant 0.000000e+00 : f32
      %15 = vector.broadcast %cst : f32 to vector<8x128xf32>
      %16 = arith.cmpf ogt, %14, %15 : vector<8x128xf32>
      %cst_6 = arith.constant 2.000000e-01 : f32
      %17 = vector.broadcast %cst_6 : f32 to vector<8x128xf32>
      %18 = arith.mulf %17, %14 : vector<8x128xf32>
      %19 = arith.select %16, %14, %18 : vector<8x128xi1>, vector<8x128xf32>
      %20 = arith.truncf %19 : vector<8x128xf32> to vector<8x128xbf16>
      %c0_7 = arith.constant 0 : index
      %c0_8 = arith.constant 0 : index
      %21 = vector.load %arg5[%c0_7, %c0_8] : memref<8x128xbf16, #tpu.memory_space<vmem>>, vector<8x128xbf16>
      tpu.vector_store %arg5[%c0_7, %c0_8], %20 {strides = array<i32>} : memref<8x128xbf16, #tpu.memory_space<vmem>>, vector<8x128xbf16>,
    } else {
    }
    return
  }
  func.func @transform_0(%arg0: i32, %arg1: i32) -> (i32, i32) {
    %c1_i32 = arith.constant 1 : i32
    %0 = arith.subi %c1_i32, %arg0 : i32
    %1 = arith.muli %arg1, %0 : i32
    %c0_i32 = arith.constant 0 : i32
    %c0_i32_0 = arith.constant 0 : i32
    return %1, %c0_i32 : i32, i32
  }
  func.func @transform_1(%arg0: i32, %arg1: i32) -> (i32, i32) {
    %c0_i32 = arith.constant 0 : i32
    %c0_i32_0 = arith.constant 0 : i32
    %c0_i32_1 = arith.constant 0 : i32
    return %c0_i32, %c0_i32_0 : i32, i32
  }
  func.func @transform_2(%arg0: i32, %arg1: i32) -> (i32, i32) {
    %c0_i32 = arith.constant 0 : i32
    %c0_i32_0 = arith.constant 0 : i32
    %c0_i32_1 = arith.constant 0 : i32
    return %c0_i32, %c0_i32_0 : i32, i32
  }
  func.func @transform_3(%arg0: i32, %arg1: i32) -> (i32, i32) {
    %0 = arith.muli %arg1, %arg0 : i32
    %c0_i32 = arith.constant 0 : i32
    %c0_i32_0 = arith.constant 0 : i32
    return %0, %c0_i32 : i32, i32
  }
}

module attributes {stable_mosaic.version = 11 : i64} {
  func.func @_conv_sigmoid_kernel(%arg0: i32, %arg1: memref<8x1024xbf16, #tpu.memory_space<vmem>>, %arg2: memref<1024x128xbf16, #tpu.memory_space<vmem>>, %arg3: memref<8x128xf32, #tpu.memory_space<vmem>>) attributes {dimension_semantics = [#tpu.dimension_semantics<parallel>], iteration_bounds = array<i64: 1>, scalar_prefetch = 0 : i64, scratch_operands = 0 : i64, tpu.core_type = #tpu.core_type<tc>, window_params = [{transform_indices = @transform_0, window_bounds = array<i64: 8, 1024>}, {pipeline_mode = #tpu.pipeline_mode<synchronous>, transform_indices = @transform_1, window_bounds = array<i64: 1024, 128>}, {transform_indices = @transform_2, window_bounds = array<i64: 8, 128>}]} {
    %c0 = arith.constant 0 : index
    %c0_0 = arith.constant 0 : index
    %0 = vector.load %arg1[%c0, %c0_0] : memref<8x1024xbf16, #tpu.memory_space<vmem>>, vector<8x1024xbf16>
    %c0_1 = arith.constant 0 : index
    %c0_2 = arith.constant 0 : index
    %1 = vector.load %arg2[%c0_1, %c0_2] : memref<1024x128xbf16, #tpu.memory_space<vmem>>, vector<1024x128xbf16>
    %cst = arith.constant dense<0.000000e+00> : vector<8x128xf32>
    %2 = tpu.matmul %0, %1, %cst {dimension_numbers = #tpu.dot_dimension_numbers<[1], [0], [0], [1], [0, 0, 1, 1], [], []>} : vector<8x1024xbf16>, vector<1024x128xbf16>, vector<8x128xf32> -> vector<8x128xf32>
    %3 = arith.negf %2 : vector<8x128xf32>
    %4 = math.exp %3 : vector<8x128xf32>
    %cst_3 = arith.constant 1.000000e+00 : f32
    %5 = vector.broadcast %cst_3 : f32 to vector<8x128xf32>
    %6 = arith.addf %5, %4 : vector<8x128xf32>
    %7 = arith.divf %5, %6 : vector<8x128xf32>
    %c0_4 = arith.constant 0 : index
    %c0_5 = arith.constant 0 : index
    %8 = vector.load %arg3[%c0_4, %c0_5] : memref<8x128xf32, #tpu.memory_space<vmem>>, vector<8x128xf32>
    tpu.vector_store %arg3[%c0_4, %c0_5], %7 {strides = array<i32>} : memref<8x128xf32, #tpu.memory_space<vmem>>, vector<8x128xf32>,
    return
  }
  func.func @transform_0(%arg0: i32) -> (i32, i32) {
    %c0_i32 = arith.constant 0 : i32
    %c0_i32_0 = arith.constant 0 : i32
    return %arg0, %c0_i32 : i32, i32
  }
  func.func @transform_1(%arg0: i32) -> (i32, i32) {
    %c0_i32 = arith.constant 0 : i32
    %c0_i32_0 = arith.constant 0 : i32
    %c0_i32_1 = arith.constant 0 : i32
    return %c0_i32, %c0_i32_0 : i32, i32
  }
  func.func @transform_2(%arg0: i32) -> (i32, i32) {
    %c0_i32 = arith.constant 0 : i32
    %c0_i32_0 = arith.constant 0 : i32
    return %arg0, %c0_i32 : i32, i32
  }
}

</mosaic_0001>

<bundles_post_ra>
// kernel: discriminator_forward.5
= control target key start
LH: loop header
LB: loop body
LE: loop exit
PB: predicated region body
PF: predicated region fallthrough
CT: control target
= control target key end

     0   :  { %s2552_s12 = smov 0   ;;  %s2554_s13 = smov 0   ;;  %s3146_s0 = inlined_call_operand.vmem [shape: bf16[512,48], index: 0, kind: input, shape index: {}]   ;;  %s3147_s1 = inlined_call_operand.vmem [shape: bf16[48,128], index: 1, kind: input, shape index: {}]   ;;  %s3148_s2 = inlined_call_operand.vmem [shape: f32[2,128], index: 2, kind: input, shape index: {}]   ;;  %s3149_s3 = inlined_call_operand.vmem [shape: bf16[512,128], index: 3, kind: output, shape index: {}]  }
   0x1   :  { %s2556_s14 = smov 0  }
   0x2 LB: > { %s25_s15 = sadd.s32 1, %s2525_s13  ;;  %p1939_p0 = scmp.ge.s32.totalorder %s2529_s14, 1  ;;  %s2529_s14 = sphi %s2556_s14, %s13_s14   ;;  %s2525_s13 = sphi %s2554_s13, %s3151_s13   ;;  %s2521_s12 = sphi %s2552_s12, %s3150_s12  }
   0x3   : > { %p27_p1 = scmp.ge.s32.totalorder %s25_s15, 2  ;;  %p160_p2 = scmp.lt.s32.totalorder %s2529_s14, 3 }
   0x5   : > { %s3153_s15 = smov (%p27_p1, %s25_s15), 0  ;;  %p161_p3 = pnand %p1939_p0, %p160_p2 }
   0x6   : > { %p1940_p4 = scmp.ne.s32.totalorder (!%p161_p3), %s2521_s12, 0 }
   0x7   : > { %164 = sbr.rel (%p161_p3) target bundleno = 515 (0x203), region = 32 }
   0xe   : > { %209 = sbr.rel (%p1940_p4) target bundleno = 418 (0x1a2), region = 36  ;;  %v2470_v0 = vld [vmem:[%s3147_s1] sm:$0xff] (!%p1940_p4)   ;;  %v2471_v1 = vld [vmem:[%s3147_s1 + $0x8] sm:$0xff] (!%p1940_p4)   ;;  %vm463_vm0 = vcmask (!%p1940_p4), 392192   ;;  %v2472_v3 = vld [vmem:[%s3147_s1 + $0x10] sm:$0xff] (!%p1940_p4)   ;;  %v2531_v35 = vmov (!%p1940_p4), 0.0  }
   0xf   : > { %2369 = vmatprep.subr.bf16.mxu0 (!%p1940_p4), %v2470_v0  ;;  %2439 = vmatprep.subr.bf16.mxu1 (!%p1940_p4), %v2470_v0  ;;  %v2473_v2 = vld [vmem:[%s3146_s0] sm:$0xff] (!%p1940_p4)   ;;  %v2474_v4 = vld [vmem:[%s3146_s0 + $0x8] sm:$0xff] (!%p1940_p4)   ;;  %v2475_v5 = vld [vmem:[%s3146_s0 + $0x10] sm:$0xff] (!%p1940_p4)   ;;  %214 = vst [vmem:[#allocation3] sm:$0x3] (!%p1940_p4), %v2531_v35 }
  0x10   : > { %2370 = vmatpush3.bf16.msra.mxu0 (!%p1940_p4), %v2470_v0  ;;  %2442 = vmatpush3.bf16.msra.mxu1 (!%p1940_p4), %v2470_v0  ;;  %v2476_v6 = vld [vmem:[%s3146_s0 + $0x18] sm:$0xff] (!%p1940_p4)   ;;  %v2477_v7 = vld [vmem:[%s3146_s0 + $0x20] sm:$0xff] (!%p1940_p4)   ;;  %v2490_v9 = vld [vmem:[%s3146_s0 + $0x88] sm:$0xff] (!%p1940_p4)  }
  0x11   : > { %2371 = vmatprep.subr.bf16.mxu0 (!%p1940_p4), %v2471_v1  ;;  %2440 = vmatprep.subr.bf16.mxu1 (!%p1940_p4), %v2471_v1  ;;  %v2489_v8 = vld [vmem:[%s3146_s0 + $0x80] sm:$0xff] (!%p1940_p4)   ;;  %v2491_v10 = vld [vmem:[%s3146_s0 + $0x90] sm:$0xff] (!%p1940_p4)   ;;  %v2478_v11 = vld [vmem:[%s3146_s0 + $0x28] sm:$0xff] (!%p1940_p4)  }
  0x12   : > { %2375 = vmatprep.mubr.msk.bf16.mxu0 (!%p1940_p4), %vm463_vm0, %v2473_v2  ;;  %2407 = vmatprep.mubr.msk.bf16.mxu1 (!%p1940_p4), %vm463_vm0, %v2489_v8  ;;  %v2479_v12 = vld [vmem:[%s3146_s0 + $0x30] sm:$0xff] (!%p1940_p4)   ;;  %v2492_v13 = vld [vmem:[%s3146_s0 + $0x98] sm:$0xff] (!%p1940_p4)   ;;  %v2493_v14 = vld [vmem:[%s3146_s0 + $0xa0] sm:$0xff] (!%p1940_p4)  }
  0x13   : > { %v2480_v15 = vld [vmem:[%s3146_s0 + $0x38] sm:$0xff] (!%p1940_p4)   ;;  %v2494_v16 = vld [vmem:[%s3146_s0 + $0xa8] sm:$0xff] (!%p1940_p4)   ;;  %v2481_v17 = vld [vmem:[%s3146_s0 + $0x40] sm:$0xff] (!%p1940_p4)  }
  0x14   : > { %2372 = vmatpush3.bf16.msra.mxu0 (!%p1940_p4), %v2471_v1  ;;  %2443 = vmatpush3.bf16.msra.mxu1 (!%p1940_p4), %v2471_v1  ;;  %v2495_v18 = vld [vmem:[%s3146_s0 + $0xb0] sm:$0xff] (!%p1940_p4)   ;;  %v2482_v19 = vld [vmem:[%s3146_s0 + $0x48] sm:$0xff] (!%p1940_p4)   ;;  %v2496_v20 = vld [vmem:[%s3146_s0 + $0xb8] sm:$0xff] (!%p1940_p4)  }
  0x15   : > { %2373 = vmatprep.subr.bf16.mxu0 %v2472_v3  ;;  %2441 = vmatprep.subr.bf16.mxu1 %v2472_v3  ;;  %v2483_v21 = vld [vmem:[%s3146_s0 + $0x50] sm:$0xff]   ;;  %v2497_v22 = vld [vmem:[%s3146_s0 + $0xc0] sm:$0xff]   ;;  %v2484_v23 = vld [vmem:[%s3146_s0 + $0x58] sm:$0xff]  }
  0x16   : > { %v2498_v24 = vld [vmem:[%s3146_s0 + $0xc8] sm:$0xff]   ;;  %v2485_v25 = vld [vmem:[%s3146_s0 + $0x60] sm:$0xff]   ;;  %v2499_v26 = vld [vmem:[%s3146_s0 + $0xd0] sm:$0xff]  }
  0x17   : > { %v2486_v27 = vld [vmem:[%s3146_s0 + $0x68] sm:$0xff]   ;;  %v2500_v28 = vld [vmem:[%s3146_s0 + $0xd8] sm:$0xff]   ;;  %v2487_v29 = vld [vmem:[%s3146_s0 + $0x70] sm:$0xff]  }
  0x18   : > { %2374 = vmatpush3.bf16.msra.mxu0 %v2472_v3  ;;  %2444 = vmatpush3.bf16.msra.mxu1 %v2472_v3  ;;  %v2501_v30 = vld [vmem:[%s3146_s0 + $0xe0] sm:$0xff]   ;;  %v2488_v31 = vld [vmem:[%s3146_s0 + $0x78] sm:$0xff]   ;;  %v2502_v32 = vld [vmem:[%s3146_s0 + $0xe8] sm:$0xff]  }
  0x19   : > { %v2503_v33 = vld [vmem:[%s3146_s0 + $0xf0] sm:$0xff]   ;;  %v2504_v34 = vld [vmem:[%s3146_s0 + $0xf8] sm:$0xff]  }
  0x1b   : > { %2376 = vmatmul.mubr.msk.bf16.vlgmr.msra.gmra.mrb[0].mxu0 %vm463_vm0, %v2474_v4  ;;  %2408 = vmatmul.mubr.msk.bf16.vlgmr.msra.gmra.mrb[0].mxu1 %vm463_vm0, %v2490_v9 }
  0x1c   : > { %2379 = vmatprep.mubr.msk.bf16.mxu0 %vm463_vm0, %v2475_v5  ;;  %2411 = vmatprep.mubr.msk.bf16.mxu1 %vm463_vm0, %v2491_v10 }
  0x23   : > { %2380 = vmatmul.mubr.msk.bf16.gmra.mrb[4].mxu0 %vm463_vm0, %v2476_v6  ;;  %2412 = vmatmul.mubr.msk.bf16.gmra.mrb[4].mxu1 %vm463_vm0, %v2492_v13 }
  0x24   : > { %2383 = vmatprep.mubr.msk.bf16.mxu0 %vm463_vm0, %v2477_v7  ;;  %2415 = vmatprep.mubr.msk.bf16.mxu1 %vm463_vm0, %v2493_v14 }
  0x2b   : > { %2384 = vmatmul.mubr.msk.bf16.gmra.mrb[8].mxu0 %vm463_vm0, %v2478_v11  ;;  %2416 = vmatmul.mubr.msk.bf16.gmra.mrb[8].mxu1 %vm463_vm0, %v2494_v16 }
  0x2c   : > { %2387 = vmatprep.mubr.msk.bf16.mxu0 %vm463_vm0, %v2479_v12  ;;  %2419 = vmatprep.mubr.msk.bf16.mxu1 %vm463_vm0, %v2495_v18 }
  0x33   : > { %2388 = vmatmul.mubr.msk.bf16.gmra.mrb[12].mxu0 %vm463_vm0, %v2480_v15  ;;  %2420 = vmatmul.mubr.msk.bf16.gmra.mrb[12].mxu1 %vm463_vm0, %v2496_v20 }
  0x34   : > { %2391 = vmatprep.mubr.msk.bf16.mxu0 %vm463_vm0, %v2481_v17  ;;  %2423 = vmatprep.mubr.msk.bf16.mxu1 %vm463_vm0, %v2497_v22 }
  0x3b   : > { %2392 = vmatmul.mubr.msk.bf16.gmra.mrb[16].mxu0 %vm463_vm0, %v2482_v19  ;;  %2424 = vmatmul.mubr.msk.bf16.gmra.mrb[16].mxu1 %vm463_vm0, %v2498_v24 }
  0x3c   : > { %2395 = vmatprep.mubr.msk.bf16.mxu0 %vm463_vm0, %v2483_v21  ;;  %2427 = vmatprep.mubr.msk.bf16.mxu1 %vm463_vm0, %v2499_v26 }
  0x43   : > { %2396 = vmatmul.mubr.msk.bf16.gmra.mrb[20].mxu0 %vm463_vm0, %v2484_v23  ;;  %2428 = vmatmul.mubr.msk.bf16.gmra.mrb[20].mxu1 %vm463_vm0, %v2500_v28 }
  0x44   : > { %2399 = vmatprep.mubr.msk.bf16.mxu0 %vm463_vm0, %v2485_v25  ;;  %2431 = vmatprep.mubr.msk.bf16.mxu1 %vm463_vm0, %v2501_v30 }
  0x4b   : > { %2400 = vmatmul.mubr.msk.bf16.gmra.mrb[24].mxu0 %vm463_vm0, %v2486_v27  ;;  %2432 = vmatmul.mubr.msk.bf16.gmra.mrb[24].mxu1 %vm463_vm0, %v2502_v32 }
  0x4c   : > { %2403 = vmatprep.mubr.msk.bf16.mxu0 %vm463_vm0, %v2487_v29  ;;  %2435 = vmatprep.mubr.msk.bf16.mxu1 %vm463_vm0, %v2503_v33 }
  0x53   : > { %2404 = vmatmul.mubr.msk.bf16.gmra.mrb[28].mxu0 %vm463_vm0, %v2488_v31  ;;  %2436 = vmatmul.mubr.msk.bf16.gmra.mrb[28].mxu1 %vm463_vm0, %v2504_v34 }
  0xee   : > { %v2377_v36 = vpop.f32.mrb[0].mxu0  ;;  %v2710_v50 = vpop.f32.mrb[0].mxu1 }
  0xef   : > { %853 = vst [vmem:[#allocation2 + $0x10] sm:$0xff] %v2377_v36  ;;  %v594_v37 = vpop.f32.mrb[1].mxu0  ;;  %v990_v43 = vmul.f32 %v2377_v36, %v2377_v36  ;;  %885 = vst [vmem:[#allocation2 + $0x110] sm:$0xff] %v2710_v50  ;;  %v2713_v52 = vpop.f32.mrb[1].mxu1 }
  0xf0   : > { %851 = vst [vmem:[#allocation2] sm:$0xff] %v594_v37  ;;  %v2378_v38 = vpop.f32.mrb[2].mxu0  ;;  %v988_v40 = vmul.f32 %v594_v37, %v594_v37  ;;  %883 = vst [vmem:[#allocation2 + $0x100] sm:$0xff] %v2713_v52  ;;  %v2716_v57 = vpop.f32.mrb[2].mxu1 }
  0xf1   : > { %854 = vst [vmem:[#allocation2 + $0x18] sm:$0xff] %v2378_v38  ;;  %v597_v39 = vpop.f32.mrb[3].mxu0  ;;  %v991_v46 = vmul.f32 %v2378_v38, %v2378_v38  ;;  %886 = vst [vmem:[#allocation2 + $0x118] sm:$0xff] %v2716_v57  ;;  %v2719_v59 = vpop.f32.mrb[3].mxu1 }
  0xf2   : > { %852 = vst [vmem:[#allocation2 + $0x8] sm:$0xff] %v597_v39  ;;  %v916_v41 = vadd.f32 %v597_v39, %v594_v37  ;;  %v989_v42 = vmul.f32 %v597_v39, %v597_v39  ;;  %884 = vst [vmem:[#allocation2 + $0x108] sm:$0xff] %v2719_v59 }
  0xf4   : > { %v917_v44 = vadd.f32 %v2377_v36, %v916_v41  ;;  %v1052_v45 = vadd.f32 %v989_v42, %v988_v40 }
  0xf6   : > { %v1053_v47 = vadd.f32 %v1052_v45, %v990_v43  ;;  %v2381_v48 = vpop.f32.mrb[4].mxu0  ;;  %v918_v49 = vadd.f32 %v2378_v38, %v917_v44  ;;  %v2722_v6 = vpop.f32.mrb[4].mxu1 }
  0xf7   : > { %857 = vst [vmem:[#allocation2 + $0x30] sm:$0xff] %v2381_v48  ;;  %v610_v51 = vpop.f32.mrb[5].mxu0  ;;  %v994_v63 = vmul.f32 %v2381_v48, %v2381_v48  ;;  %889 = vst [vmem:[#allocation2 + $0x130] sm:$0xff] %v2722_v6  ;;  %v2725_v8 = vpop.f32.mrb[5].mxu1 }
  0xf8   : > { %855 = vst [vmem:[#allocation2 + $0x20] sm:$0xff] %v610_v51  ;;  %v919_v53 = vadd.f32 %v918_v49, %v610_v51  ;;  %v992_v54 = vmul.f32 %v610_v51, %v610_v51  ;;  %v1054_v55 = vadd.f32 %v1053_v47, %v991_v46  ;;  %v2382_v56 = vpop.f32.mrb[6].mxu0  ;;  %887 = vst [vmem:[#allocation2 + $0x120] sm:$0xff] %v2725_v8  ;;  %v2728_v13 = vpop.f32.mrb[6].mxu1 }
  0xf9   : > { %858 = vst [vmem:[#allocation2 + $0x38] sm:$0xff] %v2382_v56  ;;  %v613_v58 = vpop.f32.mrb[7].mxu0  ;;  %v995_v2 = vmul.f32 %v2382_v56, %v2382_v56  ;;  %890 = vst [vmem:[#allocation2 + $0x138] sm:$0xff] %v2728_v13  ;;  %v2731_v15 = vpop.f32.mrb[7].mxu1 }
  0xfa   : > { %v1055_v60 = vadd.f32 %v1054_v55, %v992_v54  ;;  %856 = vst [vmem:[#allocation2 + $0x28] sm:$0xff] %v613_v58  ;;  %v920_v61 = vadd.f32 %v919_v53, %v613_v58  ;;  %v993_v62 = vmul.f32 %v613_v58, %v613_v58  ;;  %888 = vst [vmem:[#allocation2 + $0x128] sm:$0xff] %v2731_v15 }
  0xfc   : > { %v921_v0 = vadd.f32 %v2381_v48, %v920_v61  ;;  %v1056_v1 = vadd.f32 %v1055_v60, %v993_v62 }
  0xfe   : > { %v1057_v3 = vadd.f32 %v1056_v1, %v994_v63  ;;  %v2385_v4 = vpop.f32.mrb[8].mxu0  ;;  %v922_v5 = vadd.f32 %v2382_v56, %v921_v0  ;;  %v2734_v26 = vpop.f32.mrb[8].mxu1 }
  0xff   : > { %861 = vst [vmem:[#allocation2 + $0x50] sm:$0xff] %v2385_v4  ;;  %v626_v7 = vpop.f32.mrb[9].mxu0  ;;  %v998_v19 = vmul.f32 %v2385_v4, %v2385_v4  ;;  %893 = vst [vmem:[#allocation2 + $0x150] sm:$0xff] %v2734_v26  ;;  %v2737_v28 = vpop.f32.mrb[9].mxu1 }
 0x100   : > { %859 = vst [vmem:[#allocation2 + $0x40] sm:$0xff] %v626_v7  ;;  %v923_v9 = vadd.f32 %v922_v5, %v626_v7  ;;  %v996_v10 = vmul.f32 %v626_v7, %v626_v7  ;;  %v1058_v11 = vadd.f32 %v1057_v3, %v995_v2  ;;  %v2386_v12 = vpop.f32.mrb[10].mxu0  ;;  %891 = vst [vmem:[#allocation2 + $0x140] sm:$0xff] %v2737_v28  ;;  %v2740_v33 = vpop.f32.mrb[10].mxu1 }
 0x101   : > { %862 = vst [vmem:[#allocation2 + $0x58] sm:$0xff] %v2386_v12  ;;  %v629_v14 = vpop.f32.mrb[11].mxu0  ;;  %v999_v22 = vmul.f32 %v2386_v12, %v2386_v12  ;;  %894 = vst [vmem:[#allocation2 + $0x158] sm:$0xff] %v2740_v33  ;;  %v2743_v35 = vpop.f32.mrb[11].mxu1 }
 0x102   : > { %v1059_v16 = vadd.f32 %v1058_v11, %v996_v10  ;;  %860 = vst [vmem:[#allocation2 + $0x48] sm:$0xff] %v629_v14  ;;  %v924_v17 = vadd.f32 %v923_v9, %v629_v14  ;;  %v997_v18 = vmul.f32 %v629_v14, %v629_v14  ;;  %892 = vst [vmem:[#allocation2 + $0x148] sm:$0xff] %v2743_v35 }
 0x104   : > { %v925_v20 = vadd.f32 %v2385_v4, %v924_v17  ;;  %v1060_v21 = vadd.f32 %v1059_v16, %v997_v18 }
 0x106   : > { %v1061_v23 = vadd.f32 %v1060_v21, %v998_v19  ;;  %v2389_v24 = vpop.f32.mrb[12].mxu0  ;;  %v926_v25 = vadd.f32 %v2386_v12, %v925_v20  ;;  %v2746_v46 = vpop.f32.mrb[12].mxu1 }
 0x107   : > { %865 = vst [vmem:[#allocation2 + $0x70] sm:$0xff] %v2389_v24  ;;  %v642_v27 = vpop.f32.mrb[13].mxu0  ;;  %v1002_v39 = vmul.f32 %v2389_v24, %v2389_v24  ;;  %897 = vst [vmem:[#allocation2 + $0x170] sm:$0xff] %v2746_v46  ;;  %v2749_v48 = vpop.f32.mrb[13].mxu1 }
 0x108   : > { %863 = vst [vmem:[#allocation2 + $0x60] sm:$0xff] %v642_v27  ;;  %v927_v29 = vadd.f32 %v926_v25, %v642_v27  ;;  %v1000_v30 = vmul.f32 %v642_v27, %v642_v27  ;;  %v1062_v31 = vadd.f32 %v1061_v23, %v999_v22  ;;  %v2390_v32 = vpop.f32.mrb[14].mxu0  ;;  %895 = vst [vmem:[#allocation2 + $0x160] sm:$0xff] %v2749_v48  ;;  %v2752_v55 = vpop.f32.mrb[14].mxu1 }
 0x109   : > { %866 = vst [vmem:[#allocation2 + $0x78] sm:$0xff] %v2390_v32  ;;  %v645_v34 = vpop.f32.mrb[15].mxu0  ;;  %v1003_v42 = vmul.f32 %v2390_v32, %v2390_v32  ;;  %898 = vst [vmem:[#allocation2 + $0x178] sm:$0xff] %v2752_v55  ;;  %v2755_v58 = vpop.f32.mrb[15].mxu1 }
 0x10a   : > { %v1063_v36 = vadd.f32 %v1062_v31, %v1000_v30  ;;  %864 = vst [vmem:[#allocation2 + $0x68] sm:$0xff] %v645_v34  ;;  %v928_v37 = vadd.f32 %v927_v29, %v645_v34  ;;  %v1001_v38 = vmul.f32 %v645_v34, %v645_v34  ;;  %896 = vst [vmem:[#allocation2 + $0x168] sm:$0xff] %v2755_v58 }
 0x10c   : > { %v929_v40 = vadd.f32 %v2389_v24, %v928_v37  ;;  %v1064_v41 = vadd.f32 %v1063_v36, %v1001_v38 }
 0x10e   : > { %v1065_v43 = vadd.f32 %v1064_v41, %v1002_v39  ;;  %v2393_v44 = vpop.f32.mrb[16].mxu0  ;;  %v930_v45 = vadd.f32 %v2390_v32, %v929_v40  ;;  %v2758_v7 = vpop.f32.mrb[16].mxu1 }
 0x10f   : > { %869 = vst [vmem:[#allocation2 + $0x90] sm:$0xff] %v2393_v44  ;;  %v658_v47 = vpop.f32.mrb[17].mxu0  ;;  %v1006_v63 = vmul.f32 %v2393_v44, %v2393_v44  ;;  %901 = vst [vmem:[#allocation2 + $0x190] sm:$0xff] %v2758_v7  ;;  %v2761_v10 = vpop.f32.mrb[17].mxu1 }
 0x110   : > { %867 = vst [vmem:[#allocation2 + $0x80] sm:$0xff] %v658_v47  ;;  %v931_v49 = vadd.f32 %v930_v45, %v658_v47  ;;  %v1004_v51 = vmul.f32 %v658_v47, %v658_v47  ;;  %v1066_v53 = vadd.f32 %v1065_v43, %v1003_v42  ;;  %v2394_v54 = vpop.f32.mrb[18].mxu0  ;;  %899 = vst [vmem:[#allocation2 + $0x180] sm:$0xff] %v2761_v10  ;;  %v2764_v17 = vpop.f32.mrb[18].mxu1 }
 0x111   : > { %870 = vst [vmem:[#allocation2 + $0x98] sm:$0xff] %v2394_v54  ;;  %v661_v56 = vpop.f32.mrb[19].mxu0  ;;  %v1007_v2 = vmul.f32 %v2394_v54, %v2394_v54  ;;  %902 = vst [vmem:[#allocation2 + $0x198] sm:$0xff] %v2764_v17  ;;  %v2767_v19 = vpop.f32.mrb[19].mxu1 }
 0x112   : > { %v1067_v60 = vadd.f32 %v1066_v53, %v1004_v51  ;;  %868 = vst [vmem:[#allocation2 + $0x88] sm:$0xff] %v661_v56  ;;  %v932_v61 = vadd.f32 %v931_v49, %v661_v56  ;;  %v1005_v62 = vmul.f32 %v661_v56, %v661_v56  ;;  %900 = vst [vmem:[#allocation2 + $0x188] sm:$0xff] %v2767_v19 }
 0x114   : > { %v933_v0 = vadd.f32 %v2393_v44, %v932_v61  ;;  %v1068_v1 = vadd.f32 %v1067_v60, %v1005_v62 }
 0x116   : > { %v1069_v3 = vadd.f32 %v1068_v1, %v1006_v63  ;;  %v2397_v4 = vpop.f32.mrb[20].mxu0  ;;  %v934_v5 = vadd.f32 %v2394_v54, %v933_v0  ;;  %v2770_v32 = vpop.f32.mrb[20].mxu1 }
 0x117   : > { %873 = vst [vmem:[#allocation2 + $0xb0] sm:$0xff] %v2397_v4  ;;  %v674_v9 = vpop.f32.mrb[21].mxu0  ;;  %v1010_v23 = vmul.f32 %v2397_v4, %v2397_v4  ;;  %905 = vst [vmem:[#allocation2 + $0x1b0] sm:$0xff] %v2770_v32  ;;  %v2773_v36 = vpop.f32.mrb[21].mxu1 }
 0x118   : > { %871 = vst [vmem:[#allocation2 + $0xa0] sm:$0xff] %v674_v9  ;;  %v935_v11 = vadd.f32 %v934_v5, %v674_v9  ;;  %v1008_v12 = vmul.f32 %v674_v9, %v674_v9  ;;  %v1070_v14 = vadd.f32 %v1069_v3, %v1007_v2  ;;  %v2398_v16 = vpop.f32.mrb[22].mxu0  ;;  %903 = vst [vmem:[#allocation2 + $0x1a0] sm:$0xff] %v2773_v36  ;;  %v2776_v41 = vpop.f32.mrb[22].mxu1 }
 0x119   : > { %874 = vst [vmem:[#allocation2 + $0xb8] sm:$0xff] %v2398_v16  ;;  %v677_v18 = vpop.f32.mrb[23].mxu0  ;;  %v1011_v27 = vmul.f32 %v2398_v16, %v2398_v16  ;;  %906 = vst [vmem:[#allocation2 + $0x1b8] sm:$0xff] %v2776_v41  ;;  %v2779_v43 = vpop.f32.mrb[23].mxu1 }
 0x11a   : > { %v1071_v20 = vadd.f32 %v1070_v14, %v1008_v12  ;;  %872 = vst [vmem:[#allocation2 + $0xa8] sm:$0xff] %v677_v18  ;;  %v936_v21 = vadd.f32 %v935_v11, %v677_v18  ;;  %v1009_v22 = vmul.f32 %v677_v18, %v677_v18  ;;  %904 = vst [vmem:[#allocation2 + $0x1a8] sm:$0xff] %v2779_v43 }
 0x11c   : > { %v937_v24 = vadd.f32 %v2397_v4, %v936_v21  ;;  %v1072_v25 = vadd.f32 %v1071_v20, %v1009_v22 }
 0x11e   : > { %v1073_v29 = vadd.f32 %v1072_v25, %v1010_v23  ;;  %v2401_v30 = vpop.f32.mrb[24].mxu0  ;;  %v938_v31 = vadd.f32 %v2398_v16, %v937_v24  ;;  %v2782_v62 = vpop.f32.mrb[24].mxu1  ;;  %v1020_v25 = vmul.f32 %v2713_v52, %v2713_v52 }
 0x11f   : > { %877 = vst [vmem:[#allocation2 + $0xd0] sm:$0xff] %v2401_v30  ;;  %v690_v34 = vpop.f32.mrb[25].mxu0  ;;  %v1014_v49 = vmul.f32 %v2401_v30, %v2401_v30  ;;  %909 = vst [vmem:[#allocation2 + $0x1d0] sm:$0xff] %v2782_v62  ;;  %v2785_v0 = vpop.f32.mrb[25].mxu1 }
 0x120   : > { %875 = vst [vmem:[#allocation2 + $0xc0] sm:$0xff] %v690_v34  ;;  %v939_v37 = vadd.f32 %v938_v31, %v690_v34  ;;  %v1012_v38 = vmul.f32 %v690_v34, %v690_v34  ;;  %v1074_v39 = vadd.f32 %v1073_v29, %v1011_v27  ;;  %v2402_v40 = vpop.f32.mrb[26].mxu0  ;;  %907 = vst [vmem:[#allocation2 + $0x1c0] sm:$0xff] %v2785_v0  ;;  %v2788_v5 = vpop.f32.mrb[26].mxu1 }
 0x121   : > { %878 = vst [vmem:[#allocation2 + $0xd8] sm:$0xff] %v2402_v40  ;;  %v693_v42 = vpop.f32.mrb[27].mxu0  ;;  %v1015_v54 = vmul.f32 %v2402_v40, %v2402_v40  ;;  %910 = vst [vmem:[#allocation2 + $0x1d8] sm:$0xff] %v2788_v5  ;;  %v2791_v11 = vpop.f32.mrb[27].mxu1 }
 0x122   : > { %v1075_v44 = vadd.f32 %v1074_v39, %v1012_v38  ;;  %876 = vst [vmem:[#allocation2 + $0xc8] sm:$0xff] %v693_v42  ;;  %v940_v45 = vadd.f32 %v939_v37, %v693_v42  ;;  %v1013_v47 = vmul.f32 %v693_v42, %v693_v42  ;;  %908 = vst [vmem:[#allocation2 + $0x1c8] sm:$0xff] %v2791_v11 }
 0x124   : > { %v941_v51 = vadd.f32 %v2401_v30, %v940_v45  ;;  %v1076_v53 = vadd.f32 %v1075_v44, %v1013_v47  ;;  %v1023_v45 = vmul.f32 %v2716_v57, %v2716_v57 }
 0x126   : > { %v1077_v56 = vadd.f32 %v1076_v53, %v1014_v49  ;;  %v2405_v60 = vpop.f32.mrb[28].mxu0  ;;  %v942_v61 = vadd.f32 %v2402_v40, %v941_v51  ;;  %v2796_v27 = vpop.f32.mrb[28].mxu1  ;;  %v1021_v40 = vmul.f32 %v2719_v59, %v2719_v59  ;;  %v1024_v51 = vmul.f32 %v2725_v8, %v2725_v8 }
 0x127   : > { %881 = vst [vmem:[#allocation2 + $0xf0] sm:$0xff] %v2405_v60  ;;  %v706_v63 = vpop.f32.mrb[29].mxu0  ;;  %v1018_v18 = vmul.f32 %v2405_v60, %v2405_v60  ;;  %913 = vst [vmem:[#allocation2 + $0x1f0] sm:$0xff] %v2796_v27  ;;  %v2799_v29 = vpop.f32.mrb[29].mxu1 }
 0x128   : > { %879 = vst [vmem:[#allocation2 + $0xe0] sm:$0xff] %v706_v63  ;;  %v943_v1 = vadd.f32 %v942_v61, %v706_v63  ;;  %v1016_v2 = vmul.f32 %v706_v63, %v706_v63  ;;  %v1078_v3 = vadd.f32 %v1077_v56, %v1015_v54  ;;  %v2406_v4 = vpop.f32.mrb[30].mxu0  ;;  %911 = vst [vmem:[#allocation2 + $0x1e0] sm:$0xff] %v2799_v29  ;;  %v2803_v34 = vpop.f32.mrb[30].mxu1 }
 0x129   : > { %882 = vst [vmem:[#allocation2 + $0xf8] sm:$0xff] %v2406_v4  ;;  %v709_v9 = vpop.f32.mrb[31].mxu0  ;;  %v1019_v22 = vmul.f32 %v2406_v4, %v2406_v4  ;;  %914 = vst [vmem:[#allocation2 + $0x1f8] sm:$0xff] %v2803_v34  ;;  %v2806_v37 = vpop.f32.mrb[31].mxu1 }
 0x12a   : > { %v1079_v12 = vadd.f32 %v1078_v3, %v1016_v2  ;;  %880 = vst [vmem:[#allocation2 + $0xe8] sm:$0xff] %v709_v9  ;;  %v944_v14 = vadd.f32 %v943_v1, %v709_v9  ;;  %v1017_v16 = vmul.f32 %v709_v9, %v709_v9  ;;  %912 = vst [vmem:[#allocation2 + $0x1e8] sm:$0xff] %v2806_v37 }
 0x12c   : > { %v945_v20 = vadd.f32 %v2405_v60, %v944_v14  ;;  %v1080_v21 = vadd.f32 %v1079_v12, %v1017_v16  ;;  %v1025_v60 = vmul.f32 %v2731_v15, %v2731_v15  ;;  %v1029_v12 = vmul.f32 %v2743_v35, %v2743_v35 }
 0x12e   : > { %v1081_v23 = vadd.f32 %v1080_v21, %v1018_v18  ;;  %v946_v24 = vadd.f32 %v2406_v4, %v945_v20 }
 0x130   : > { %v947_v30 = vadd.f32 %v946_v24, %v2713_v52  ;;  %v1082_v31 = vadd.f32 %v1081_v23, %v1019_v22  ;;  %v1022_v52 = vmul.f32 %v2710_v50, %v2710_v50  ;;  %v1033_v24 = vmul.f32 %v2755_v58, %v2755_v58 }
 0x132   : > { %v1083_v38 = vadd.f32 %v1082_v31, %v1020_v25  ;;  %v948_v39 = vadd.f32 %v947_v30, %v2719_v59 }
 0x134   : > { %v949_v42 = vadd.f32 %v2710_v50, %v948_v39  ;;  %v1084_v44 = vadd.f32 %v1083_v38, %v1021_v40  ;;  %v1026_v50 = vmul.f32 %v2722_v6, %v2722_v6 }
 0x136   : > { %v1085_v47 = vadd.f32 %v1084_v44, %v1022_v52  ;;  %v950_v49 = vadd.f32 %v2716_v57, %v949_v42  ;;  %v1027_v57 = vmul.f32 %v2728_v13, %v2728_v13  ;;  %v1037_v42 = vmul.f32 %v2767_v19, %v2767_v19 }
 0x138   : > { %v951_v53 = vadd.f32 %v950_v49, %v2725_v8  ;;  %v1086_v59 = vadd.f32 %v1085_v47, %v1023_v45  ;;  %v1028_v8 = vmul.f32 %v2737_v28, %v2737_v28 }
 0x13a   : > { %v1087_v54 = vadd.f32 %v1086_v59, %v1024_v51  ;;  %v952_v56 = vadd.f32 %v951_v53, %v2731_v15 }
 0x13c   : > { %v953_v61 = vadd.f32 %v2722_v6, %v952_v56  ;;  %v1088_v63 = vadd.f32 %v1087_v54, %v1025_v60  ;;  %v1030_v6 = vmul.f32 %v2734_v26, %v2734_v26  ;;  %v1041_v54 = vmul.f32 %v2779_v43, %v2779_v43 }
 0x13e   : > { %v1089_v1 = vadd.f32 %v1088_v63, %v1026_v50  ;;  %v954_v2 = vadd.f32 %v2728_v13, %v953_v61  ;;  %v1031_v13 = vmul.f32 %v2740_v33, %v2740_v33 }
 0x140   : > { %v955_v3 = vadd.f32 %v954_v2, %v2737_v28  ;;  %v1090_v4 = vadd.f32 %v1089_v1, %v1027_v57  ;;  %v1032_v28 = vmul.f32 %v2749_v48, %v2749_v48  ;;  %v1045_v2 = vmul.f32 %v2791_v11, %v2791_v11 }
 0x142   : > { %v1091_v9 = vadd.f32 %v1090_v4, %v1028_v8  ;;  %v956_v15 = vadd.f32 %v955_v3, %v2743_v35 }
 0x144   : > { %v957_v14 = vadd.f32 %v2734_v26, %v956_v15  ;;  %v1092_v16 = vadd.f32 %v1091_v9, %v1029_v12  ;;  %v1034_v26 = vmul.f32 %v2746_v46, %v2746_v46 }
 0x146   : > { %v1093_v18 = vadd.f32 %v1092_v16, %v1030_v6  ;;  %v958_v20 = vadd.f32 %v2740_v33, %v957_v14  ;;  %v1035_v33 = vmul.f32 %v2752_v55, %v2752_v55  ;;  %v1049_v14 = vmul.f32 %v2806_v37, %v2806_v37 }
 0x148   : > { %v959_v21 = vadd.f32 %v958_v20, %v2749_v48  ;;  %v1094_v22 = vadd.f32 %v1093_v18, %v1031_v13  ;;  %v1036_v48 = vmul.f32 %v2761_v10, %v2761_v10 }
 0x14a   : > { %v1095_v23 = vadd.f32 %v1094_v22, %v1032_v28  ;;  %v960_v35 = vadd.f32 %v959_v21, %v2755_v58 }
 0x14c   : > { %v961_v25 = vadd.f32 %v2746_v46, %v960_v35  ;;  %v1096_v30 = vadd.f32 %v1095_v23, %v1033_v24  ;;  %v1038_v46 = vmul.f32 %v2758_v7, %v2758_v7 }
 0x14e   : > { %v1097_v31 = vadd.f32 %v1096_v30, %v1034_v26  ;;  %v962_v38 = vadd.f32 %v2752_v55, %v961_v25  ;;  %v1039_v55 = vmul.f32 %v2764_v17, %v2764_v17  ;;  %v915_v30 = vld [vmem:[#allocation3] sm:$0x1] }
 0x150   : > { %v963_v39 = vadd.f32 %v962_v38, %v2761_v10  ;;  %v1098_v40 = vadd.f32 %v1097_v31, %v1035_v33  ;;  %v1040_v10 = vmul.f32 %v2773_v36, %v2773_v36  ;;  %v987_v31 = vld [vmem:[#allocation3 + $0x1] sm:$0x1] }
 0x152   : > { %v1099_v52 = vadd.f32 %v1098_v40, %v1036_v48  ;;  %v964_v58 = vadd.f32 %v963_v39, %v2767_v19 }
 0x154   : > { %v965_v44 = vadd.f32 %v2758_v7, %v964_v58  ;;  %v1100_v45 = vadd.f32 %v1099_v52, %v1037_v42  ;;  %v1042_v7 = vmul.f32 %v2770_v32, %v2770_v32 }
 0x156   : > { %v1101_v47 = vadd.f32 %v1100_v45, %v1038_v46  ;;  %v966_v49 = vadd.f32 %v2764_v17, %v965_v44  ;;  %v1043_v17 = vmul.f32 %v2776_v41, %v2776_v41 }
 0x158   : > { %v967_v51 = vadd.f32 %v966_v49, %v2773_v36  ;;  %v1102_v53 = vadd.f32 %v1101_v47, %v1039_v55  ;;  %v1044_v36 = vmul.f32 %v2785_v0, %v2785_v0  ;;  %v1135_v55 = vld [vmem:[%s3148_s2] sm:$0x1] }
 0x15a   : > { %v1103_v59 = vadd.f32 %v1102_v53, %v1040_v10  ;;  %v968_v19 = vadd.f32 %v967_v51, %v2779_v43  ;;  %v1136_v10 = vld [vmem:[%s3148_s2 + $0x1] sm:$0x1] }
 0x15c   : > { %v969_v56 = vadd.f32 %v2770_v32, %v968_v19  ;;  %v1104_v60 = vadd.f32 %v1103_v59, %v1041_v54  ;;  %v1046_v32 = vmul.f32 %v2782_v62, %v2782_v62 }
 0x15e   : > { %v1105_v50 = vadd.f32 %v1104_v60, %v1042_v7  ;;  %v970_v61 = vadd.f32 %v2776_v41, %v969_v56  ;;  %v1047_v41 = vmul.f32 %v2788_v5, %v2788_v5 }
 0x160   : > { %v971_v63 = vadd.f32 %v970_v61, %v2785_v0  ;;  %v1106_v57 = vadd.f32 %v1105_v50, %v1043_v17  ;;  %v1048_v0 = vmul.f32 %v2799_v29, %v2799_v29 }
 0x162   : > { %v1107_v1 = vadd.f32 %v1106_v57, %v1044_v36  ;;  %v972_v43 = vadd.f32 %v971_v63, %v2791_v11 }
 0x164   : > { %v973_v8 = vadd.f32 %v2782_v62, %v972_v43  ;;  %v1108_v3 = vadd.f32 %v1107_v1, %v1045_v2  ;;  %v1050_v62 = vmul.f32 %v2796_v27, %v2796_v27 }
 0x166   : > { %v1109_v4 = vadd.f32 %v1108_v3, %v1046_v32  ;;  %v974_v9 = vadd.f32 %v2788_v5, %v973_v8  ;;  %v1051_v5 = vmul.f32 %v2803_v34, %v2803_v34 }
 0x168   : > { %v975_v15 = vadd.f32 %v974_v9, %v2799_v29  ;;  %v1110_v12 = vadd.f32 %v1109_v4, %v1047_v41 }
 0x16a   : > { %v1111_v6 = vadd.f32 %v1110_v12, %v1048_v0  ;;  %v976_v11 = vadd.f32 %v975_v15, %v2806_v37 }
 0x16c   : > { %v977_v16 = vadd.f32 %v2796_v27, %v976_v11  ;;  %v1112_v13 = vadd.f32 %v1111_v6, %v1049_v14 }
 0x16e   : > { %v978_v18 = vadd.f32 %v2803_v34, %v977_v16  ;;  %v1113_v20 = vadd.f32 %v1112_v13, %v1050_v62 }
 0x170   : > { %v979_v29 = vrot.slane %v978_v18, 4  ;;  %v1114_v28 = vadd.f32 %v1113_v20, %v1051_v5 }
 0x172   : > { %v980_v21 = vadd.f32 %v979_v29, %v978_v18  ;;  %v1115_v22 = vrot.slane %v1114_v28, 4 }
 0x174   : > { %v981_v23 = vrot.slane %v980_v21, 2  ;;  %v1116_v35 = vadd.f32 %v1115_v22, %v1114_v28 }
 0x176   : > { %v982_v24 = vadd.f32 %v981_v23, %v980_v21  ;;  %v1117_v37 = vrot.slane %v1116_v35, 2 }
 0x178   : > { %v983_v26 = vrot.slane %v982_v24, 1  ;;  %v1118_v25 = vadd.f32 %v1117_v37, %v1116_v35 }
 0x17a   : > { %v984_v33 = vadd.f32 %v983_v26, %v982_v24  ;;  %v1119_v27 = vrot.slane %v1118_v25, 1 }
 0x17c   : > { %v985_v38 = vadd.f32 %v984_v33, %v915_v30  ;;  %v1120_v48 = vadd.f32 %v1119_v27, %v1118_v25 }
 0x17e   : > { %986 = vst [vmem:[#allocation3] sm:$0x1] %v985_v38  ;;  %v1121_v39 = vadd.f32 %v1120_v48, %v987_v31 }
 0x180   : > { %1122 = vst [vmem:[#allocation3 + $0x1] sm:$0x1] %v1121_v39 }
 0x185   : > { %v1126_v34 = vld [vmem:[#allocation3] sm:$0x1] }
 0x186   : > { %v1127_v40 = vmul.f32 0.001953125, %v1126_v34 }
 0x187   : > { %v1128_v52 = vld [vmem:[#allocation3 + $0x1] sm:$0x1] }
 0x188   : > { %v1129_v58 = vmul.f32 0.001953125, %v1128_v52  ;;  %v1130_v42 = vmul.f32 %v1127_v40, %v1127_v40 }
 0x18a   : > { %v1131_v46 = vsub.f32 %v1129_v58, %v1130_v42 }
 0x18c   : > { %v1132_v44 = vmax.f32 %v1131_v46, 0.0 }
 0x18e   : > { %v1133_v45 = vadd.f32 1e-05, %v1132_v44 }
 0x190   : > { %2505 = vrsqrt.f32 %v1133_v45 }
 0x19a   : > { %v2506_v47 = vpop.eup %2505 }
 0x19b   : > { %v1137_v49 = vmul.f32 %v2506_v47, %v1135_v55 }
 0x19d   : > { %1138 = vst [vmem:[#allocation4] sm:$0x1] %v1137_v49  ;;  %v1139_v51 = vmul.f32 %v1137_v49, %v1127_v40 }
 0x19f   : > { %v1140_v53 = vsub.f32 %v1136_v10, %v1139_v51 }
 0x1a1   : > { %1141 = vst [vmem:[#allocation4 + $0x1] sm:$0x1] %v1140_v53 }
 0x1a2 PF: > { %p2008_p5 = scmp.ne.s32.totalorder %s2521_s12, 1 }
 0x1a3   : > { %v1148_v59 = vld [vmem:[#allocation2] sm:$0xff] (!%p2008_p5)  ;;  %v1149_v19 = vld [vmem:[#allocation2 + $0x8] sm:$0xff] (!%p2008_p5)  ;;  %v1150_v17 = vld [vmem:[#allocation2 + $0x10] sm:$0xff] (!%p2008_p5) }
 0x1a4   : > { %1145 = sbr.rel (%p2008_p5) target bundleno = 515 (0x203), region = 48  ;;  %v2909_v54 = vld [vmem:[#allocation4] ss:$0 sm:$0xff] (!%p2008_p5)  ;;  %v1151_v50 = vld [vmem:[#allocation2 + $0x18] sm:$0xff] (!%p2008_p5)  ;;  %v1153_v57 = vld [vmem:[#allocation2 + $0x28] sm:$0xff] (!%p2008_p5) }
 0x1a5   : > { %v1217_v7 = vmul.f32 (!%p2008_p5), %v2909_v54, %v1148_v59  ;;  %v1218_v56 = vmul.f32 (!%p2008_p5), %v2909_v54, %v1149_v19  ;;  %v1219_v61 = vmul.f32 (!%p2008_p5), %v2909_v54, %v1150_v17  ;;  %v1220_v36 = vmul.f32 (!%p2008_p5), %v2909_v54, %v1151_v50  ;;  %v1152_v63 = vld [vmem:[#allocation2 + $0x20] sm:$0xff] (!%p2008_p5)  ;;  %v1154_v1 = vld [vmem:[#allocation2 + $0x30] sm:$0xff] (!%p2008_p5)  ;;  %v1155_v3 = vld [vmem:[#allocation2 + $0x38] sm:$0xff] (!%p2008_p5) }
 0x1a6   : > { %v1221_v32 = vmul.f32 (!%p2008_p5), %v2909_v54, %v1152_v63  ;;  %v1222_v8 = vmul.f32 (!%p2008_p5), %v2909_v54, %v1153_v57  ;;  %v1223_v9 = vmul.f32 (!%p2008_p5), %v2909_v54, %v1154_v1  ;;  %v1224_v0 = vmul.f32 (!%p2008_p5), %v2909_v54, %v1155_v3  ;;  %v1156_v28 = vld [vmem:[#allocation2 + $0x40] sm:$0xff] (!%p2008_p5)  ;;  %v1157_v21 = vld [vmem:[#allocation2 + $0x48] sm:$0xff] (!%p2008_p5)  ;;  %v1158_v22 = vld [vmem:[#allocation2 + $0x50] sm:$0xff] (!%p2008_p5) }
 0x1a7   : > { %v1159_v25 = vld [vmem:[#allocation2 + $0x58] sm:$0xff] (!%p2008_p5)  ;;  %v1225_v33 = vmul.f32 (!%p2008_p5), %v2909_v54, %v1156_v28  ;;  %v1226_v27 = vmul.f32 (!%p2008_p5), %v2909_v54, %v1157_v21  ;;  %v1227_v31 = vmul.f32 (!%p2008_p5), %v2909_v54, %v1158_v22  ;;  %v1160_v38 = vld [vmem:[#allocation2 + $0x60] sm:$0xff] (!%p2008_p5)  ;;  %v1161_v48 = vld [vmem:[#allocation2 + $0x68] sm:$0xff] (!%p2008_p5) }
 0x1a8   : > { %v2913_v60 = vld [vmem:[#allocation4 + $0x1] ss:$0 sm:$0xff] (!%p2008_p5)  ;;  %v1228_v46 = vmul.f32 (!%p2008_p5), %v2909_v54, %v1159_v25  ;;  %v1229_v55 = vmul.f32 (!%p2008_p5), %v2909_v54, %v1160_v38  ;;  %v1230_v47 = vmul.f32 (!%p2008_p5), %v2909_v54, %v1161_v48  ;;  %v1162_v49 = vld [vmem:[#allocation2 + $0x70] sm:$0xff] (!%p2008_p5)  ;;  %v1163_v50 = vld [vmem:[#allocation2 + $0x78] sm:$0xff] (!%p2008_p5) }
 0x1a9   : > { %v1286_v43 = vadd.f32 (!%p2008_p5), %v2913_v60, %v1217_v7  ;;  %v1287_v2 = vadd.f32 (!%p2008_p5), %v2913_v60, %v1218_v56  ;;  %v1288_v41 = vadd.f32 (!%p2008_p5), %v2913_v60, %v1219_v61  ;;  %v1289_v4 = vadd.f32 (!%p2008_p5), %v2913_v60, %v1220_v36  ;;  %v1164_v1 = vld [vmem:[#allocation2 + $0x80] sm:$0xff] (!%p2008_p5) }
 0x1aa   : > { %v1290_v16 = vadd.f32 (!%p2008_p5), %v2913_v60, %v1221_v32  ;;  %v1291_v13 = vadd.f32 (!%p2008_p5), %v2913_v60, %v1222_v8  ;;  %v1292_v29 = vadd.f32 (!%p2008_p5), %v2913_v60, %v1223_v9  ;;  %v1293_v37 = vadd.f32 (!%p2008_p5), %v2913_v60, %v1224_v0  ;;  %v1166_v9 = vld [vmem:[#allocation2 + $0x90] sm:$0xff] (!%p2008_p5) }
 0x1ab   : > { %vm1350_vm1 = vcmp.gt.f32.partialorder %v1286_v43, 0.0  ;;  %vm1351_vm2 = vcmp.gt.f32.partialorder %v1287_v2, 0.0  ;;  %v1414_v15 = vmul.f32 0.2, %v1286_v43  ;;  %v1415_v12 = vmul.f32 0.2, %v1287_v2 }
 0x1ac   : > { %vm1352_vm3 = vcmp.gt.f32.partialorder %v1288_v41, 0.0  ;;  %vm1353_vm4 = vcmp.gt.f32.partialorder %v1289_v4, 0.0  ;;  %v1416_v6 = vmul.f32 0.2, %v1288_v41  ;;  %v1417_v11 = vmul.f32 0.2, %v1289_v4 }
 0x1ad   : > { %v1478_v14 = vsel %vm1350_vm1, %v1286_v43, %v1414_v15  ;;  %v1479_v62 = vsel %vm1351_vm2, %v1287_v2, %v1415_v12  ;;  %vm1354_vm5 = vcmp.gt.f32.partialorder %v1290_v16, 0.0  ;;  %vm1355_vm6 = vcmp.gt.f32.partialorder %v1291_v13, 0.0  ;;  %v1165_v43 = vld [vmem:[#allocation2 + $0x88] sm:$0xff] }
 0x1ae   : > { %v2146_v5 = vpack.c.bf16 %v1479_v62, %v1478_v14  ;;  %v1480_v18 = vsel %vm1352_vm3, %v1288_v41, %v1416_v6  ;;  %v1481_v20 = vsel %vm1353_vm4, %v1289_v4, %v1417_v11  ;;  %v1418_v35 = vmul.f32 0.2, %v1290_v16  ;;  %v1167_v11 = vld [vmem:[#allocation2 + $0x98] sm:$0xff] }
 0x1af   : > { %v2151_v23 = vpack.c.bf16 %v1481_v20, %v1480_v18  ;;  %v1419_v24 = vmul.f32 0.2, %v1291_v13  ;;  %vm1356_vm7 = vcmp.gt.f32.partialorder %v1292_v29, 0.0  ;;  %v1420_v26 = vmul.f32 0.2, %v1292_v29 }
 0x1b0   : > { %2147 = vst [vmem:[%s3149_s3] sm:$0xff] %v2146_v5   ;;  %v1482_v30 = vsel %vm1354_vm5, %v1290_v16, %v1418_v35  ;;  %vm1357_vm8 = vcmp.gt.f32.partialorder %v1293_v37, 0.0  ;;  %v1421_v34 = vmul.f32 0.2, %v1293_v37  ;;  %v1294_v58 = vadd.f32 %v2913_v60, %v1225_v33  ;;  %v1170_v33 = vld [vmem:[#allocation2 + $0xb0] sm:$0xff] }
 0x1b1   : > { %2303 = vst [vmem:[%s3149_s3 + $0x8] sm:$0xff] %v2151_v23   ;;  %v1483_v39 = vsel %vm1355_vm6, %v1291_v13, %v1419_v24  ;;  %v1484_v40 = vsel %vm1356_vm7, %v1292_v29, %v1420_v26  ;;  %v1295_v42 = vadd.f32 %v2913_v60, %v1226_v27  ;;  %v1296_v45 = vadd.f32 %v2913_v60, %v1227_v31  ;;  %v1168_v29 = vld [vmem:[#allocation2 + $0xa0] sm:$0xff]  ;;  %v1169_v23 = vld [vmem:[#allocation2 + $0xa8] sm:$0xff] }
 0x1b2   : > { %v2156_v52 = vpack.c.bf16 %v1483_v39, %v1482_v30  ;;  %v1485_v44 = vsel %vm1357_vm8, %v1293_v37, %v1421_v34  ;;  %vm1358_vm9 = vcmp.gt.f32.partialorder %v1294_v58, 0.0  ;;  %v1422_v51 = vmul.f32 0.2, %v1294_v58  ;;  %v1171_v39 = vld [vmem:[#allocation2 + $0xb8] sm:$0xff]  ;;  %v1172_v34 = vld [vmem:[#allocation2 + $0xc0] sm:$0xff] }
 0x1b3   : > { %v2161_v10 = vpack.c.bf16 %v1485_v44, %v1484_v40  ;;  %vm1359_vm10 = vcmp.gt.f32.partialorder %v1295_v42, 0.0  ;;  %v1423_v53 = vmul.f32 0.2, %v1295_v42  ;;  %v1297_v59 = vadd.f32 %v2913_v60, %v1228_v46  ;;  %v1173_v40 = vld [vmem:[#allocation2 + $0xc8] sm:$0xff] }
 0x1b4   : > { %2304 = vst [vmem:[%s3149_s3 + $0x10] sm:$0xff] %v2156_v52   ;;  %vm1360_vm11 = vcmp.gt.f32.partialorder %v1296_v45, 0.0  ;;  %v1424_v19 = vmul.f32 0.2, %v1296_v45  ;;  %v1486_v7 = vsel %vm1358_vm9, %v1294_v58, %v1422_v51  ;;  %v1298_v56 = vadd.f32 %v2913_v60, %v1229_v55  ;;  %v1174_v51 = vld [vmem:[#allocation2 + $0xd0] sm:$0xff] }
 0x1b5   : > { %2305 = vst [vmem:[%s3149_s3 + $0x18] sm:$0xff] %v2161_v10   ;;  %v1299_v17 = vadd.f32 %v2913_v60, %v1230_v47  ;;  %v1231_v61 = vmul.f32 %v2909_v54, %v1162_v49  ;;  %v1487_v36 = vsel %vm1359_vm10, %v1295_v42, %v1423_v53  ;;  %vm1361_vm12 = vcmp.gt.f32.partialorder %v1297_v59, 0.0 }
 0x1b6   : > { %v1425_v63 = vmul.f32 0.2, %v1297_v59  ;;  %v1488_v57 = vsel %vm1360_vm11, %v1296_v45, %v1424_v19  ;;  %v2166_v2 = vpack.c.bf16 %v1487_v36, %v1486_v7  ;;  %vm1362_vm13 = vcmp.gt.f32.partialorder %v1298_v56, 0.0 }
 0x1b7   : > { %vm1363_vm14 = vcmp.gt.f32.partialorder %v1299_v17, 0.0  ;;  %v1426_v32 = vmul.f32 0.2, %v1298_v56  ;;  %v1427_v3 = vmul.f32 0.2, %v1299_v17  ;;  %v1232_v41 = vmul.f32 %v2909_v54, %v1163_v50 }
 0x1b8   : > { %v1489_v8 = vsel %vm1361_vm12, %v1297_v59, %v1425_v63  ;;  %v1300_v4 = vadd.f32 %v2913_v60, %v1231_v61  ;;  %2306 = vst [vmem:[%s3149_s3 + $0x20] sm:$0xff] %v2166_v2   ;;  %v1233_v12 = vmul.f32 %v2909_v54, %v1164_v1  ;;  %v1234_v6 = vmul.f32 %v2909_v54, %v1165_v43  ;;  %v1175_v63 = vld [vmem:[#allocation2 + $0xd8] sm:$0xff]  ;;  %v1176_v2 = vld [vmem:[#allocation2 + $0xe0] sm:$0xff] }
 0x1b9   : > { %v2171_v0 = vpack.c.bf16 %v1489_v8, %v1488_v57  ;;  %v1490_v15 = vsel %vm1362_vm13, %v1298_v56, %v1426_v32  ;;  %v1491_v14 = vsel %vm1363_vm14, %v1299_v17, %v1427_v3  ;;  %v1301_v62 = vadd.f32 %v2913_v60, %v1232_v41  ;;  %v1177_v32 = vld [vmem:[#allocation2 + $0xe8] sm:$0xff] }
 0x1ba   : > { %vm1364_vm15 = vcmp.gt.f32.partialorder %v1300_v4, 0.0  ;;  %v1428_v16 = vmul.f32 0.2, %v1300_v4  ;;  %v2176_v13 = vpack.c.bf16 %v1491_v14, %v1490_v15  ;;  %v1302_v5 = vadd.f32 %v2913_v60, %v1233_v12  ;;  %v1178_v14 = vld [vmem:[#allocation2 + $0xf0] sm:$0xff] }
 0x1bb   : > { %2307 = vst [vmem:[%s3149_s3 + $0x28] sm:$0xff] %v2171_v0   ;;  %v1303_v18 = vadd.f32 %v2913_v60, %v1234_v6  ;;  %v1235_v20 = vmul.f32 %v2909_v54, %v1166_v9  ;;  %vm1365_vm0 = vcmp.gt.f32.partialorder %v1301_v62, 0.0  ;;  %v1429_v28 = vmul.f32 0.2, %v1301_v62 }
 0x1bc   : > { %v1492_v21 = vsel %vm1364_vm15, %v1300_v4, %v1428_v16  ;;  %v1236_v22 = vmul.f32 %v2909_v54, %v1167_v11  ;;  %2308 = vst [vmem:[%s3149_s3 + $0x30] sm:$0xff] %v2176_v13   ;;  %vm1366_vm1 = vcmp.gt.f32.partialorder %v1302_v5, 0.0  ;;  %v1430_v35 = vmul.f32 0.2, %v1302_v5 }
 0x1bd   : > { %vm1367_vm2 = vcmp.gt.f32.partialorder %v1303_v18, 0.0  ;;  %v1431_v24 = vmul.f32 0.2, %v1303_v18  ;;  %v1493_v37 = vsel %vm1365_vm0, %v1301_v62, %v1429_v28  ;;  %v1304_v26 = vadd.f32 %v2913_v60, %v1235_v20 }
 0x1be   : > { %v1305_v25 = vadd.f32 %v2913_v60, %v1236_v22  ;;  %v1237_v30 = vmul.f32 %v2909_v54, %v1168_v29  ;;  %v2181_v27 = vpack.c.bf16 %v1493_v37, %v1492_v21  ;;  %v1494_v31 = vsel %vm1366_vm1, %v1302_v5, %v1430_v35  ;;  %v1180_v35 = vld [vmem:[#allocation2 + $0x100] sm:$0xff] }
 0x1bf   : > { %v1495_v38 = vsel %vm1367_vm2, %v1303_v18, %v1431_v24  ;;  %v1238_v48 = vmul.f32 %v2909_v54, %v1169_v23  ;;  %vm1368_vm3 = vcmp.gt.f32.partialorder %v1304_v26, 0.0  ;;  %v1432_v58 = vmul.f32 0.2, %v1304_v26  ;;  %v1179_v18 = vld [vmem:[#allocation2 + $0xf8] sm:$0xff] }
 0x1c0   : > { %v2186_v52 = vpack.c.bf16 %v1495_v38, %v1494_v31  ;;  %vm1369_vm4 = vcmp.gt.f32.partialorder %v1305_v25, 0.0  ;;  %2309 = vst [vmem:[%s3149_s3 + $0x38] sm:$0xff] %v2181_v27   ;;  %v1433_v42 = vmul.f32 0.2, %v1305_v25  ;;  %v1306_v46 = vadd.f32 %v2913_v60, %v1237_v30 }
 0x1c1   : > { %v1307_v44 = vadd.f32 %v2913_v60, %v1238_v48  ;;  %v1239_v45 = vmul.f32 %v2909_v54, %v1170_v33  ;;  %v1496_v55 = vsel %vm1368_vm3, %v1304_v26, %v1432_v58  ;;  %v1240_v47 = vmul.f32 %v2909_v54, %v1171_v39 }
 0x1c2   : > { %2310 = vst [vmem:[%s3149_s3 + $0x40] sm:$0xff] %v2186_v52   ;;  %v1241_v49 = vmul.f32 %v2909_v54, %v1172_v34  ;;  %v1242_v10 = vmul.f32 %v2909_v54, %v1173_v40  ;;  %v1497_v53 = vsel %vm1369_vm4, %v1305_v25, %v1433_v42  ;;  %vm1370_vm5 = vcmp.gt.f32.partialorder %v1306_v46, 0.0  ;;  %v1181_v25 = vld [vmem:[#allocation2 + $0x108] sm:$0xff]  ;;  %v1182_v34 = vld [vmem:[#allocation2 + $0x110] sm:$0xff]  ;;  %v1183_v40 = vld [vmem:[#allocation2 + $0x118] sm:$0xff] }
 0x1c3   : > { %vm1371_vm6 = vcmp.gt.f32.partialorder %v1307_v44, 0.0  ;;  %v1434_v59 = vmul.f32 0.2, %v1306_v46  ;;  %v2191_v19 = vpack.c.bf16 %v1497_v53, %v1496_v55  ;;  %v1435_v7 = vmul.f32 0.2, %v1307_v44  ;;  %v1185_v53 = vld [vmem:[#allocation2 + $0x128] sm:$0xff] }
 0x1c4   : > { %v1308_v56 = vadd.f32 %v2913_v60, %v1239_v45  ;;  %v1309_v17 = vadd.f32 %v2913_v60, %v1240_v47  ;;  %v1310_v61 = vadd.f32 %v2913_v60, %v1241_v49  ;;  %v1311_v36 = vadd.f32 %v2913_v60, %v1242_v10 }
 0x1c5   : > { %v1498_v50 = vsel %vm1370_vm5, %v1306_v46, %v1434_v59  ;;  %v1243_v57 = vmul.f32 %v2909_v54, %v1174_v51  ;;  %2311 = vst [vmem:[%s3149_s3 + $0x48] sm:$0xff] %v2191_v19   ;;  %v1499_v1 = vsel %vm1371_vm6, %v1307_v44, %v1435_v7  ;;  %v1244_v0 = vmul.f32 %v2909_v54, %v1175_v63  ;;  %v1184_v46 = vld [vmem:[#allocation2 + $0x120] sm:$0xff] }
 0x1c6   : > { %vm1372_vm7 = vcmp.gt.f32.partialorder %v1308_v56, 0.0  ;;  %vm1373_vm8 = vcmp.gt.f32.partialorder %v1309_v17, 0.0  ;;  %v1436_v43 = vmul.f32 0.2, %v1308_v56  ;;  %v2196_v8 = vpack.c.bf16 %v1499_v1, %v1498_v50 }
 0x1c7   : > { %v1437_v3 = vmul.f32 0.2, %v1309_v17  ;;  %vm1374_vm9 = vcmp.gt.f32.partialorder %v1310_v61, 0.0  ;;  %vm1375_vm10 = vcmp.gt.f32.partialorder %v1311_v36, 0.0  ;;  %v1438_v4 = vmul.f32 0.2, %v1310_v61 }
 0x1c8   : > { %v1500_v41 = vsel %vm1372_vm7, %v1308_v56, %v1436_v43  ;;  %v1439_v9 = vmul.f32 0.2, %v1311_v36  ;;  %2312 = vst [vmem:[%s3149_s3 + $0x50] sm:$0xff] %v2196_v8   ;;  %v1312_v12 = vadd.f32 %v2913_v60, %v1243_v57  ;;  %v1245_v6 = vmul.f32 %v2909_v54, %v1176_v2  ;;  %v1186_v56 = vld [vmem:[#allocation2 + $0x130] sm:$0xff]  ;;  %v1187_v43 = vld [vmem:[#allocation2 + $0x138] sm:$0xff] }
 0x1c9   : > { %v1501_v15 = vsel %vm1373_vm8, %v1309_v17, %v1437_v3  ;;  %v1246_v11 = vmul.f32 %v2909_v54, %v1177_v32  ;;  %v1502_v16 = vsel %vm1374_vm9, %v1310_v61, %v1438_v4  ;;  %v1313_v5 = vadd.f32 %v2913_v60, %v1244_v0 }
 0x1ca   : > { %v2201_v62 = vpack.c.bf16 %v1501_v15, %v1500_v41  ;;  %v1503_v13 = vsel %vm1375_vm10, %v1311_v36, %v1439_v9  ;;  %vm1376_vm11 = vcmp.gt.f32.partialorder %v1312_v12, 0.0  ;;  %v1440_v29 = vmul.f32 0.2, %v1312_v12  ;;  %v1188_v9 = vld [vmem:[#allocation2 + $0x140] sm:$0xff] }
 0x1cb   : > { %v2206_v20 = vpack.c.bf16 %v1503_v13, %v1502_v16  ;;  %v1314_v28 = vadd.f32 %v2913_v60, %v1245_v6  ;;  %vm1377_vm12 = vcmp.gt.f32.partialorder %v1313_v5, 0.0  ;;  %v1441_v21 = vmul.f32 0.2, %v1313_v5  ;;  %v1189_v6 = vld [vmem:[#allocation2 + $0x148] sm:$0xff] }
 0x1cc   : > { %2313 = vst [vmem:[%s3149_s3 + $0x58] sm:$0xff] %v2201_v62   ;;  %v1315_v22 = vadd.f32 %v2913_v60, %v1246_v11  ;;  %v1247_v23 = vmul.f32 %v2909_v54, %v1178_v14  ;;  %v1504_v24 = vsel %vm1376_vm11, %v1312_v12, %v1440_v29  ;;  %v1248_v26 = vmul.f32 %v2909_v54, %v1179_v18  ;;  %v1191_v29 = vld [vmem:[#allocation2 + $0x158] sm:$0xff] }
 0x1cd   : > { %2314 = vst [vmem:[%s3149_s3 + $0x60] sm:$0xff] %v2206_v20   ;;  %vm1378_vm13 = vcmp.gt.f32.partialorder %v1314_v28, 0.0  ;;  %v1442_v37 = vmul.f32 0.2, %v1314_v28  ;;  %v1505_v30 = vsel %vm1377_vm12, %v1313_v5, %v1441_v21  ;;  %v1249_v39 = vmul.f32 %v2909_v54, %v1180_v35  ;;  %v1190_v20 = vld [vmem:[#allocation2 + $0x150] sm:$0xff] }
 0x1ce   : > { %vm1379_vm14 = vcmp.gt.f32.partialorder %v1315_v22, 0.0  ;;  %v1443_v33 = vmul.f32 0.2, %v1315_v22  ;;  %v1316_v27 = vadd.f32 %v2913_v60, %v1247_v23  ;;  %v2211_v31 = vpack.c.bf16 %v1505_v30, %v1504_v24  ;;  %v1192_v23 = vld [vmem:[#allocation2 + $0x160] sm:$0xff] }
 0x1cf   : > { %v1506_v38 = vsel %vm1378_vm13, %v1314_v28, %v1442_v37  ;;  %v1317_v48 = vadd.f32 %v2913_v60, %v1248_v26  ;;  %v1250_v42 = vmul.f32 %v2909_v54, %v1181_v25  ;;  %v1318_v55 = vadd.f32 %v2913_v60, %v1249_v39  ;;  %v1194_v39 = vld [vmem:[#allocation2 + $0x170] sm:$0xff] }
 0x1d0   : > { %v1507_v52 = vsel %vm1379_vm14, %v1315_v22, %v1443_v33  ;;  %vm1380_vm15 = vcmp.gt.f32.partialorder %v1316_v27, 0.0  ;;  %v1444_v58 = vmul.f32 0.2, %v1316_v27  ;;  %2315 = vst [vmem:[%s3149_s3 + $0x68] sm:$0xff] %v2211_v31   ;;  %v1251_v10 = vmul.f32 %v2909_v54, %v1182_v34 }
 0x1d1   : > { %v2216_v44 = vpack.c.bf16 %v1507_v52, %v1506_v38  ;;  %vm1381_vm0 = vcmp.gt.f32.partialorder %v1317_v48, 0.0  ;;  %v1445_v45 = vmul.f32 0.2, %v1317_v48  ;;  %v1319_v49 = vadd.f32 %v2913_v60, %v1250_v42 }
 0x1d2   : > { %v1508_v47 = vsel %vm1380_vm15, %v1316_v27, %v1444_v58  ;;  %v1252_v51 = vmul.f32 %v2909_v54, %v1183_v40  ;;  %vm1382_vm1 = vcmp.gt.f32.partialorder %v1318_v55, 0.0  ;;  %v1446_v19 = vmul.f32 0.2, %v1318_v55  ;;  %v1193_v27 = vld [vmem:[#allocation2 + $0x168] sm:$0xff] }
 0x1d3   : > { %2316 = vst [vmem:[%s3149_s3 + $0x70] sm:$0xff] %v2216_v44   ;;  %v1509_v59 = vsel %vm1381_vm0, %v1317_v48, %v1445_v45  ;;  %v1253_v7 = vmul.f32 %v2909_v54, %v1184_v46  ;;  %vm1383_vm2 = vcmp.gt.f32.partialorder %v1319_v49, 0.0  ;;  %v1447_v50 = vmul.f32 0.2, %v1319_v49  ;;  %v1195_v45 = vld [vmem:[#allocation2 + $0x178] sm:$0xff] }
 0x1d4   : > { %v2221_v17 = vpack.c.bf16 %v1509_v59, %v1508_v47  ;;  %v1320_v61 = vadd.f32 %v2913_v60, %v1251_v10  ;;  %v1510_v36 = vsel %vm1382_vm1, %v1318_v55, %v1446_v19  ;;  %v1321_v63 = vadd.f32 %v2913_v60, %v1252_v51  ;;  %v1196_v59 = vld [vmem:[#allocation2 + $0x180] sm:$0xff] }
 0x1d5   : > { %v1254_v57 = vmul.f32 %v2909_v54, %v1185_v53  ;;  %v1322_v1 = vadd.f32 %v2913_v60, %v1253_v7  ;;  %v1511_v2 = vsel %vm1383_vm2, %v1319_v49, %v1447_v50  ;;  %v1255_v8 = vmul.f32 %v2909_v54, %v1186_v56 }
 0x1d6   : > { %2317 = vst [vmem:[%s3149_s3 + $0x78] sm:$0xff] %v2221_v17   ;;  %vm1384_vm3 = vcmp.gt.f32.partialorder %v1320_v61, 0.0  ;;  %v1448_v32 = vmul.f32 0.2, %v1320_v61  ;;  %v2226_v3 = vpack.c.bf16 %v1511_v2, %v1510_v36  ;;  %vm1385_vm4 = vcmp.gt.f32.partialorder %v1321_v63, 0.0  ;;  %v1197_v17 = vld [vmem:[#allocation2 + $0x188] sm:$0xff] }
 0x1d7   : > { %v1449_v41 = vmul.f32 0.2, %v1321_v63  ;;  %v1323_v4 = vadd.f32 %v2913_v60, %v1254_v57  ;;  %vm1386_vm5 = vcmp.gt.f32.partialorder %v1322_v1, 0.0  ;;  %v1450_v15 = vmul.f32 0.2, %v1322_v1  ;;  %v1198_v2 = vld [vmem:[#allocation2 + $0x190] sm:$0xff] }
 0x1d8   : > { %v1512_v0 = vsel %vm1384_vm3, %v1320_v61, %v1448_v32  ;;  %v1256_v12 = vmul.f32 %v2909_v54, %v1187_v43  ;;  %2318 = vst [vmem:[%s3149_s3 + $0x80] sm:$0xff] %v2226_v3   ;;  %v1324_v62 = vadd.f32 %v2913_v60, %v1255_v8  ;;  %v1257_v18 = vmul.f32 %v2909_v54, %v1188_v9  ;;  %v1199_v32 = vld [vmem:[#allocation2 + $0x198] sm:$0xff] }
 0x1d9   : > { %v1513_v11 = vsel %vm1385_vm4, %v1321_v63, %v1449_v41  ;;  %vm1387_vm6 = vcmp.gt.f32.partialorder %v1323_v4, 0.0  ;;  %v1451_v14 = vmul.f32 0.2, %v1323_v4  ;;  %v1514_v13 = vsel %vm1386_vm5, %v1322_v1, %v1450_v15 }
 0x1da   : > { %v2231_v16 = vpack.c.bf16 %v1513_v11, %v1512_v0  ;;  %v1325_v5 = vadd.f32 %v2913_v60, %v1256_v12  ;;  %vm1388_vm7 = vcmp.gt.f32.partialorder %v1324_v62, 0.0  ;;  %v1452_v21 = vmul.f32 0.2, %v1324_v62 }
 0x1db   : > { %v1515_v28 = vsel %vm1387_vm6, %v1323_v4, %v1451_v14  ;;  %v1258_v22 = vmul.f32 %v2909_v54, %v1189_v6  ;;  %v1326_v37 = vadd.f32 %v2913_v60, %v1257_v18  ;;  %v1259_v30 = vmul.f32 %v2909_v54, %v1190_v20  ;;  %v1200_v4 = vld [vmem:[#allocation2 + $0x1a0] sm:$0xff]  ;;  %v1202_v18 = vld [vmem:[#allocation2 + $0x1b0] sm:$0xff] }
 0x1dc   : > { %2319 = vst [vmem:[%s3149_s3 + $0x88] sm:$0xff] %v2231_v16   ;;  %v2236_v35 = vpack.c.bf16 %v1515_v28, %v1514_v13  ;;  %vm1389_vm8 = vcmp.gt.f32.partialorder %v1325_v5, 0.0  ;;  %v1453_v24 = vmul.f32 0.2, %v1325_v5  ;;  %v1516_v26 = vsel %vm1388_vm7, %v1324_v62, %v1452_v21  ;;  %v1201_v62 = vld [vmem:[#allocation2 + $0x1a8] sm:$0xff] }
 0x1dd   : > { %v1327_v25 = vadd.f32 %v2913_v60, %v1258_v22  ;;  %v1260_v33 = vmul.f32 %v2909_v54, %v1191_v29  ;;  %vm1390_vm9 = vcmp.gt.f32.partialorder %v1326_v37, 0.0  ;;  %v1454_v38 = vmul.f32 0.2, %v1326_v37 }
 0x1de   : > { %2320 = vst [vmem:[%s3149_s3 + $0x90] sm:$0xff] %v2236_v35   ;;  %v1517_v31 = vsel %vm1389_vm8, %v1325_v5, %v1453_v24  ;;  %v1261_v48 = vmul.f32 %v2909_v54, %v1192_v23  ;;  %v1328_v52 = vadd.f32 %v2913_v60, %v1259_v30  ;;  %v1262_v46 = vmul.f32 %v2909_v54, %v1193_v27  ;;  %v1203_v24 = vld [vmem:[#allocation2 + $0x1b8] sm:$0xff] }
 0x1df   : > { %v2241_v34 = vpack.c.bf16 %v1517_v31, %v1516_v26  ;;  %vm1391_vm10 = vcmp.gt.f32.partialorder %v1327_v25, 0.0  ;;  %v1455_v40 = vmul.f32 0.2, %v1327_v25  ;;  %v1518_v58 = vsel %vm1390_vm9, %v1326_v37, %v1454_v38  ;;  %v1204_v31 = vld [vmem:[#allocation2 + $0x1c0] sm:$0xff] }
 0x1e0   : > { %v1329_v42 = vadd.f32 %v2913_v60, %v1260_v33  ;;  %v1330_v44 = vadd.f32 %v2913_v60, %v1261_v48  ;;  %vm1392_vm11 = vcmp.gt.f32.partialorder %v1328_v52, 0.0  ;;  %v1456_v47 = vmul.f32 0.2, %v1328_v52 }
 0x1e1   : > { %2321 = vst [vmem:[%s3149_s3 + $0x98] sm:$0xff] %v2241_v34   ;;  %v1519_v55 = vsel %vm1391_vm10, %v1327_v25, %v1455_v40  ;;  %v1263_v49 = vmul.f32 %v2909_v54, %v1194_v39  ;;  %v1331_v53 = vadd.f32 %v2913_v60, %v1262_v46  ;;  %v1264_v56 = vmul.f32 %v2909_v54, %v1195_v45  ;;  %v1205_v34 = vld [vmem:[#allocation2 + $0x1c8] sm:$0xff] }
 0x1e2   : > { %v2246_v10 = vpack.c.bf16 %v1519_v55, %v1518_v58  ;;  %vm1393_vm12 = vcmp.gt.f32.partialorder %v1329_v42, 0.0  ;;  %v1457_v51 = vmul.f32 0.2, %v1329_v42  ;;  %v1520_v19 = vsel %vm1392_vm11, %v1328_v52, %v1456_v47  ;;  %v1206_v55 = vld [vmem:[#allocation2 + $0x1d0] sm:$0xff]  ;;  %v1207_v47 = vld [vmem:[#allocation2 + $0x1d8] sm:$0xff] }
 0x1e3   : > { %vm1394_vm13 = vcmp.gt.f32.partialorder %v1330_v44, 0.0  ;;  %v1458_v7 = vmul.f32 0.2, %v1330_v44  ;;  %vm1395_vm14 = vcmp.gt.f32.partialorder %v1331_v53, 0.0  ;;  %v1459_v61 = vmul.f32 0.2, %v1331_v53 }
 0x1e4   : > { %2322 = vst [vmem:[%s3149_s3 + $0xa0] sm:$0xff] %v2246_v10   ;;  %v1521_v50 = vsel %vm1393_vm12, %v1329_v42, %v1457_v51  ;;  %v1332_v36 = vadd.f32 %v2913_v60, %v1263_v49  ;;  %v1333_v1 = vadd.f32 %v2913_v60, %v1264_v56  ;;  %v1265_v43 = vmul.f32 %v2909_v54, %v1196_v59 }
 0x1e5   : > { %v2251_v63 = vpack.c.bf16 %v1521_v50, %v1520_v19  ;;  %v1522_v57 = vsel %vm1394_vm13, %v1330_v44, %v1458_v7  ;;  %v1523_v8 = vsel %vm1395_vm14, %v1331_v53, %v1459_v61  ;;  %v1266_v41 = vmul.f32 %v2909_v54, %v1197_v17  ;;  %v1208_v53 = vld [vmem:[#allocation2 + $0x1e0] sm:$0xff] }
 0x1e6   : > { %vm1396_vm15 = vcmp.gt.f32.partialorder %v1332_v36, 0.0  ;;  %v1460_v3 = vmul.f32 0.2, %v1332_v36  ;;  %v2256_v9 = vpack.c.bf16 %v1523_v8, %v1522_v57  ;;  %vm1397_vm0 = vcmp.gt.f32.partialorder %v1333_v1, 0.0 }
 0x1e7   : > { %2323 = vst [vmem:[%s3149_s3 + $0xa8] sm:$0xff] %v2251_v63   ;;  %v1461_v0 = vmul.f32 0.2, %v1333_v1  ;;  %v1334_v15 = vadd.f32 %v2913_v60, %v1265_v43  ;;  %v1335_v6 = vadd.f32 %v2913_v60, %v1266_v41  ;;  %v1267_v11 = vmul.f32 %v2909_v54, %v1198_v2  ;;  %v1210_v43 = vld [vmem:[#allocation2 + $0x1f0] sm:$0xff] }
 0x1e8   : > { %v1524_v12 = vsel %vm1396_vm15, %v1332_v36, %v1460_v3  ;;  %v1268_v14 = vmul.f32 %v2909_v54, %v1199_v32  ;;  %2324 = vst [vmem:[%s3149_s3 + $0xb0] sm:$0xff] %v2256_v9   ;;  %v1269_v5 = vmul.f32 %v2909_v54, %v1200_v4  ;;  %v1270_v23 = vmul.f32 %v2909_v54, %v1201_v62  ;;  %v1209_v36 = vld [vmem:[#allocation2 + $0x1e8] sm:$0xff] }
 0x1e9   : > { %v1525_v16 = vsel %vm1397_vm0, %v1333_v1, %v1461_v0  ;;  %vm1398_vm1 = vcmp.gt.f32.partialorder %v1334_v15, 0.0  ;;  %v1462_v13 = vmul.f32 0.2, %v1334_v15  ;;  %vm1399_vm2 = vcmp.gt.f32.partialorder %v1335_v6, 0.0  ;;  %v1211_v0 = vld [vmem:[#allocation2 + $0x1f8] sm:$0xff] }
 0x1ea   : > { %v2261_v20 = vpack.c.bf16 %v1525_v16, %v1524_v12  ;;  %v1463_v29 = vmul.f32 0.2, %v1335_v6  ;;  %v1336_v28 = vadd.f32 %v2913_v60, %v1267_v11  ;;  %v1337_v22 = vadd.f32 %v2913_v60, %v1268_v14 }
 0x1eb   : > { %v1526_v21 = vsel %vm1398_vm1, %v1334_v15, %v1462_v13  ;;  %v1338_v35 = vadd.f32 %v2913_v60, %v1269_v5  ;;  %v1271_v25 = vmul.f32 %v2909_v54, %v1202_v18  ;;  %v1339_v27 = vadd.f32 %v2913_v60, %v1270_v23 }
 0x1ec   : > { %2325 = vst [vmem:[%s3149_s3 + $0xb8] sm:$0xff] %v2261_v20   ;;  %v1527_v37 = vsel %vm1399_vm2, %v1335_v6, %v1463_v29  ;;  %vm1400_vm3 = vcmp.gt.f32.partialorder %v1336_v28, 0.0  ;;  %v1464_v26 = vmul.f32 0.2, %v1336_v28  ;;  %vm1401_vm4 = vcmp.gt.f32.partialorder %v1337_v22, 0.0 }
 0x1ed   : > { %v2266_v30 = vpack.c.bf16 %v1527_v37, %v1526_v21  ;;  %v1465_v33 = vmul.f32 0.2, %v1337_v22  ;;  %vm1402_vm5 = vcmp.gt.f32.partialorder %v1338_v35, 0.0  ;;  %v1466_v48 = vmul.f32 0.2, %v1338_v35 }
 0x1ee   : > { %v1528_v38 = vsel %vm1400_vm3, %v1336_v28, %v1464_v26  ;;  %v1272_v39 = vmul.f32 %v2909_v54, %v1203_v24  ;;  %vm1403_vm6 = vcmp.gt.f32.partialorder %v1339_v27, 0.0  ;;  %v1467_v52 = vmul.f32 0.2, %v1339_v27 }
 0x1ef   : > { %2326 = vst [vmem:[%s3149_s3 + $0xc0] sm:$0xff] %v2266_v30   ;;  %v1529_v40 = vsel %vm1401_vm4, %v1337_v22, %v1465_v33  ;;  %v1340_v58 = vadd.f32 %v2913_v60, %v1271_v25  ;;  %v1530_v46 = vsel %vm1402_vm5, %v1338_v35, %v1466_v48  ;;  %v1273_v45 = vmul.f32 %v2909_v54, %v1204_v31 }
 0x1f0   : > { %v2271_v42 = vpack.c.bf16 %v1529_v40, %v1528_v38  ;;  %v1341_v44 = vadd.f32 %v2913_v60, %v1272_v39  ;;  %v1531_v49 = vsel %vm1403_vm6, %v1339_v27, %v1467_v52  ;;  %v1274_v51 = vmul.f32 %v2909_v54, %v1205_v34 }
 0x1f1   : > { %vm1404_vm7 = vcmp.gt.f32.partialorder %v1340_v58, 0.0  ;;  %v1468_v10 = vmul.f32 0.2, %v1340_v58  ;;  %v2276_v59 = vpack.c.bf16 %v1531_v49, %v1530_v46  ;;  %v1342_v7 = vadd.f32 %v2913_v60, %v1273_v45 }
 0x1f2   : > { %2327 = vst [vmem:[%s3149_s3 + $0xc8] sm:$0xff] %v2271_v42   ;;  %vm1405_vm8 = vcmp.gt.f32.partialorder %v1341_v44, 0.0  ;;  %v1469_v19 = vmul.f32 0.2, %v1341_v44  ;;  %v1343_v17 = vadd.f32 %v2913_v60, %v1274_v51  ;;  %v1275_v50 = vmul.f32 %v2909_v54, %v1206_v55 }
 0x1f3   : > { %v1532_v56 = vsel %vm1404_vm7, %v1340_v58, %v1468_v10  ;;  %v1276_v61 = vmul.f32 %v2909_v54, %v1207_v47  ;;  %2328 = vst [vmem:[%s3149_s3 + $0xd0] sm:$0xff] %v2276_v59   ;;  %vm1406_vm9 = vcmp.gt.f32.partialorder %v1342_v7, 0.0  ;;  %v1470_v57 = vmul.f32 0.2, %v1342_v7 }
 0x1f4   : > { %v1533_v63 = vsel %vm1405_vm8, %v1341_v44, %v1469_v19  ;;  %v1277_v1 = vmul.f32 %v2909_v54, %v1208_v53  ;;  %vm1407_vm10 = vcmp.gt.f32.partialorder %v1343_v17, 0.0  ;;  %v1471_v32 = vmul.f32 0.2, %v1343_v17 }
 0x1f5   : > { %v2281_v2 = vpack.c.bf16 %v1533_v63, %v1532_v56  ;;  %v1344_v8 = vadd.f32 %v2913_v60, %v1275_v50  ;;  %v1534_v3 = vsel %vm1406_vm9, %v1342_v7, %v1470_v57  ;;  %v1345_v41 = vadd.f32 %v2913_v60, %v1276_v61 }
 0x1f6   : > { %v1278_v4 = vmul.f32 %v2909_v54, %v1209_v36  ;;  %v1346_v9 = vadd.f32 %v2913_v60, %v1277_v1  ;;  %v1535_v15 = vsel %vm1407_vm10, %v1343_v17, %v1471_v32  ;;  %v1279_v6 = vmul.f32 %v2909_v54, %v1210_v43 }
 0x1f7   : > { %2329 = vst [vmem:[%s3149_s3 + $0xd8] sm:$0xff] %v2281_v2   ;;  %vm1408_vm11 = vcmp.gt.f32.partialorder %v1344_v8, 0.0  ;;  %v1472_v12 = vmul.f32 0.2, %v1344_v8  ;;  %v2286_v11 = vpack.c.bf16 %v1535_v15, %v1534_v3  ;;  %vm1409_vm12 = vcmp.gt.f32.partialorder %v1345_v41, 0.0 }
 0x1f8   : > { %v1473_v14 = vmul.f32 0.2, %v1345_v41  ;;  %v1347_v62 = vadd.f32 %v2913_v60, %v1278_v4  ;;  %vm1410_vm13 = vcmp.gt.f32.partialorder %v1346_v9, 0.0  ;;  %v1474_v13 = vmul.f32 0.2, %v1346_v9 }
 0x1f9   : > { %v1536_v16 = vsel %vm1408_vm11, %v1344_v8, %v1472_v12  ;;  %v1280_v5 = vmul.f32 %v2909_v54, %v1211_v0  ;;  %2330 = vst [vmem:[%s3149_s3 + $0xe0] sm:$0xff] %v2286_v11   ;;  %v1348_v29 = vadd.f32 %v2913_v60, %v1279_v6 }
 0x1fa   : > { %v1537_v18 = vsel %vm1409_vm12, %v1345_v41, %v1473_v14  ;;  %vm1411_vm14 = vcmp.gt.f32.partialorder %v1347_v62, 0.0  ;;  %v1475_v20 = vmul.f32 0.2, %v1347_v62  ;;  %v1538_v21 = vsel %vm1410_vm13, %v1346_v9, %v1474_v13 }
 0x1fb   : > { %v2291_v28 = vpack.c.bf16 %v1537_v18, %v1536_v16  ;;  %v1349_v22 = vadd.f32 %v2913_v60, %v1280_v5  ;;  %vm1412_vm15 = vcmp.gt.f32.partialorder %v1348_v29, 0.0  ;;  %v1476_v35 = vmul.f32 0.2, %v1348_v29 }
 0x1fc   : > { %v1539_v23 = vsel %vm1411_vm14, %v1347_v62, %v1475_v20 }
 0x1fd   : > { %2331 = vst [vmem:[%s3149_s3 + $0xe8] sm:$0xff] %v2291_v28   ;;  %v2296_v54 = vpack.c.bf16 %v1539_v23, %v1538_v21  ;;  %vm1413_vm0 = vcmp.gt.f32.partialorder %v1349_v22, 0.0  ;;  %v1477_v24 = vmul.f32 0.2, %v1349_v22  ;;  %v1540_v37 = vsel %vm1412_vm15, %v1348_v29, %v1476_v35 }
 0x1ff   : > { %2332 = vst [vmem:[%s3149_s3 + $0xf0] sm:$0xff] %v2296_v54   ;;  %v1541_v26 = vsel %vm1413_vm0, %v1349_v22, %v1477_v24 }
 0x200   : > { %v2301_v25 = vpack.c.bf16 %v1541_v26, %v1540_v37 }
 0x202   : > { %2333 = vst [vmem:[%s3149_s3 + $0xf8] sm:$0xff] %v2301_v25  }
 0x203 PF: > { %s13_s14 = sadd.s32 1, %s2529_s14   ;;  %s3150_s12 = smov %s2525_s13 }
 0x204   : > { %p10_p6 = scmp.ge.s32.totalorder %s13_s14, 4   ;;  %s3151_s13 = smov %s3153_s15 }
 0x206   :  { %12 = sbr.rel (!%p10_p6) target bundleno = 2 (0x2), region = 80 }

// kernel: discriminator_forward.6
= control target key start
LH: loop header
LB: loop body
LE: loop exit
PB: predicated region body
PF: predicated region fallthrough
CT: control target
= control target key end

     0   :  { %s1066_s12 = smov 0   ;;  %s1068_s13 = smov 0   ;;  %s1211_s0 = inlined_call_operand.vmem [shape: bf16[128,128], index: 0, kind: input, shape index: {}]   ;;  %s1212_s1 = inlined_call_operand.vmem [shape: bf16[128,128], index: 1, kind: input, shape index: {}]   ;;  %s1213_s2 = inlined_call_operand.vmem [shape: f32[2,128], index: 2, kind: input, shape index: {}]   ;;  %s1214_s3 = inlined_call_operand.vmem [shape: bf16[128,128], index: 3, kind: output, shape index: {}]  }
   0x1   :  { %s1070_s14 = smov 0  }
   0x2 LB: > { %s25_s15 = sadd.s32 1, %s1039_s13  ;;  %p810_p0 = scmp.ge.s32.totalorder %s1043_s14, 1  ;;  %s1043_s14 = sphi %s1070_s14, %s13_s14   ;;  %s1039_s13 = sphi %s1068_s13, %s1216_s13   ;;  %s1035_s12 = sphi %s1066_s12, %s1215_s12  }
   0x3   : > { %p27_p1 = scmp.ge.s32.totalorder %s25_s15, 2  ;;  %p160_p2 = scmp.lt.s32.totalorder %s1043_s14, 3 }
   0x5   : > { %s1218_s15 = smov (%p27_p1, %s25_s15), 0  ;;  %p161_p3 = pnand %p810_p0, %p160_p2 }
   0x6   : > { %p811_p4 = scmp.ne.s32.totalorder (!%p161_p3), %s1035_s12, 0 }
   0x7   : > { %164 = sbr.rel (%p161_p3) target bundleno = 373 (0x175), region = 32 }
   0xe   : > { %209 = sbr.rel (%p811_p4) target bundleno = 342 (0x156), region = 36  ;;  %v1003_v0 = vld [vmem:[%s1212_s1] sm:$0xff] (!%p811_p4)   ;;  %v1004_v1 = vld [vmem:[%s1212_s1 + $0x8] sm:$0xff] (!%p811_p4)   ;;  %v1005_v2 = vld [vmem:[%s1212_s1 + $0x10] sm:$0xff] (!%p811_p4)   ;;  %v1045_v16 = vmov (!%p811_p4), 0.0  }
   0xf   : > { %930 = vmatprep.subr.bf16.mxu0 (!%p811_p4), %v1003_v0  ;;  %962 = vmatprep.subr.bf16.mxu1 (!%p811_p4), %v1003_v0  ;;  %v1006_v3 = vld [vmem:[%s1212_s1 + $0x18] sm:$0xff] (!%p811_p4)   ;;  %v1011_v4 = vld [vmem:[%s1211_s0] sm:$0xff] (!%p811_p4)   ;;  %v1008_v7 = vld [vmem:[%s1212_s1 + $0x28] sm:$0xff] (!%p811_p4)   ;;  %214 = vst [vmem:[#allocation3] sm:$0x3] (!%p811_p4), %v1045_v16 }
  0x10   : > { %931 = vmatpush3.bf16.msra.mxu0 (!%p811_p4), %v1003_v0  ;;  %970 = vmatpush3.bf16.msra.mxu1 (!%p811_p4), %v1003_v0  ;;  %v1007_v5 = vld [vmem:[%s1212_s1 + $0x20] sm:$0xff] (!%p811_p4)   ;;  %v1009_v8 = vld [vmem:[%s1212_s1 + $0x30] sm:$0xff] (!%p811_p4)   ;;  %v1010_v9 = vld [vmem:[%s1212_s1 + $0x38] sm:$0xff] (!%p811_p4)  }
  0x11   : > { %932 = vmatprep.subr.bf16.mxu0 (!%p811_p4), %v1004_v1  ;;  %963 = vmatprep.subr.bf16.mxu1 (!%p811_p4), %v1004_v1  ;;  %v1015_v6 = vld [vmem:[%s1211_s0 + $0x20] sm:$0xff] (!%p811_p4)   ;;  %v1012_v10 = vld [vmem:[%s1211_s0 + $0x8] sm:$0xff] (!%p811_p4)   ;;  %v1013_v12 = vld [vmem:[%s1211_s0 + $0x10] sm:$0xff] (!%p811_p4)  }
  0x12   : > { %946 = vmatprep.mubr.bf16.mxu0 (!%p811_p4), %v1011_v4  ;;  %954 = vmatprep.mubr.bf16.mxu1 (!%p811_p4), %v1015_v6  ;;  %v1016_v11 = vld [vmem:[%s1211_s0 + $0x28] sm:$0xff] (!%p811_p4)   ;;  %v1017_v13 = vld [vmem:[%s1211_s0 + $0x30] sm:$0xff] (!%p811_p4)   ;;  %v1014_v14 = vld [vmem:[%s1211_s0 + $0x18] sm:$0xff] (!%p811_p4)  }
  0x13   : > { %v1018_v15 = vld [vmem:[%s1211_s0 + $0x38] sm:$0xff] (!%p811_p4)  }
  0x14   : > { %933 = vmatpush3.bf16.msra.mxu0 (!%p811_p4), %v1004_v1  ;;  %971 = vmatpush3.bf16.msra.mxu1 (!%p811_p4), %v1004_v1 }
  0x15   : > { %934 = vmatprep.subr.bf16.mxu0 %v1005_v2  ;;  %964 = vmatprep.subr.bf16.mxu1 %v1005_v2 }
  0x18   : > { %935 = vmatpush3.bf16.msra.mxu0 %v1005_v2  ;;  %972 = vmatpush3.bf16.msra.mxu1 %v1005_v2 }
  0x19   : > { %936 = vmatprep.subr.bf16.mxu0 %v1006_v3  ;;  %965 = vmatprep.subr.bf16.mxu1 %v1006_v3 }
  0x1c   : > { %937 = vmatpush3.bf16.msra.mxu0 %v1006_v3  ;;  %973 = vmatpush3.bf16.msra.mxu1 %v1006_v3 }
  0x1d   : > { %938 = vmatprep.subr.bf16.mxu0 %v1007_v5  ;;  %966 = vmatprep.subr.bf16.mxu1 %v1007_v5 }
  0x20   : > { %939 = vmatpush3.bf16.msra.mxu0 %v1007_v5  ;;  %974 = vmatpush3.bf16.msra.mxu1 %v1007_v5 }
  0x21   : > { %940 = vmatprep.subr.bf16.mxu0 %v1008_v7  ;;  %967 = vmatprep.subr.bf16.mxu1 %v1008_v7 }
  0x24   : > { %941 = vmatpush3.bf16.msra.mxu0 %v1008_v7  ;;  %975 = vmatpush3.bf16.msra.mxu1 %v1008_v7 }
  0x25   : > { %942 = vmatprep.subr.bf16.mxu0 %v1009_v8  ;;  %968 = vmatprep.subr.bf16.mxu1 %v1009_v8 }
  0x28   : > { %943 = vmatpush3.bf16.msra.mxu0 %v1009_v8  ;;  %976 = vmatpush3.bf16.msra.mxu1 %v1009_v8 }
  0x29   : > { %944 = vmatprep.subr.bf16.mxu0 %v1010_v9  ;;  %969 = vmatprep.subr.bf16.mxu1 %v1010_v9 }
  0x2c   : > { %945 = vmatpush3.bf16.msra.mxu0 %v1010_v9  ;;  %977 = vmatpush3.bf16.msra.mxu1 %v1010_v9 }
  0x2f   : > { %947 = vmatmul.mubr.bf16.vlgmr.msra.gmra.mrb[0].mxu0 %v1012_v10  ;;  %955 = vmatmul.mubr.bf16.vlgmr.msra.gmra.mrb[0].mxu1 %v1016_v11 }
  0x30   : > { %950 = vmatprep.mubr.bf16.mxu0 %v1013_v12  ;;  %958 = vmatprep.mubr.bf16.mxu1 %v1017_v13 }
  0x37   : > { %951 = vmatmul.mubr.bf16.gmra.mrb[4].mxu0 %v1014_v14  ;;  %959 = vmatmul.mubr.bf16.gmra.mrb[4].mxu1 %v1018_v15 }
 0x102   : > { %v948_v17 = vpop.f32.mrb[0].mxu0  ;;  %v956_v18 = vpop.f32.mrb[0].mxu1 }
 0x103   : > { %444 = vst [vmem:[#allocation2 + $0x10] sm:$0xff] %v948_v17  ;;  %v377_v19 = vpop.f32.mrb[1].mxu0  ;;  %452 = vst [vmem:[#allocation2 + $0x50] sm:$0xff] %v956_v18  ;;  %v409_v20 = vpop.f32.mrb[1].mxu1  ;;  %v485_v28 = vmul.f32 %v948_v17, %v948_v17  ;;  %v493_v60 = vmul.f32 %v956_v18, %v956_v18 }
 0x104   : > { %442 = vst [vmem:[#allocation2] sm:$0xff] %v377_v19  ;;  %v949_v21 = vpop.f32.mrb[2].mxu0  ;;  %450 = vst [vmem:[#allocation2 + $0x40] sm:$0xff] %v409_v20  ;;  %v957_v22 = vpop.f32.mrb[2].mxu1  ;;  %v483_v25 = vmul.f32 %v377_v19, %v377_v19  ;;  %v491_v54 = vmul.f32 %v409_v20, %v409_v20 }
 0x105   : > { %445 = vst [vmem:[#allocation2 + $0x18] sm:$0xff] %v949_v21  ;;  %v380_v23 = vpop.f32.mrb[3].mxu0  ;;  %453 = vst [vmem:[#allocation2 + $0x58] sm:$0xff] %v957_v22  ;;  %v412_v24 = vpop.f32.mrb[3].mxu1  ;;  %v486_v31 = vmul.f32 %v949_v21, %v949_v21  ;;  %v494_v63 = vmul.f32 %v957_v22, %v957_v22 }
 0x106   : > { %443 = vst [vmem:[#allocation2 + $0x8] sm:$0xff] %v380_v23  ;;  %v459_v26 = vadd.f32 %v380_v23, %v377_v19  ;;  %v484_v27 = vmul.f32 %v380_v23, %v380_v23  ;;  %451 = vst [vmem:[#allocation2 + $0x48] sm:$0xff] %v412_v24  ;;  %v492_v59 = vmul.f32 %v412_v24, %v412_v24 }
 0x108   : > { %v460_v29 = vadd.f32 %v948_v17, %v459_v26  ;;  %v499_v30 = vadd.f32 %v484_v27, %v483_v25  ;;  %v482_v27 = vld [vmem:[#allocation3 + $0x1] sm:$0x1] }
 0x10a   : > { %v500_v32 = vadd.f32 %v499_v30, %v485_v28  ;;  %v952_v33 = vpop.f32.mrb[4].mxu0  ;;  %v461_v34 = vadd.f32 %v949_v21, %v460_v29  ;;  %v960_v35 = vpop.f32.mrb[4].mxu1 }
 0x10b   : > { %448 = vst [vmem:[#allocation2 + $0x30] sm:$0xff] %v952_v33  ;;  %v393_v36 = vpop.f32.mrb[5].mxu0  ;;  %456 = vst [vmem:[#allocation2 + $0x70] sm:$0xff] %v960_v35  ;;  %v425_v37 = vpop.f32.mrb[5].mxu1  ;;  %v489_v48 = vmul.f32 %v952_v33, %v952_v33  ;;  %v497_v8 = vmul.f32 %v960_v35, %v960_v35 }
 0x10c   : > { %446 = vst [vmem:[#allocation2 + $0x20] sm:$0xff] %v393_v36  ;;  %v462_v38 = vadd.f32 %v461_v34, %v393_v36  ;;  %v487_v39 = vmul.f32 %v393_v36, %v393_v36  ;;  %v501_v40 = vadd.f32 %v500_v32, %v486_v31  ;;  %v953_v41 = vpop.f32.mrb[6].mxu0  ;;  %454 = vst [vmem:[#allocation2 + $0x60] sm:$0xff] %v425_v37  ;;  %v961_v42 = vpop.f32.mrb[6].mxu1 }
 0x10d   : > { %449 = vst [vmem:[#allocation2 + $0x38] sm:$0xff] %v953_v41  ;;  %v396_v43 = vpop.f32.mrb[7].mxu0  ;;  %457 = vst [vmem:[#allocation2 + $0x78] sm:$0xff] %v961_v42  ;;  %v428_v44 = vpop.f32.mrb[7].mxu1  ;;  %v490_v51 = vmul.f32 %v953_v41, %v953_v41  ;;  %v495_v2 = vmul.f32 %v425_v37, %v425_v37  ;;  %v498_v11 = vmul.f32 %v961_v42, %v961_v42 }
 0x10e   : > { %v502_v45 = vadd.f32 %v501_v40, %v487_v39  ;;  %447 = vst [vmem:[#allocation2 + $0x28] sm:$0xff] %v396_v43  ;;  %v463_v46 = vadd.f32 %v462_v38, %v396_v43  ;;  %v488_v47 = vmul.f32 %v396_v43, %v396_v43  ;;  %455 = vst [vmem:[#allocation2 + $0x68] sm:$0xff] %v428_v44  ;;  %v534_v39 = vld [vmem:[%s1213_s2] sm:$0x1] }
 0x10f   : > { %v496_v7 = vmul.f32 %v428_v44, %v428_v44 }
 0x110   : > { %v464_v49 = vadd.f32 %v952_v33, %v463_v46  ;;  %v503_v50 = vadd.f32 %v502_v45, %v488_v47 }
 0x112   : > { %v504_v52 = vadd.f32 %v503_v50, %v489_v48  ;;  %v465_v53 = vadd.f32 %v953_v41, %v464_v49 }
 0x114   : > { %v466_v55 = vadd.f32 %v465_v53, %v409_v20  ;;  %v505_v56 = vadd.f32 %v504_v52, %v490_v51 }
 0x116   : > { %v506_v57 = vadd.f32 %v505_v56, %v491_v54  ;;  %v467_v58 = vadd.f32 %v466_v55, %v412_v24  ;;  %v458_v24 = vld [vmem:[#allocation3] sm:$0x1] }
 0x118   : > { %v468_v61 = vadd.f32 %v956_v18, %v467_v58  ;;  %v507_v62 = vadd.f32 %v506_v57, %v492_v59 }
 0x11a   : > { %v508_v0 = vadd.f32 %v507_v62, %v493_v60  ;;  %v469_v1 = vadd.f32 %v957_v22, %v468_v61 }
 0x11c   : > { %v470_v3 = vadd.f32 %v469_v1, %v425_v37  ;;  %v509_v4 = vadd.f32 %v508_v0, %v494_v63 }
 0x11e   : > { %v510_v5 = vadd.f32 %v509_v4, %v495_v2  ;;  %v471_v6 = vadd.f32 %v470_v3, %v428_v44 }
 0x120   : > { %v472_v9 = vadd.f32 %v960_v35, %v471_v6  ;;  %v511_v10 = vadd.f32 %v510_v5, %v496_v7 }
 0x122   : > { %v473_v12 = vadd.f32 %v961_v42, %v472_v9  ;;  %v512_v13 = vadd.f32 %v511_v10, %v497_v8  ;;  %v535_v42 = vld [vmem:[%s1213_s2 + $0x1] sm:$0x1] }
 0x124   : > { %v474_v14 = vrot.slane %v473_v12, 4  ;;  %v513_v15 = vadd.f32 %v512_v13, %v498_v11 }
 0x126   : > { %v475_v16 = vadd.f32 %v474_v14, %v473_v12  ;;  %v514_v17 = vrot.slane %v513_v15, 4 }
 0x128   : > { %v476_v18 = vrot.slane %v475_v16, 2  ;;  %v515_v19 = vadd.f32 %v514_v17, %v513_v15 }
 0x12a   : > { %v477_v20 = vadd.f32 %v476_v18, %v475_v16  ;;  %v516_v21 = vrot.slane %v515_v19, 2 }
 0x12c   : > { %v478_v22 = vrot.slane %v477_v20, 1  ;;  %v517_v23 = vadd.f32 %v516_v21, %v515_v19 }
 0x12e   : > { %v479_v25 = vadd.f32 %v478_v22, %v477_v20  ;;  %v518_v26 = vrot.slane %v517_v23, 1 }
 0x130   : > { %v480_v28 = vadd.f32 %v479_v25, %v458_v24  ;;  %v519_v29 = vadd.f32 %v518_v26, %v517_v23 }
 0x132   : > { %481 = vst [vmem:[#allocation3] sm:$0x1] %v480_v28  ;;  %v520_v30 = vadd.f32 %v519_v29, %v482_v27 }
 0x134   : > { %521 = vst [vmem:[#allocation3 + $0x1] sm:$0x1] %v520_v30 }
 0x139   : > { %v525_v31 = vld [vmem:[#allocation3] sm:$0x1] }
 0x13a   : > { %v526_v32 = vmul.f32 0.0078125, %v525_v31 }
 0x13b   : > { %v527_v33 = vld [vmem:[#allocation3 + $0x1] sm:$0x1] }
 0x13c   : > { %v528_v34 = vmul.f32 0.0078125, %v527_v33  ;;  %v529_v35 = vmul.f32 %v526_v32, %v526_v32 }
 0x13e   : > { %v530_v36 = vsub.f32 %v528_v34, %v529_v35 }
 0x140   : > { %v531_v37 = vmax.f32 %v530_v36, 0.0 }
 0x142   : > { %v532_v38 = vadd.f32 1e-05, %v531_v37 }
 0x144   : > { %1019 = vrsqrt.f32 %v532_v38 }
 0x14e   : > { %v1020_v40 = vpop.eup %1019 }
 0x14f   : > { %v536_v41 = vmul.f32 %v1020_v40, %v534_v39 }
 0x151   : > { %537 = vst [vmem:[#allocation4] sm:$0x1] %v536_v41  ;;  %v538_v43 = vmul.f32 %v536_v41, %v526_v32 }
 0x153   : > { %v539_v44 = vsub.f32 %v535_v42, %v538_v43 }
 0x155   : > { %540 = vst [vmem:[#allocation4 + $0x1] sm:$0x1] %v539_v44 }
 0x156 PF: > { %p828_p5 = scmp.ne.s32.totalorder %s1035_s12, 1 }
 0x157   : > { %v547_v45 = vld [vmem:[#allocation2] sm:$0xff] (!%p828_p5)  ;;  %v548_v46 = vld [vmem:[#allocation2 + $0x8] sm:$0xff] (!%p828_p5)  ;;  %v549_v51 = vld [vmem:[#allocation2 + $0x10] sm:$0xff] (!%p828_p5) }
 0x158   : > { %544 = sbr.rel (%p828_p5) target bundleno = 373 (0x175), region = 48  ;;  %v1142_v47 = vld [vmem:[#allocation4] ss:$0 sm:$0xff] (!%p828_p5)  ;;  %v550_v52 = vld [vmem:[#allocation2 + $0x18] sm:$0xff] (!%p828_p5)  ;;  %v552_v56 = vld [vmem:[#allocation2 + $0x28] sm:$0xff] (!%p828_p5) }
 0x159   : > { %v568_v48 = vmul.f32 (!%p828_p5), %v1142_v47, %v547_v45  ;;  %v569_v49 = vmul.f32 (!%p828_p5), %v1142_v47, %v548_v46  ;;  %v570_v53 = vmul.f32 (!%p828_p5), %v1142_v47, %v549_v51  ;;  %v571_v54 = vmul.f32 (!%p828_p5), %v1142_v47, %v550_v52  ;;  %v551_v55 = vld [vmem:[#allocation2 + $0x20] sm:$0xff] (!%p828_p5)  ;;  %v553_v57 = vld [vmem:[#allocation2 + $0x30] sm:$0xff] (!%p828_p5)  ;;  %v554_v62 = vld [vmem:[#allocation2 + $0x38] sm:$0xff] (!%p828_p5) }
 0x15a   : > { %v572_v60 = vmul.f32 (!%p828_p5), %v1142_v47, %v551_v55  ;;  %v573_v61 = vmul.f32 (!%p828_p5), %v1142_v47, %v552_v56  ;;  %v574_v1 = vmul.f32 (!%p828_p5), %v1142_v47, %v553_v57  ;;  %v575_v2 = vmul.f32 (!%p828_p5), %v1142_v47, %v554_v62  ;;  %v555_v15 = vld [vmem:[#allocation2 + $0x40] sm:$0xff] (!%p828_p5)  ;;  %v556_v16 = vld [vmem:[#allocation2 + $0x48] sm:$0xff] (!%p828_p5)  ;;  %v557_v17 = vld [vmem:[#allocation2 + $0x50] sm:$0xff] (!%p828_p5) }
 0x15b   : > { %v558_v23 = vld [vmem:[#allocation2 + $0x58] sm:$0xff] (!%p828_p5)  ;;  %v576_v25 = vmul.f32 (!%p828_p5), %v1142_v47, %v555_v15  ;;  %v577_v26 = vmul.f32 (!%p828_p5), %v1142_v47, %v556_v16  ;;  %v578_v27 = vmul.f32 (!%p828_p5), %v1142_v47, %v557_v17  ;;  %v559_v28 = vld [vmem:[#allocation2 + $0x60] sm:$0xff] (!%p828_p5)  ;;  %v560_v29 = vld [vmem:[#allocation2 + $0x68] sm:$0xff] (!%p828_p5) }
 0x15c   : > { %v1146_v50 = vld [vmem:[#allocation4 + $0x1] ss:$0 sm:$0xff] (!%p828_p5)  ;;  %v579_v36 = vmul.f32 (!%p828_p5), %v1142_v47, %v558_v23  ;;  %v580_v39 = vmul.f32 (!%p828_p5), %v1142_v47, %v559_v28  ;;  %v581_v40 = vmul.f32 (!%p828_p5), %v1142_v47, %v560_v29  ;;  %v561_v41 = vld [vmem:[#allocation2 + $0x70] sm:$0xff] (!%p828_p5)  ;;  %v562_v52 = vld [vmem:[#allocation2 + $0x78] sm:$0xff] (!%p828_p5) }
 0x15d   : > { %v589_v58 = vadd.f32 (!%p828_p5), %v1146_v50, %v568_v48  ;;  %v590_v59 = vadd.f32 (!%p828_p5), %v1146_v50, %v569_v49  ;;  %v591_v63 = vadd.f32 (!%p828_p5), %v1146_v50, %v570_v53  ;;  %v592_v0 = vadd.f32 (!%p828_p5), %v1146_v50, %v571_v54 }
 0x15e   : > { %v593_v9 = vadd.f32 (!%p828_p5), %v1146_v50, %v572_v60  ;;  %v594_v10 = vadd.f32 (!%p828_p5), %v1146_v50, %v573_v61  ;;  %v595_v14 = vadd.f32 (!%p828_p5), %v1146_v50, %v574_v1  ;;  %v596_v21 = vadd.f32 (!%p828_p5), %v1146_v50, %v575_v2 }
 0x15f   : > { %vm605_vm0 = vcmp.gt.f32.partialorder %v589_v58, 0.0  ;;  %vm606_vm1 = vcmp.gt.f32.partialorder %v590_v59, 0.0  ;;  %v621_v3 = vmul.f32 0.2, %v589_v58  ;;  %v622_v4 = vmul.f32 0.2, %v590_v59 }
 0x160   : > { %vm607_vm2 = vcmp.gt.f32.partialorder %v591_v63, 0.0  ;;  %vm608_vm3 = vcmp.gt.f32.partialorder %v592_v0, 0.0  ;;  %v623_v5 = vmul.f32 0.2, %v591_v63  ;;  %v624_v6 = vmul.f32 0.2, %v592_v0 }
 0x161   : > { %v637_v7 = vsel %vm605_vm0, %v589_v58, %v621_v3  ;;  %v638_v8 = vsel %vm606_vm1, %v590_v59, %v622_v4  ;;  %vm609_vm4 = vcmp.gt.f32.partialorder %v593_v9, 0.0  ;;  %vm610_vm5 = vcmp.gt.f32.partialorder %v594_v10, 0.0 }
 0x162   : > { %v870_v11 = vpack.c.bf16 %v638_v8, %v637_v7  ;;  %v639_v12 = vsel %vm607_vm2, %v591_v63, %v623_v5  ;;  %v640_v13 = vsel %vm608_vm3, %v592_v0, %v624_v6  ;;  %v625_v19 = vmul.f32 0.2, %v593_v9 }
 0x163   : > { %v875_v18 = vpack.c.bf16 %v640_v13, %v639_v12  ;;  %v626_v20 = vmul.f32 0.2, %v594_v10  ;;  %vm611_vm6 = vcmp.gt.f32.partialorder %v595_v14, 0.0  ;;  %v627_v22 = vmul.f32 0.2, %v595_v14 }
 0x164   : > { %871 = vst [vmem:[%s1214_s3] sm:$0xff] %v870_v11   ;;  %v641_v24 = vsel %vm609_vm4, %v593_v9, %v625_v19  ;;  %vm612_vm7 = vcmp.gt.f32.partialorder %v596_v21, 0.0  ;;  %v628_v31 = vmul.f32 0.2, %v596_v21  ;;  %v597_v34 = vadd.f32 %v1146_v50, %v576_v25 }
 0x165   : > { %907 = vst [vmem:[%s1214_s3 + $0x8] sm:$0xff] %v875_v18   ;;  %v642_v30 = vsel %vm610_vm5, %v594_v10, %v626_v20  ;;  %v643_v32 = vsel %vm611_vm6, %v595_v14, %v627_v22  ;;  %v598_v35 = vadd.f32 %v1146_v50, %v577_v26  ;;  %v599_v38 = vadd.f32 %v1146_v50, %v578_v27 }
 0x166   : > { %v880_v33 = vpack.c.bf16 %v642_v30, %v641_v24  ;;  %v644_v37 = vsel %vm612_vm7, %v596_v21, %v628_v31  ;;  %vm613_vm8 = vcmp.gt.f32.partialorder %v597_v34, 0.0  ;;  %v629_v43 = vmul.f32 0.2, %v597_v34 }
 0x167   : > { %v885_v42 = vpack.c.bf16 %v644_v37, %v643_v32  ;;  %vm614_vm9 = vcmp.gt.f32.partialorder %v598_v35, 0.0  ;;  %v630_v44 = vmul.f32 0.2, %v598_v35  ;;  %v600_v45 = vadd.f32 %v1146_v50, %v579_v36 }
 0x168   : > { %908 = vst [vmem:[%s1214_s3 + $0x10] sm:$0xff] %v880_v33   ;;  %vm615_vm10 = vcmp.gt.f32.partialorder %v599_v38, 0.0  ;;  %v631_v46 = vmul.f32 0.2, %v599_v38  ;;  %v645_v48 = vsel %vm613_vm8, %v597_v34, %v629_v43  ;;  %v601_v49 = vadd.f32 %v1146_v50, %v580_v39 }
 0x169   : > { %909 = vst [vmem:[%s1214_s3 + $0x18] sm:$0xff] %v885_v42   ;;  %v602_v51 = vadd.f32 %v1146_v50, %v581_v40  ;;  %v582_v53 = vmul.f32 %v1142_v47, %v561_v41  ;;  %v646_v54 = vsel %vm614_vm9, %v598_v35, %v630_v44  ;;  %vm616_vm11 = vcmp.gt.f32.partialorder %v600_v45, 0.0 }
 0x16a   : > { %v632_v55 = vmul.f32 0.2, %v600_v45  ;;  %v647_v56 = vsel %vm615_vm10, %v599_v38, %v631_v46  ;;  %v890_v57 = vpack.c.bf16 %v646_v54, %v645_v48  ;;  %vm617_vm12 = vcmp.gt.f32.partialorder %v601_v49, 0.0 }
 0x16b   : > { %vm618_vm13 = vcmp.gt.f32.partialorder %v602_v51, 0.0  ;;  %v633_v58 = vmul.f32 0.2, %v601_v49  ;;  %v634_v60 = vmul.f32 0.2, %v602_v51  ;;  %v583_v61 = vmul.f32 %v1142_v47, %v562_v52 }
 0x16c   : > { %v648_v59 = vsel %vm616_vm11, %v600_v45, %v632_v55  ;;  %v603_v62 = vadd.f32 %v1146_v50, %v582_v53  ;;  %910 = vst [vmem:[%s1214_s3 + $0x20] sm:$0xff] %v890_v57  }
 0x16d   : > { %v895_v63 = vpack.c.bf16 %v648_v59, %v647_v56  ;;  %v649_v0 = vsel %vm617_vm12, %v601_v49, %v633_v58  ;;  %v650_v1 = vsel %vm618_vm13, %v602_v51, %v634_v60  ;;  %v604_v2 = vadd.f32 %v1146_v50, %v583_v61 }
 0x16e   : > { %vm619_vm14 = vcmp.gt.f32.partialorder %v603_v62, 0.0  ;;  %v635_v3 = vmul.f32 0.2, %v603_v62  ;;  %v900_v4 = vpack.c.bf16 %v650_v1, %v649_v0 }
 0x16f   : > { %911 = vst [vmem:[%s1214_s3 + $0x28] sm:$0xff] %v895_v63   ;;  %vm620_vm15 = vcmp.gt.f32.partialorder %v604_v2, 0.0  ;;  %v636_v47 = vmul.f32 0.2, %v604_v2 }
 0x170   : > { %v651_v5 = vsel %vm619_vm14, %v603_v62, %v635_v3  ;;  %912 = vst [vmem:[%s1214_s3 + $0x30] sm:$0xff] %v900_v4  }
 0x171   : > { %v652_v6 = vsel %vm620_vm15, %v604_v2, %v636_v47 }
 0x172   : > { %v905_v7 = vpack.c.bf16 %v652_v6, %v651_v5 }
 0x174   : > { %913 = vst [vmem:[%s1214_s3 + $0x38] sm:$0xff] %v905_v7  }
 0x175 PF: > { %s13_s14 = sadd.s32 1, %s1043_s14   ;;  %s1215_s12 = smov %s1039_s13 }
 0x176   : > { %p10_p6 = scmp.ge.s32.totalorder %s13_s14, 4   ;;  %s1216_s13 = smov %s1218_s15 }
 0x178   :  { %12 = sbr.rel (!%p10_p6) target bundleno = 2 (0x2), region = 80 }

// kernel: discriminator_forward.7
= control target key start
LH: loop header
LB: loop body
LE: loop exit
PB: predicated region body
PF: predicated region fallthrough
CT: control target
= control target key end

     0   :  { %s795_s12 = smov 0   ;;  %s797_s13 = smov 0   ;;  %s898_s0 = inlined_call_operand.vmem [shape: bf16[32,256], index: 0, kind: input, shape index: {}]   ;;  %s899_s1 = inlined_call_operand.vmem [shape: bf16[256,128], index: 1, kind: input, shape index: {}]   ;;  %s900_s2 = inlined_call_operand.vmem [shape: f32[2,128], index: 2, kind: input, shape index: {}]   ;;  %s901_s3 = inlined_call_operand.vmem [shape: bf16[32,128], index: 3, kind: output, shape index: {}]  }
   0x1   :  { %s799_s14 = smov 0  }
   0x2 LB: > { %s25_s15 = sadd.s32 1, %s768_s13  ;;  %p609_p0 = scmp.ge.s32.totalorder %s772_s14, 1  ;;  %s772_s14 = sphi %s799_s14, %s13_s14   ;;  %s768_s13 = sphi %s797_s13, %s903_s13   ;;  %s764_s12 = sphi %s795_s12, %s902_s12  }
   0x3   : > { %p27_p1 = scmp.ge.s32.totalorder %s25_s15, 2  ;;  %p161_p2 = scmp.lt.s32.totalorder %s772_s14, 3 }
   0x5   : > { %s905_s15 = smov (%p27_p1, %s25_s15), 0  ;;  %p162_p3 = pnand %p609_p0, %p161_p2 }
   0x6   : > { %p610_p4 = scmp.ne.s32.totalorder (!%p162_p3), %s764_s12, 0 }
   0x7   : > { %165 = sbr.rel (%p162_p3) target bundleno = 336 (0x150), region = 32 }
   0xe   : > { %212 = sbr.rel (%p610_p4) target bundleno = 320 (0x140), region = 36  ;;  %v726_v0 = vld [vmem:[%s899_s1 + $0x40] sm:$0xff] (!%p610_p4)   ;;  %v728_v2 = vld [vmem:[%s899_s1 + $0x48] sm:$0xff] (!%p610_p4)   ;;  %v730_v4 = vld [vmem:[%s899_s1 + $0x50] sm:$0xff] (!%p610_p4)   ;;  %v774_v20 = vmov (!%p610_p4), 0.0  }
   0xf   : > { %v727_v1 = vld [vmem:[%s899_s1] sm:$0xff] (!%p610_p4)   ;;  %657 = vmatprep.subr.bf16.mxu0 (!%p610_p4), %v726_v0  ;;  %685 = vmatprep.subr.bf16.mxu1 (!%p610_p4), %v726_v0  ;;  %v729_v3 = vld [vmem:[%s899_s1 + $0x8] sm:$0xff] (!%p610_p4)   ;;  %v731_v5 = vld [vmem:[%s899_s1 + $0x10] sm:$0xff] (!%p610_p4)   ;;  %217 = vst [vmem:[#allocation3] sm:$0x3] (!%p610_p4), %v774_v20 }
  0x10   : > { %658 = vmatpush3.bf16.msra.mxu0 (!%p610_p4), %v727_v1  ;;  %693 = vmatpush3.bf16.msra.mxu1 (!%p610_p4), %v727_v1  ;;  %v732_v6 = vld [vmem:[%s899_s1 + $0x58] sm:$0xff] (!%p610_p4)   ;;  %v734_v8 = vld [vmem:[%s899_s1 + $0x60] sm:$0xff] (!%p610_p4)   ;;  %v736_v10 = vld [vmem:[%s899_s1 + $0x68] sm:$0xff] (!%p610_p4)  }
  0x11   : > { %659 = vmatprep.subr.bf16.mxu0 (!%p610_p4), %v728_v2  ;;  %686 = vmatprep.subr.bf16.mxu1 (!%p610_p4), %v728_v2  ;;  %v733_v7 = vld [vmem:[%s899_s1 + $0x18] sm:$0xff] (!%p610_p4)   ;;  %v735_v9 = vld [vmem:[%s899_s1 + $0x20] sm:$0xff] (!%p610_p4)   ;;  %v737_v13 = vld [vmem:[%s899_s1 + $0x28] sm:$0xff] (!%p610_p4)  }
  0x12   : > { %v744_v11 = vld [vmem:[%s898_s0 + $0x4] ss:$8 sps:$4 sm:$0xff] (!%p610_p4)   ;;  %v747_v12 = vld [vmem:[%s898_s0 + $0x14] ss:$8 sps:$4 sm:$0xff] (!%p610_p4)   ;;  %v742_v18 = vld [vmem:[%s898_s0] ss:$8 sps:$4 sm:$0xff] (!%p610_p4)  }
  0x13   : > { %v738_v14 = vld [vmem:[%s899_s1 + $0x70] sm:$0xff] (!%p610_p4)   ;;  %402 = vmatprep.mubr.bf16.mxu0 (!%p610_p4), %v744_v11  ;;  %410 = vmatprep.mubr.bf16.mxu1 (!%p610_p4), %v747_v12  ;;  %v740_v16 = vld [vmem:[%s899_s1 + $0x78] sm:$0xff] (!%p610_p4)  }
  0x14   : > { %660 = vmatpush3.bf16.msra.mxu0 (!%p610_p4), %v729_v3  ;;  %694 = vmatpush3.bf16.msra.mxu1 (!%p610_p4), %v729_v3  ;;  %v739_v15 = vld [vmem:[%s899_s1 + $0x30] sm:$0xff] (!%p610_p4)   ;;  %v741_v17 = vld [vmem:[%s899_s1 + $0x38] sm:$0xff] (!%p610_p4)   ;;  %v465_v3 = vld [vmem:[%s900_s2] sm:$0x1] (!%p610_p4) }
  0x15   : > { %661 = vmatprep.subr.bf16.mxu0 %v730_v4  ;;  %687 = vmatprep.subr.bf16.mxu1 %v730_v4  ;;  %v745_v19 = vld [vmem:[%s898_s0 + $0x10] ss:$8 sps:$4 sm:$0xff]  }
  0x16   : > { %v425_v52 = vld [vmem:[#allocation3] sm:$0x1]  ;;  %v437_v55 = vld [vmem:[#allocation3 + $0x1] sm:$0x1] }
  0x18   : > { %662 = vmatpush3.bf16.msra.mxu0 %v731_v5  ;;  %695 = vmatpush3.bf16.msra.mxu1 %v731_v5 }
  0x19   : > { %663 = vmatprep.subr.bf16.mxu0 %v732_v6  ;;  %688 = vmatprep.subr.bf16.mxu1 %v732_v6  ;;  %v466_v6 = vld [vmem:[%s900_s2 + $0x1] sm:$0x1] }
  0x1c   : > { %664 = vmatpush3.bf16.msra.mxu0 %v733_v7  ;;  %696 = vmatpush3.bf16.msra.mxu1 %v733_v7 }
  0x1d   : > { %665 = vmatprep.subr.bf16.mxu0 %v734_v8  ;;  %689 = vmatprep.subr.bf16.mxu1 %v734_v8 }
  0x20   : > { %666 = vmatpush3.bf16.msra.mxu0 %v735_v9  ;;  %697 = vmatpush3.bf16.msra.mxu1 %v735_v9 }
  0x21   : > { %667 = vmatprep.subr.bf16.mxu0 %v736_v10  ;;  %690 = vmatprep.subr.bf16.mxu1 %v736_v10 }
  0x24   : > { %668 = vmatpush3.bf16.msra.mxu0 %v737_v13  ;;  %698 = vmatpush3.bf16.msra.mxu1 %v737_v13 }
  0x25   : > { %669 = vmatprep.subr.bf16.mxu0 %v738_v14  ;;  %691 = vmatprep.subr.bf16.mxu1 %v738_v14 }
  0x28   : > { %670 = vmatpush3.bf16.msra.mxu0 %v739_v15  ;;  %699 = vmatpush3.bf16.msra.mxu1 %v739_v15 }
  0x29   : > { %671 = vmatprep.subr.bf16.mxu0 %v740_v16  ;;  %692 = vmatprep.subr.bf16.mxu1 %v740_v16 }
  0x2c   : > { %672 = vmatpush3.bf16.msra.mxu0 %v741_v17  ;;  %700 = vmatpush3.bf16.msra.mxu1 %v741_v17 }
  0x2f   : > { %403 = vmatmul.mubr.bf16.vlgmr.msra.gmra.mrb[0].mxu0 %v742_v18  ;;  %411 = vmatmul.mubr.bf16.vlgmr.msra.gmra.mrb[0].mxu1 %v745_v19 }
 0x102   : > { %v673_v21 = vpop.f32.mrb[0].mxu0  ;;  %v679_v22 = vpop.f32.mrb[0].mxu1 }
 0x103   : > { %v674_v23 = vpop.f32.mrb[1].mxu0  ;;  %v680_v24 = vpop.f32.mrb[1].mxu1 }
 0x104   : > { %v675_v25 = vadd.f32 %v674_v23, %v673_v21  ;;  %v676_v26 = vpop.f32.mrb[2].mxu0  ;;  %v681_v27 = vadd.f32 %v680_v24, %v679_v22  ;;  %v682_v28 = vpop.f32.mrb[2].mxu1 }
 0x105   : > { %v677_v29 = vpop.f32.mrb[3].mxu0  ;;  %v683_v30 = vpop.f32.mrb[3].mxu1 }
 0x106   : > { %421 = vst [vmem:[#allocation2] sm:$0xff] %v675_v25  ;;  %423 = vst [vmem:[#allocation2 + $0x10] sm:$0xff] %v681_v27  ;;  %v678_v31 = vadd.f32 %v677_v29, %v676_v26  ;;  %v684_v32 = vadd.f32 %v683_v30, %v682_v28  ;;  %v438_v33 = vmul.f32 %v675_v25, %v675_v25 }
 0x107   : > { %v440_v34 = vmul.f32 %v681_v27, %v681_v27 }
 0x108   : > { %422 = vst [vmem:[#allocation2 + $0x8] sm:$0xff] %v678_v31  ;;  %v426_v35 = vadd.f32 %v678_v31, %v675_v25  ;;  %v439_v36 = vmul.f32 %v678_v31, %v678_v31  ;;  %424 = vst [vmem:[#allocation2 + $0x18] sm:$0xff] %v684_v32  ;;  %v441_v40 = vmul.f32 %v684_v32, %v684_v32 }
 0x10a   : > { %v442_v37 = vadd.f32 %v439_v36, %v438_v33  ;;  %v427_v38 = vadd.f32 %v681_v27, %v426_v35 }
 0x10c   : > { %v428_v39 = vadd.f32 %v684_v32, %v427_v38  ;;  %v443_v41 = vadd.f32 %v442_v37, %v440_v34 }
 0x10e   : > { %v429_v42 = vrot.slane %v428_v39, 4  ;;  %v444_v43 = vadd.f32 %v443_v41, %v441_v40 }
 0x110   : > { %v430_v44 = vadd.f32 %v429_v42, %v428_v39  ;;  %v445_v45 = vrot.slane %v444_v43, 4 }
 0x112   : > { %v431_v46 = vrot.slane %v430_v44, 2  ;;  %v446_v47 = vadd.f32 %v445_v45, %v444_v43 }
 0x114   : > { %v432_v48 = vadd.f32 %v431_v46, %v430_v44  ;;  %v447_v49 = vrot.slane %v446_v47, 2 }
 0x116   : > { %v433_v50 = vrot.slane %v432_v48, 1  ;;  %v448_v51 = vadd.f32 %v447_v49, %v446_v47 }
 0x118   : > { %v434_v53 = vadd.f32 %v433_v50, %v432_v48  ;;  %v449_v54 = vrot.slane %v448_v51, 1 }
 0x11a   : > { %v435_v56 = vadd.f32 %v434_v53, %v425_v52  ;;  %v450_v57 = vadd.f32 %v449_v54, %v448_v51 }
 0x11c   : > { %436 = vst [vmem:[#allocation3] sm:$0x1] %v435_v56  ;;  %v451_v58 = vadd.f32 %v450_v57, %v437_v55 }
 0x11e   : > { %452 = vst [vmem:[#allocation3 + $0x1] sm:$0x1] %v451_v58 }
 0x123   : > { %v456_v59 = vld [vmem:[#allocation3] sm:$0x1] }
 0x124   : > { %v457_v60 = vmul.f32 0.03125, %v456_v59 }
 0x125   : > { %v458_v61 = vld [vmem:[#allocation3 + $0x1] sm:$0x1] }
 0x126   : > { %v459_v62 = vmul.f32 0.03125, %v458_v61  ;;  %v460_v63 = vmul.f32 %v457_v60, %v457_v60 }
 0x128   : > { %v461_v0 = vsub.f32 %v459_v62, %v460_v63 }
 0x12a   : > { %v462_v1 = vmax.f32 %v461_v0, 0.0 }
 0x12c   : > { %v463_v2 = vadd.f32 1e-05, %v462_v1 }
 0x12e   : > { %748 = vrsqrt.f32 %v463_v2 }
 0x138   : > { %v749_v4 = vpop.eup %748 }
 0x139   : > { %v467_v5 = vmul.f32 %v749_v4, %v465_v3 }
 0x13b   : > { %468 = vst [vmem:[#allocation4] sm:$0x1] %v467_v5  ;;  %v469_v7 = vmul.f32 %v467_v5, %v457_v60 }
 0x13d   : > { %v470_v8 = vsub.f32 %v466_v6, %v469_v7 }
 0x13f   : > { %471 = vst [vmem:[#allocation4 + $0x1] sm:$0x1] %v470_v8 }
 0x140 PF: > { %p631_p5 = scmp.ne.s32.totalorder %s764_s12, 1 }
 0x141   : > { %v478_v9 = vld [vmem:[#allocation2] sm:$0xff] (!%p631_p5)  ;;  %v479_v10 = vld [vmem:[#allocation2 + $0x8] sm:$0xff] (!%p631_p5)  ;;  %v480_v15 = vld [vmem:[#allocation2 + $0x10] sm:$0xff] (!%p631_p5) }
 0x142   : > { %475 = sbr.rel (%p631_p5) target bundleno = 336 (0x150), region = 48  ;;  %v632_v11 = vld [vmem:[#allocation4] ss:$0 sm:$0xff] (!%p631_p5)  ;;  %v481_v16 = vld [vmem:[#allocation2 + $0x18] sm:$0xff] (!%p631_p5) }
 0x143   : > { %v487_v12 = vmul.f32 (!%p631_p5), %v632_v11, %v478_v9  ;;  %v488_v13 = vmul.f32 (!%p631_p5), %v632_v11, %v479_v10  ;;  %v489_v17 = vmul.f32 (!%p631_p5), %v632_v11, %v480_v15  ;;  %v490_v18 = vmul.f32 (!%p631_p5), %v632_v11, %v481_v16 }
 0x146   : > { %v633_v14 = vld [vmem:[#allocation4 + $0x1] ss:$0 sm:$0xff] (!%p631_p5) }
 0x147   : > { %v496_v19 = vadd.f32 (!%p631_p5), %v633_v14, %v487_v12  ;;  %v497_v20 = vadd.f32 (!%p631_p5), %v633_v14, %v488_v13  ;;  %v498_v21 = vadd.f32 (!%p631_p5), %v633_v14, %v489_v17  ;;  %v499_v22 = vadd.f32 (!%p631_p5), %v633_v14, %v490_v18 }
 0x149   : > { %vm500_vm0 = vcmp.gt.f32.partialorder %v496_v19, 0.0  ;;  %vm501_vm1 = vcmp.gt.f32.partialorder %v497_v20, 0.0  ;;  %v504_v23 = vmul.f32 0.2, %v496_v19  ;;  %v505_v24 = vmul.f32 0.2, %v497_v20 }
 0x14a   : > { %vm502_vm2 = vcmp.gt.f32.partialorder %v498_v21, 0.0  ;;  %vm503_vm3 = vcmp.gt.f32.partialorder %v499_v22, 0.0  ;;  %v506_v25 = vmul.f32 0.2, %v498_v21  ;;  %v507_v26 = vmul.f32 0.2, %v499_v22 }
 0x14b   : > { %v508_v27 = vsel %vm500_vm0, %v496_v19, %v504_v23  ;;  %v509_v28 = vsel %vm501_vm1, %v497_v20, %v505_v24 }
 0x14c   : > { %v649_v29 = vpack.c.bf16 %v509_v28, %v508_v27  ;;  %v510_v30 = vsel %vm502_vm2, %v498_v21, %v506_v25  ;;  %v511_v31 = vsel %vm503_vm3, %v499_v22, %v507_v26 }
 0x14d   : > { %v654_v32 = vpack.c.bf16 %v511_v31, %v510_v30 }
 0x14e   : > { %650 = vst [vmem:[%s901_s3] sm:$0xff] %v649_v29  }
 0x14f   : > { %656 = vst [vmem:[%s901_s3 + $0x8] sm:$0xff] %v654_v32  }
 0x150 PF: > { %s13_s14 = sadd.s32 1, %s772_s14   ;;  %s902_s12 = smov %s768_s13 }
 0x151   : > { %p10_p6 = scmp.ge.s32.totalorder %s13_s14, 4   ;;  %s903_s13 = smov %s905_s15 }
 0x153   :  { %12 = sbr.rel (!%p10_p6) target bundleno = 2 (0x2), region = 80 }

// kernel: discriminator_forward.8
= control target key start
LH: loop header
LB: loop body
LE: loop exit
PB: predicated region body
PF: predicated region fallthrough
CT: control target
= control target key end

     0   :  { %s898_s12 = smov 0   ;;  %s900_s13 = smov 0   ;;  %s1040_s0 = inlined_call_operand.vmem [shape: bf16[8,512], index: 0, kind: input, shape index: {}]   ;;  %s1041_s1 = inlined_call_operand.vmem [shape: bf16[512,128], index: 1, kind: input, shape index: {}]   ;;  %s1042_s2 = inlined_call_operand.vmem [shape: f32[2,128], index: 2, kind: input, shape index: {}]   ;;  %s1043_s3 = inlined_call_operand.vmem [shape: bf16[8,128], index: 3, kind: output, shape index: {}]  }
   0x1   :  { %s902_s14 = smov 0  }
   0x2 LB: > { %s25_s15 = sadd.s32 1, %s871_s13  ;;  %p701_p0 = scmp.ge.s32.totalorder %s875_s14, 1  ;;  %s875_s14 = sphi %s902_s14, %s13_s14   ;;  %s871_s13 = sphi %s900_s13, %s1045_s13   ;;  %s867_s12 = sphi %s898_s12, %s1044_s12  }
   0x3   : > { %p27_p1 = scmp.ge.s32.totalorder %s25_s15, 2  ;;  %p159_p2 = scmp.lt.s32.totalorder %s875_s14, 3 }
   0x5   : > { %s1047_s15 = smov (%p27_p1, %s25_s15), 0  ;;  %p160_p3 = pnand %p701_p0, %p159_p2 }
   0x6   : > { %p702_p4 = scmp.ne.s32.totalorder (!%p160_p3), %s867_s12, 0 }
   0x7   : > { %163 = sbr.rel (%p160_p3) target bundleno = 331 (0x14b), region = 32 }
   0xe   : > { %204 = sbr.rel (%p702_p4) target bundleno = 316 (0x13c), region = 36  ;;  %v815_v0 = vld [vmem:[%s1041_s1 + $0x40] sm:$0xff] (!%p702_p4)   ;;  %v819_v4 = vld [vmem:[%s1041_s1 + $0x48] sm:$0xff] (!%p702_p4)   ;;  %v823_v8 = vld [vmem:[%s1041_s1 + $0x50] sm:$0xff] (!%p702_p4)   ;;  %v877_v38 = vmov (!%p702_p4), 0.0  }
   0xf   : > { %v816_v1 = vld [vmem:[%s1041_s1 + $0xc0] sm:$0xff] (!%p702_p4)   ;;  %746 = vmatprep.subr.bf16.mxu0 (!%p702_p4), %v815_v0  ;;  %v820_v5 = vld [vmem:[%s1041_s1 + $0xc8] sm:$0xff] (!%p702_p4)   ;;  %v824_v9 = vld [vmem:[%s1041_s1 + $0xd0] sm:$0xff] (!%p702_p4)   ;;  %209 = vst [vmem:[#allocation3] sm:$0x3] (!%p702_p4), %v877_v38 }
  0x10   : > { %v817_v2 = vld [vmem:[%s1041_s1] sm:$0xff] (!%p702_p4)   ;;  %768 = vmatprep.subr.bf16.mxu1 (!%p702_p4), %v816_v1  ;;  %v821_v6 = vld [vmem:[%s1041_s1 + $0x8] sm:$0xff] (!%p702_p4)   ;;  %v825_v10 = vld [vmem:[%s1041_s1 + $0x10] sm:$0xff] (!%p702_p4)  }
  0x11   : > { %v818_v3 = vld [vmem:[%s1041_s1 + $0x80] sm:$0xff] (!%p702_p4)   ;;  %747 = vmatpush3.bf16.msra.mxu0 (!%p702_p4), %v817_v2  ;;  %v822_v7 = vld [vmem:[%s1041_s1 + $0x88] sm:$0xff] (!%p702_p4)   ;;  %v826_v11 = vld [vmem:[%s1041_s1 + $0x90] sm:$0xff] (!%p702_p4)  }
  0x12   : > { %769 = vmatpush3.bf16.msra.mxu1 (!%p702_p4), %v818_v3  ;;  %748 = vmatprep.subr.bf16.mxu0 (!%p702_p4), %v819_v4  ;;  %v827_v12 = vld [vmem:[%s1041_s1 + $0x58] sm:$0xff] (!%p702_p4)   ;;  %v831_v16 = vld [vmem:[%s1041_s1 + $0x60] sm:$0xff] (!%p702_p4)   ;;  %v835_v20 = vld [vmem:[%s1041_s1 + $0x68] sm:$0xff] (!%p702_p4)  }
  0x13   : > { %770 = vmatprep.subr.bf16.mxu1 (!%p702_p4), %v820_v5  ;;  %v828_v13 = vld [vmem:[%s1041_s1 + $0xd8] sm:$0xff] (!%p702_p4)   ;;  %v832_v17 = vld [vmem:[%s1041_s1 + $0xe0] sm:$0xff] (!%p702_p4)   ;;  %v836_v21 = vld [vmem:[%s1041_s1 + $0xe8] sm:$0xff] (!%p702_p4)  }
  0x14   : > { %v829_v14 = vld [vmem:[%s1041_s1 + $0x18] sm:$0xff] (!%p702_p4)   ;;  %v833_v18 = vld [vmem:[%s1041_s1 + $0x20] sm:$0xff] (!%p702_p4)   ;;  %v837_v22 = vld [vmem:[%s1041_s1 + $0x28] sm:$0xff] (!%p702_p4)  }
  0x15   : > { %749 = vmatpush3.bf16.msra.mxu0 %v821_v6  ;;  %v830_v15 = vld [vmem:[%s1041_s1 + $0x98] sm:$0xff]   ;;  %v834_v19 = vld [vmem:[%s1041_s1 + $0xa0] sm:$0xff]   ;;  %v838_v23 = vld [vmem:[%s1041_s1 + $0xa8] sm:$0xff]  }
  0x16   : > { %771 = vmatpush3.bf16.msra.mxu1 %v822_v7  ;;  %750 = vmatprep.subr.bf16.mxu0 %v823_v8  ;;  %v839_v24 = vld [vmem:[%s1041_s1 + $0x70] sm:$0xff]   ;;  %v843_v28 = vld [vmem:[%s1041_s1 + $0x78] sm:$0xff]   ;;  %v210_v32 = vld [vmem:[%s1040_s0] sm:$0xff] }
  0x17   : > { %772 = vmatprep.subr.bf16.mxu1 %v824_v9  ;;  %v840_v25 = vld [vmem:[%s1041_s1 + $0xf0] sm:$0xff]   ;;  %v844_v29 = vld [vmem:[%s1041_s1 + $0xf8] sm:$0xff]   ;;  %v211_v33 = vld [vmem:[%s1040_s0 + $0x8] sm:$0xff]  ;;  %v703_v34 = vcombine.low %v210_v32, %v210_v32  ;;  %v704_v35 = vcombine.high %v210_v32, %v210_v32 }
  0x18   : > { %v841_v26 = vld [vmem:[%s1041_s1 + $0x30] sm:$0xff]   ;;  %v845_v30 = vld [vmem:[%s1041_s1 + $0x38] sm:$0xff]   ;;  %v705_v36 = vcombine.low %v211_v33, %v211_v33  ;;  %v706_v37 = vcombine.high %v211_v33, %v211_v33  ;;  %v565_v60 = vld [vmem:[#allocation3] sm:$0x1] }
  0x19   : > { %751 = vmatpush3.bf16.msra.mxu0 %v825_v10  ;;  %v842_v27 = vld [vmem:[%s1041_s1 + $0xb0] sm:$0xff]   ;;  %v846_v31 = vld [vmem:[%s1041_s1 + $0xb8] sm:$0xff]   ;;  %514 = vmatprep.mubr.bf16.mxu0 %v704_v35  ;;  %v574_v63 = vld [vmem:[#allocation3 + $0x1] sm:$0x1] }
  0x1a   : > { %773 = vmatpush3.bf16.msra.mxu1 %v826_v11  ;;  %752 = vmatprep.subr.bf16.mxu0 %v827_v12  ;;  %v596_v11 = vld [vmem:[%s1042_s2] sm:$0x1] }
  0x1b   : > { %774 = vmatprep.subr.bf16.mxu1 %v828_v13  ;;  %554 = vmatprep.mubr.bf16.mxu1 %v706_v37 }
  0x1d   : > { %753 = vmatpush3.bf16.msra.mxu0 %v829_v14  ;;  %v597_v14 = vld [vmem:[%s1042_s2 + $0x1] sm:$0x1] }
  0x1e   : > { %775 = vmatpush3.bf16.msra.mxu1 %v830_v15  ;;  %754 = vmatprep.subr.bf16.mxu0 %v831_v16 }
  0x1f   : > { %776 = vmatprep.subr.bf16.mxu1 %v832_v17 }
  0x21   : > { %755 = vmatpush3.bf16.msra.mxu0 %v833_v18 }
  0x22   : > { %777 = vmatpush3.bf16.msra.mxu1 %v834_v19  ;;  %756 = vmatprep.subr.bf16.mxu0 %v835_v20 }
  0x23   : > { %778 = vmatprep.subr.bf16.mxu1 %v836_v21 }
  0x25   : > { %757 = vmatpush3.bf16.msra.mxu0 %v837_v22 }
  0x26   : > { %779 = vmatpush3.bf16.msra.mxu1 %v838_v23  ;;  %758 = vmatprep.subr.bf16.mxu0 %v839_v24 }
  0x27   : > { %780 = vmatprep.subr.bf16.mxu1 %v840_v25 }
  0x29   : > { %759 = vmatpush3.bf16.msra.mxu0 %v841_v26 }
  0x2a   : > { %781 = vmatpush3.bf16.msra.mxu1 %v842_v27  ;;  %760 = vmatprep.subr.bf16.mxu0 %v843_v28 }
  0x2b   : > { %782 = vmatprep.subr.bf16.mxu1 %v844_v29 }
  0x2d   : > { %761 = vmatpush3.bf16.msra.mxu0 %v845_v30 }
  0x2e   : > { %783 = vmatpush3.bf16.msra.mxu1 %v846_v31 }
  0x30   : > { %515 = vmatmul.mubr.bf16.vlgmr.msra.gmra.mrb[0].mxu0 %v703_v34 }
  0x31   : > { %555 = vmatmul.mubr.bf16.vlgmr.msra.gmra.mrb[0].mxu1 %v705_v36 }
 0x103   : > { %v762_v39 = vpop.f32.mrb[0].mxu0 }
 0x104   : > { %v784_v40 = vpop.f32.mrb[0].mxu1  ;;  %v763_v41 = vpop.f32.mrb[1].mxu0 }
 0x105   : > { %v785_v42 = vpop.f32.mrb[1].mxu1  ;;  %v764_v43 = vadd.f32 %v763_v41, %v762_v39  ;;  %v765_v45 = vpop.f32.mrb[2].mxu0 }
 0x106   : > { %v786_v44 = vadd.f32 %v785_v42, %v784_v40  ;;  %v787_v46 = vpop.f32.mrb[2].mxu1  ;;  %v766_v47 = vpop.f32.mrb[3].mxu0 }
 0x107   : > { %v788_v48 = vpop.f32.mrb[3].mxu1 }
 0x108   : > { %v557_v49 = vadd.f32 %v786_v44, %v764_v43 }
 0x10a   : > { %564 = vst [vmem:[#allocation2] sm:$0xff] %v557_v49  ;;  %v566_v50 = vrot.slane %v557_v49, 4  ;;  %v575_v51 = vmul.f32 %v557_v49, %v557_v49 }
 0x10c   : > { %v567_v52 = vadd.f32 %v566_v50, %v557_v49  ;;  %v576_v53 = vrot.slane %v575_v51, 4 }
 0x10e   : > { %v568_v54 = vrot.slane %v567_v52, 2  ;;  %v577_v55 = vadd.f32 %v576_v53, %v575_v51 }
 0x110   : > { %v569_v56 = vadd.f32 %v568_v54, %v567_v52  ;;  %v578_v57 = vrot.slane %v577_v55, 2 }
 0x112   : > { %v570_v58 = vrot.slane %v569_v56, 1  ;;  %v579_v59 = vadd.f32 %v578_v57, %v577_v55 }
 0x114   : > { %v571_v61 = vadd.f32 %v570_v58, %v569_v56  ;;  %v580_v62 = vrot.slane %v579_v59, 1 }
 0x116   : > { %v572_v0 = vadd.f32 %v571_v61, %v565_v60  ;;  %v581_v1 = vadd.f32 %v580_v62, %v579_v59 }
 0x118   : > { %573 = vst [vmem:[#allocation3] sm:$0x1] %v572_v0  ;;  %v582_v2 = vadd.f32 %v581_v1, %v574_v63 }
 0x11a   : > { %583 = vst [vmem:[#allocation3 + $0x1] sm:$0x1] %v582_v2 }
 0x11f   : > { %v587_v3 = vld [vmem:[#allocation3] sm:$0x1] }
 0x120   : > { %v588_v4 = vmul.f32 0.125, %v587_v3 }
 0x121   : > { %v589_v5 = vld [vmem:[#allocation3 + $0x1] sm:$0x1] }
 0x122   : > { %v590_v6 = vmul.f32 0.125, %v589_v5  ;;  %v591_v7 = vmul.f32 %v588_v4, %v588_v4 }
 0x124   : > { %v592_v8 = vsub.f32 %v590_v6, %v591_v7 }
 0x126   : > { %v593_v9 = vmax.f32 %v592_v8, 0.0 }
 0x128   : > { %v594_v10 = vadd.f32 1e-05, %v593_v9 }
 0x12a   : > { %851 = vrsqrt.f32 %v594_v10 }
 0x134   : > { %v852_v12 = vpop.eup %851 }
 0x135   : > { %v598_v13 = vmul.f32 %v852_v12, %v596_v11 }
 0x137   : > { %599 = vst [vmem:[#allocation4] sm:$0x1] %v598_v13  ;;  %v600_v15 = vmul.f32 %v598_v13, %v588_v4 }
 0x139   : > { %v601_v16 = vsub.f32 %v597_v14, %v600_v15 }
 0x13b   : > { %602 = vst [vmem:[#allocation4 + $0x1] sm:$0x1] %v601_v16 }
 0x13c PF: > { %p739_p5 = scmp.ne.s32.totalorder %s867_s12, 1 }
 0x13d   : > { %v609_v17 = vld [vmem:[#allocation2] sm:$0xff] (!%p739_p5) }
 0x13e   : > { %606 = sbr.rel (%p739_p5) target bundleno = 331 (0x14b), region = 48  ;;  %v740_v18 = vld [vmem:[#allocation4] ss:$0 sm:$0xff] (!%p739_p5) }
 0x13f   : > { %v615_v20 = vmul.f32 (!%p739_p5), %v740_v18, %v609_v17 }
 0x142   : > { %v741_v19 = vld [vmem:[#allocation4 + $0x1] ss:$0 sm:$0xff] (!%p739_p5) }
 0x143   : > { %v621_v21 = vadd.f32 (!%p739_p5), %v741_v19, %v615_v20 }
 0x145   : > { %vm622_vm0 = vcmp.gt.f32.partialorder %v621_v21, 0.0  ;;  %v623_v22 = vmul.f32 0.2, %v621_v21 }
 0x147   : > { %v624_v23 = vsel %vm622_vm0, %v621_v21, %v623_v22 }
 0x148   : > { %v625_v24 = vpack.c.bf16 %v624_v23, %v624_v23 }
 0x14a   : > { %626 = vst [vmem:[%s1043_s3] sm:$0xf] %v625_v24 }
 0x14b PF: > { %s13_s14 = sadd.s32 1, %s875_s14   ;;  %s1044_s12 = smov %s871_s13 }
 0x14c   : > { %p10_p6 = scmp.ge.s32.totalorder %s13_s14, 4   ;;  %s1045_s13 = smov %s1047_s15 }
 0x14e   :  { %12 = sbr.rel (!%p10_p6) target bundleno = 2 (0x2), region = 80 }

// kernel: discriminator_forward.9
= control target key start
LH: loop header
LB: loop body
LE: loop exit
PB: predicated region body
PF: predicated region fallthrough
CT: control target
= control target key end

     0   :  { %s1186_s1 = inlined_call_operand.vmem [shape: bf16[1024,128], index: 1, kind: input, shape index: {}]   ;;  %s1187_s0 = inlined_call_operand.vmem [shape: bf16[8,1024], index: 0, kind: input, shape index: {}]   ;;  %s1188_s2 = inlined_call_operand.vmem [shape: f32[8,128], index: 2, kind: output, shape index: {}]  }
   0x1   :  { %v888_v0 = vld [vmem:[%s1186_s1 + $0x40] sm:$0xff]   ;;  %v892_v4 = vld [vmem:[%s1186_s1 + $0x48] sm:$0xff]   ;;  %v896_v8 = vld [vmem:[%s1186_s1 + $0x50] sm:$0xff]  }
   0x2   :  { %v889_v1 = vld [vmem:[%s1186_s1 + $0xc0] sm:$0xff]   ;;  %800 = vmatprep.subr.bf16.mxu0 %v888_v0  ;;  %v893_v5 = vld [vmem:[%s1186_s1 + $0xc8] sm:$0xff]   ;;  %v897_v9 = vld [vmem:[%s1186_s1 + $0xd0] sm:$0xff]  }
   0x3   :  { %v890_v2 = vld [vmem:[%s1186_s1] sm:$0xff]   ;;  %822 = vmatprep.subr.bf16.mxu1 %v889_v1  ;;  %v894_v6 = vld [vmem:[%s1186_s1 + $0x8] sm:$0xff]   ;;  %v898_v10 = vld [vmem:[%s1186_s1 + $0x10] sm:$0xff]  }
   0x4   :  { %v891_v3 = vld [vmem:[%s1186_s1 + $0x80] sm:$0xff]   ;;  %801 = vmatpush3.bf16.msra.mxu0 %v890_v2  ;;  %v895_v7 = vld [vmem:[%s1186_s1 + $0x88] sm:$0xff]   ;;  %v899_v11 = vld [vmem:[%s1186_s1 + $0x90] sm:$0xff]  }
   0x5   :  { %823 = vmatpush3.bf16.msra.mxu1 %v891_v3  ;;  %802 = vmatprep.subr.bf16.mxu0 %v892_v4  ;;  %v900_v12 = vld [vmem:[%s1186_s1 + $0x58] sm:$0xff]   ;;  %v904_v16 = vld [vmem:[%s1186_s1 + $0x60] sm:$0xff]   ;;  %v908_v20 = vld [vmem:[%s1186_s1 + $0x68] sm:$0xff]  }
   0x6   :  { %824 = vmatprep.subr.bf16.mxu1 %v893_v5  ;;  %v901_v13 = vld [vmem:[%s1186_s1 + $0xd8] sm:$0xff]   ;;  %v905_v17 = vld [vmem:[%s1186_s1 + $0xe0] sm:$0xff]   ;;  %v909_v21 = vld [vmem:[%s1186_s1 + $0xe8] sm:$0xff]  }
   0x7   :  { %v902_v14 = vld [vmem:[%s1186_s1 + $0x18] sm:$0xff]   ;;  %v906_v18 = vld [vmem:[%s1186_s1 + $0x20] sm:$0xff]   ;;  %v910_v22 = vld [vmem:[%s1186_s1 + $0x28] sm:$0xff]  }
   0x8   :  { %803 = vmatpush3.bf16.msra.mxu0 %v894_v6  ;;  %v903_v15 = vld [vmem:[%s1186_s1 + $0x98] sm:$0xff]   ;;  %v907_v19 = vld [vmem:[%s1186_s1 + $0xa0] sm:$0xff]   ;;  %v911_v23 = vld [vmem:[%s1186_s1 + $0xa8] sm:$0xff]  }
   0x9   :  { %825 = vmatpush3.bf16.msra.mxu1 %v895_v7  ;;  %804 = vmatprep.subr.bf16.mxu0 %v896_v8  ;;  %v912_v24 = vld [vmem:[%s1186_s1 + $0x70] sm:$0xff]   ;;  %v916_v28 = vld [vmem:[%s1186_s1 + $0x78] sm:$0xff]   ;;  %v12_v32 = vld [vmem:[%s1187_s0] sm:$0xff] }
   0xa   :  { %826 = vmatprep.subr.bf16.mxu1 %v897_v9  ;;  %v913_v25 = vld [vmem:[%s1186_s1 + $0xf0] sm:$0xff]   ;;  %v917_v29 = vld [vmem:[%s1186_s1 + $0xf8] sm:$0xff]   ;;  %v13_v33 = vld [vmem:[%s1187_s0 + $0x8] sm:$0xff]  ;;  %v727_v34 = vcombine.low %v12_v32, %v12_v32  ;;  %v728_v35 = vcombine.high %v12_v32, %v12_v32 }
   0xb   :  { %v914_v26 = vld [vmem:[%s1186_s1 + $0x30] sm:$0xff]   ;;  %v918_v30 = vld [vmem:[%s1186_s1 + $0x38] sm:$0xff]   ;;  %v729_v36 = vcombine.low %v13_v33, %v13_v33  ;;  %v730_v37 = vcombine.high %v13_v33, %v13_v33  ;;  %v924_v38 = vld [vmem:[%s1186_s1 + $0x140] sm:$0xff]  }
   0xc   :  { %805 = vmatpush3.bf16.msra.mxu0 %v898_v10  ;;  %v915_v27 = vld [vmem:[%s1186_s1 + $0xb0] sm:$0xff]   ;;  %v919_v31 = vld [vmem:[%s1186_s1 + $0xb8] sm:$0xff]   ;;  %v925_v39 = vld [vmem:[%s1186_s1 + $0x1c0] sm:$0xff]   ;;  %588 = vmatprep.mubr.bf16.mxu0 %v728_v35 }
   0xd   :  { %827 = vmatpush3.bf16.msra.mxu1 %v899_v11  ;;  %806 = vmatprep.subr.bf16.mxu0 %v900_v12  ;;  %v926_v40 = vld [vmem:[%s1186_s1 + $0x100] sm:$0xff]   ;;  %v928_v42 = vld [vmem:[%s1186_s1 + $0x148] sm:$0xff]   ;;  %v932_v46 = vld [vmem:[%s1186_s1 + $0x150] sm:$0xff]  }
   0xe   :  { %828 = vmatprep.subr.bf16.mxu1 %v901_v13  ;;  %628 = vmatprep.mubr.bf16.mxu1 %v730_v37  ;;  %v927_v41 = vld [vmem:[%s1186_s1 + $0x180] sm:$0xff]   ;;  %v929_v43 = vld [vmem:[%s1186_s1 + $0x1c8] sm:$0xff]   ;;  %v933_v47 = vld [vmem:[%s1186_s1 + $0x1d0] sm:$0xff]  }
   0xf   :  { %v930_v44 = vld [vmem:[%s1186_s1 + $0x108] sm:$0xff]   ;;  %v934_v48 = vld [vmem:[%s1186_s1 + $0x110] sm:$0xff]   ;;  %v936_v50 = vld [vmem:[%s1186_s1 + $0x158] sm:$0xff]  }
  0x10   :  { %807 = vmatpush3.bf16.msra.mxu0 %v902_v14  ;;  %v931_v45 = vld [vmem:[%s1186_s1 + $0x188] sm:$0xff]   ;;  %v935_v49 = vld [vmem:[%s1186_s1 + $0x190] sm:$0xff]   ;;  %v937_v51 = vld [vmem:[%s1186_s1 + $0x1d8] sm:$0xff]  }
  0x11   :  { %829 = vmatpush3.bf16.msra.mxu1 %v903_v15  ;;  %808 = vmatprep.subr.bf16.mxu0 %v904_v16  ;;  %v938_v52 = vld [vmem:[%s1186_s1 + $0x118] sm:$0xff]   ;;  %v940_v54 = vld [vmem:[%s1186_s1 + $0x160] sm:$0xff]   ;;  %v944_v58 = vld [vmem:[%s1186_s1 + $0x168] sm:$0xff]  }
  0x12   :  { %830 = vmatprep.subr.bf16.mxu1 %v905_v17  ;;  %v939_v53 = vld [vmem:[%s1186_s1 + $0x198] sm:$0xff]   ;;  %v941_v55 = vld [vmem:[%s1186_s1 + $0x1e0] sm:$0xff]   ;;  %v945_v59 = vld [vmem:[%s1186_s1 + $0x1e8] sm:$0xff]  }
  0x13   :  { %v942_v56 = vld [vmem:[%s1186_s1 + $0x120] sm:$0xff]   ;;  %v946_v60 = vld [vmem:[%s1186_s1 + $0x128] sm:$0xff]   ;;  %v948_v62 = vld [vmem:[%s1186_s1 + $0x170] sm:$0xff]  }
  0x14   :  { %809 = vmatpush3.bf16.msra.mxu0 %v906_v18  ;;  %v943_v57 = vld [vmem:[%s1186_s1 + $0x1a0] sm:$0xff]   ;;  %v947_v61 = vld [vmem:[%s1186_s1 + $0x1a8] sm:$0xff]   ;;  %v949_v63 = vld [vmem:[%s1186_s1 + $0x1f0] sm:$0xff]  }
  0x15   :  { %831 = vmatpush3.bf16.msra.mxu1 %v907_v19  ;;  %810 = vmatprep.subr.bf16.mxu0 %v908_v20  ;;  %v950_v0 = vld [vmem:[%s1186_s1 + $0x130] sm:$0xff]   ;;  %v952_v2 = vld [vmem:[%s1186_s1 + $0x178] sm:$0xff]  }
  0x16   :  { %832 = vmatprep.subr.bf16.mxu1 %v909_v21  ;;  %v951_v1 = vld [vmem:[%s1186_s1 + $0x1b0] sm:$0xff]   ;;  %v953_v3 = vld [vmem:[%s1186_s1 + $0x1f8] sm:$0xff]  }
  0x17   :  { %v954_v4 = vld [vmem:[%s1186_s1 + $0x138] sm:$0xff]   ;;  %v14_v6 = vld [vmem:[%s1187_s0 + $0x10] sm:$0xff] }
  0x18   :  { %811 = vmatpush3.bf16.msra.mxu0 %v910_v22  ;;  %v955_v5 = vld [vmem:[%s1186_s1 + $0x1b8] sm:$0xff]   ;;  %v731_v7 = vcombine.low %v14_v6, %v14_v6  ;;  %v732_v8 = vcombine.high %v14_v6, %v14_v6 }
  0x19   :  { %833 = vmatpush3.bf16.msra.mxu1 %v911_v23  ;;  %812 = vmatprep.subr.bf16.mxu0 %v912_v24  ;;  %v15_v9 = vld [vmem:[%s1187_s0 + $0x18] sm:$0xff] }
  0x1a   :  { %834 = vmatprep.subr.bf16.mxu1 %v913_v25  ;;  %v733_v10 = vcombine.low %v15_v9, %v15_v9  ;;  %v734_v11 = vcombine.high %v15_v9, %v15_v9 }
  0x1c   :  { %813 = vmatpush3.bf16.msra.mxu0 %v914_v26 }
  0x1d   :  { %835 = vmatpush3.bf16.msra.mxu1 %v915_v27  ;;  %814 = vmatprep.subr.bf16.mxu0 %v916_v28 }
  0x1e   :  { %836 = vmatprep.subr.bf16.mxu1 %v917_v29 }
  0x20   :  { %815 = vmatpush3.bf16.msra.mxu0 %v918_v30 }
  0x21   :  { %837 = vmatpush3.bf16.msra.mxu1 %v919_v31  ;;  %844 = vmatprep.subr.bf16.mxu0 %v924_v38 }
  0x22   :  { %866 = vmatprep.subr.bf16.mxu1 %v925_v39 }
  0x23   :  { %589 = vmatmul.mubr.bf16.vlgmr.msra.gmra.mrb[0].mxu0 %v727_v34 }
  0x24   :  { %629 = vmatmul.mubr.bf16.vlgmr.msra.gmra.mrb[0].mxu1 %v729_v36  ;;  %845 = vmatpush3.bf16.msra.mxu0 %v926_v40 }
  0x25   :  { %867 = vmatpush3.bf16.msra.mxu1 %v927_v41  ;;  %846 = vmatprep.subr.bf16.mxu0 %v928_v42 }
  0x26   :  { %868 = vmatprep.subr.bf16.mxu1 %v929_v43  ;;  %668 = vmatprep.mubr.bf16.mxu0 %v732_v8 }
  0x27   :  { %708 = vmatprep.mubr.bf16.mxu1 %v734_v11 }
  0x28   :  { %847 = vmatpush3.bf16.msra.mxu0 %v930_v44 }
  0x29   :  { %869 = vmatpush3.bf16.msra.mxu1 %v931_v45  ;;  %848 = vmatprep.subr.bf16.mxu0 %v932_v46 }
  0x2a   :  { %870 = vmatprep.subr.bf16.mxu1 %v933_v47 }
  0x2c   :  { %849 = vmatpush3.bf16.msra.mxu0 %v934_v48 }
  0x2d   :  { %871 = vmatpush3.bf16.msra.mxu1 %v935_v49  ;;  %850 = vmatprep.subr.bf16.mxu0 %v936_v50 }
  0x2e   :  { %872 = vmatprep.subr.bf16.mxu1 %v937_v51 }
  0x30   :  { %851 = vmatpush3.bf16.msra.mxu0 %v938_v52 }
  0x31   :  { %873 = vmatpush3.bf16.msra.mxu1 %v939_v53  ;;  %852 = vmatprep.subr.bf16.mxu0 %v940_v54 }
  0x32   :  { %874 = vmatprep.subr.bf16.mxu1 %v941_v55 }
  0x34   :  { %853 = vmatpush3.bf16.msra.mxu0 %v942_v56 }
  0x35   :  { %875 = vmatpush3.bf16.msra.mxu1 %v943_v57  ;;  %854 = vmatprep.subr.bf16.mxu0 %v944_v58 }
  0x36   :  { %876 = vmatprep.subr.bf16.mxu1 %v945_v59 }
  0x38   :  { %855 = vmatpush3.bf16.msra.mxu0 %v946_v60 }
  0x39   :  { %877 = vmatpush3.bf16.msra.mxu1 %v947_v61  ;;  %856 = vmatprep.subr.bf16.mxu0 %v948_v62 }
  0x3a   :  { %878 = vmatprep.subr.bf16.mxu1 %v949_v63 }
  0x3c   :  { %857 = vmatpush3.bf16.msra.mxu0 %v950_v0 }
  0x3d   :  { %879 = vmatpush3.bf16.msra.mxu1 %v951_v1  ;;  %858 = vmatprep.subr.bf16.mxu0 %v952_v2 }
  0x3e   :  { %880 = vmatprep.subr.bf16.mxu1 %v953_v3 }
  0x40   :  { %859 = vmatpush3.bf16.msra.mxu0 %v954_v4 }
  0x41   :  { %881 = vmatpush3.bf16.msra.mxu1 %v955_v5 }
  0x43   :  { %669 = vmatmul.mubr.bf16.vlgmr.msra.gmra.mrb[4].mxu0 %v731_v7 }
  0x44   :  { %709 = vmatmul.mubr.bf16.vlgmr.msra.gmra.mrb[4].mxu1 %v733_v10 }
  0xf6   :  { %v816_v12 = vpop.f32.mrb[0].mxu0 }
  0xf7   :  { %v838_v13 = vpop.f32.mrb[0].mxu1  ;;  %v817_v14 = vpop.f32.mrb[1].mxu0 }
  0xf8   :  { %v839_v15 = vpop.f32.mrb[1].mxu1  ;;  %v818_v16 = vadd.f32 %v817_v14, %v816_v12  ;;  %v819_v18 = vpop.f32.mrb[2].mxu0 }
  0xf9   :  { %v840_v17 = vadd.f32 %v839_v15, %v838_v13  ;;  %v841_v19 = vpop.f32.mrb[2].mxu1  ;;  %v820_v20 = vpop.f32.mrb[3].mxu0 }
  0xfa   :  { %v842_v21 = vpop.f32.mrb[3].mxu1 }
  0xfb   :  { %v631_v22 = vadd.f32 %v840_v17, %v818_v16 }
 0x116   :  { %v860_v23 = vpop.f32.mrb[4].mxu0 }
 0x117   :  { %v882_v24 = vpop.f32.mrb[4].mxu1  ;;  %v861_v25 = vpop.f32.mrb[5].mxu0 }
 0x118   :  { %v883_v26 = vpop.f32.mrb[5].mxu1  ;;  %v862_v27 = vadd.f32 %v861_v25, %v860_v23  ;;  %v863_v29 = vpop.f32.mrb[6].mxu0 }
 0x119   :  { %v884_v28 = vadd.f32 %v883_v26, %v882_v24  ;;  %v885_v30 = vpop.f32.mrb[6].mxu1  ;;  %v864_v31 = vpop.f32.mrb[7].mxu0 }
 0x11a   :  { %v886_v32 = vpop.f32.mrb[7].mxu1  ;;  %v671_v33 = vadd.f32 %v862_v27, %v631_v22 }
 0x11c   :  { %v711_v34 = vadd.f32 %v884_v28, %v671_v33 }
 0x11e   :  { %v799_v35 = vmul.f32 -1.442695, %v711_v34 }
 0x120   :  { %960 = vpow2.f32 %v799_v35 }
 0x12a   :  { %v961_v36 = vpop.eup %960 }
 0x12b   :  { %v719_v37 = vadd.f32 1.0, %v961_v36 }
 0x12d   :  { %962 = vrcp.f32 %v719_v37 }
 0x137   :  { %v963_v38 = vpop.eup %962 }
 0x138   :  { %722 = vst [vmem:[%s1188_s2] sm:$0xff] %v963_v38 }

</bundles_post_ra>
